<compile_context>
chip_gen: v7x
topology: tpu7x:2x2x1
jax: 0.10.0
libtpu: 0.0.40
codegen_flags: <defaults>
</compile_context>

<pallas_src>
import functools
import math

import jax
import jax.numpy as jnp
from jax.experimental import pallas as pl
from jax.experimental.pallas import tpu as pltpu


# ------------------------------- helpers -------------------------------------

def _round_up(x, m):
    return ((x + m - 1) // m) * m


def _default_mm_tm():
    # v5e's default scoped-VMEM budget is the smallest; use a 256-row tile there.
    try:
        kind = jax.devices()[0].device_kind.lower()
    except Exception:
        return 512
    if "v5 lite" in kind or "v5e" in kind:
        return 256
    return 512


_MM_TM = _default_mm_tm()   # row tile for matmul-style kernels
_LSTM_TT = 128              # time tile for the LSTM recurrence
_LSTM_UNROLL = 4            # in-kernel unroll of the recurrence
_FIR_TB = 256               # lane-dense time block for the sinc FIR resampler
_NORM_TT = 8192             # time tile for the normalization reduction


def _pick_tm(m, tm_max):
    """Balanced row tile: multiple of 8 (sublane), <= tm_max, >= 2 grid steps
    when possible (keeps both v7x TensorCores busy), minimal ragged waste."""
    if m <= 8:
        return m                       # single block equal to the full dim
    nblk = max(2, pl.cdiv(m, tm_max))
    return max(8, min(tm_max, _round_up(pl.cdiv(m, nblk), 8)))


def _vmem_limit(need_bytes):
    # headroom for compiler scratch; clamp below v7x's 64 MiB physical VMEM.
    return int(min(max(need_bytes + (8 << 20), 32 << 20), 56 << 20))


def _cparams(semantics, need_bytes):
    return pltpu.CompilerParams(dimension_semantics=semantics,
                                vmem_limit_bytes=_vmem_limit(need_bytes))


def _const_spec(shape):
    """BlockSpec for a grid-invariant operand; single-buffered when supported
    (no point double-buffering a block whose index never changes)."""
    idx = lambda *_: tuple(0 for _ in shape)
    try:
        return pl.BlockSpec(shape, idx, pipeline_mode=pl.Buffered(1))
    except Exception:                  # older jax without pipeline_mode
        return pl.BlockSpec(shape, idx)


# --------------------------- generic tiled matmul ----------------------------

def _mm_act_kernel(x_ref, w_ref, b_ref, o_ref, *, act):
    y = jnp.dot(x_ref[...], w_ref[...], preferred_element_type=jnp.float32)
    y = y + b_ref[...]
    if act == "relu":
        y = jnp.maximum(y, 0.0)
    elif act == "glu":
        h = y.shape[-1] // 2
        y = y[:, :h] * jax.nn.sigmoid(y[:, h:])
    o_ref[...] = y.astype(o_ref.dtype)


def mm_act(x, w, b, act="none", operand_dtype=None, out_dtype=jnp.float32,
           tm=None):
    """o = act(x @ w + b): row-tiled grid, f32 accumulation, ragged last block
    (no pad / slice HBM round trip).  GLU halves N."""
    if tm is None:
        tm = _MM_TM
    M, K = x.shape
    N = w.shape[1]
    out_n = N // 2 if act == "glu" else N
    if operand_dtype is not None:
        x = x.astype(operand_dtype)
        w = w.astype(operand_dtype)
    TM = _pick_tm(M, tm)
    need = (2 * TM * K * x.dtype.itemsize                    # x, double-buffered
            + K * N * w.dtype.itemsize + 4 * N               # weights (Buffered(1))
            + 2 * TM * out_n * jnp.dtype(out_dtype).itemsize  # out
            + 4 * TM * N)                                    # f32 temporaries
    return pl.pallas_call(
        functools.partial(_mm_act_kernel, act=act),
        out_shape=jax.ShapeDtypeStruct((M, out_n), out_dtype),
        grid=(pl.cdiv(M, TM),),
        in_specs=[pl.BlockSpec((TM, K), lambda i: (i, 0)),
                  _const_spec((K, N)),
                  _const_spec((1, N))],
        out_specs=pl.BlockSpec((TM, out_n), lambda i: (i, 0)),
        compiler_params=_cparams(("parallel",), need),
    )(x, w, b.reshape(1, N).astype(jnp.float32))


# --------------------- fused encoder / decoder kernels -----------------------

def _encode_fused_kernel(c_ref, w1_ref, b1_ref, w2_ref, b2_ref, o_ref, *, cout):
    # Conv1d(K, stride) as im2col matmul + bias + ReLU, then 1x1 conv + GLU,
    # all on the same row tile (intermediate h never leaves VMEM).
    h = jnp.dot(c_ref[...], w1_ref[...], preferred_element_type=jnp.float32)
    h = jnp.maximum(h + b1_ref[...], 0.0)
    g = jnp.dot(h.astype(w2_ref.dtype), w2_ref[...],
                preferred_element_type=jnp.float32)
    g = g + b2_ref[...]
    o_ref[...] = (g[:, :cout] * jax.nn.sigmoid(g[:, cout:])).astype(o_ref.dtype)


def encode_fused(cols, w1, b1, w2, b2, tm=None):
    if tm is None:
        tm = _MM_TM
    M, Kd = cols.shape
    Cout = w1.shape[1]
    TM = _pick_tm(M, tm)
    need = (2 * TM * Kd * 2                          # bf16 cols, double-buffered
            + Kd * Cout * 2 + 2 * Cout * Cout * 4    # bf16 weights (Buffered(1))
            + 2 * TM * Cout * 2                      # bf16 output
            + 4 * TM * (3 * Cout) + 16 * Cout)       # f32 temporaries h, g
    return pl.pallas_call(
        functools.partial(_encode_fused_kernel, cout=Cout),
        out_shape=jax.ShapeDtypeStruct((M, Cout), jnp.bfloat16),
        grid=(pl.cdiv(M, TM),),
        in_specs=[pl.BlockSpec((TM, Kd), lambda i: (i, 0)),
                  _const_spec((Kd, Cout)),
                  _const_spec((1, Cout)),
                  _const_spec((Cout, 2 * Cout)),
                  _const_spec((1, 2 * Cout))],
        out_specs=pl.BlockSpec((TM, Cout), lambda i: (i, 0)),
        compiler_params=_cparams(("parallel",), need),
    )(cols.astype(jnp.bfloat16), w1.astype(jnp.bfloat16),
      b1.reshape(1, Cout).astype(jnp.float32),
      w2.astype(jnp.bfloat16), b2.reshape(1, 2 * Cout).astype(jnp.float32))


def _decode_fused_kernel(x_ref, w1_ref, b1_ref, wt_ref, o_ref, *, c):
    # 1x1 conv + GLU, then the ConvTranspose1d matmul (h @ (C, Cout*K)),
    # fused on the row tile; overlap-add / bias happen outside.
    g = jnp.dot(x_ref[...], w1_ref[...], preferred_element_type=jnp.float32)
    g = g + b1_ref[...]
    h = g[:, :c] * jax.nn.sigmoid(g[:, c:])
    y = jnp.dot(h.astype(wt_ref.dtype), wt_ref[...],
                preferred_element_type=jnp.float32)
    o_ref[...] = y.astype(o_ref.dtype)


def decode_fused(x2d, w1, b1, wt, tm=None):
    if tm is None:
        tm = _MM_TM
    M, C = x2d.shape
    Nout = wt.shape[1]
    TM = _pick_tm(M, tm)
    need = (2 * TM * C * 2                           # bf16 x, double-buffered
            + 2 * C * C * 2 * 2 + int(wt.size) * 2   # bf16 weights (Buffered(1))
            + 2 * TM * Nout * 4                      # f32 output
            + 4 * TM * (3 * C + Nout) + 8 * C)       # f32 temporaries g, h, y
    return pl.pallas_call(
        functools.partial(_decode_fused_kernel, c=C),
        out_shape=jax.ShapeDtypeStruct((M, Nout), jnp.float32),
        grid=(pl.cdiv(M, TM),),
        in_specs=[pl.BlockSpec((TM, C), lambda i: (i, 0)),
                  _const_spec((C, 2 * C)),
                  _const_spec((1, 2 * C)),
                  _const_spec((C, Nout))],
        out_specs=pl.BlockSpec((TM, Nout), lambda i: (i, 0)),
        compiler_params=_cparams(("parallel",), need),
    )(x2d.astype(jnp.bfloat16), w1.astype(jnp.bfloat16),
      b1.reshape(1, 2 * C).astype(jnp.float32), wt.astype(jnp.bfloat16))


# --------------------------------- LSTM ---------------------------------------

def _lstm_layer_kernel(xg_ref, whh_ref, y_ref, h_ref, c_ref, *, TT, H, unroll):
    # xg_ref: (TT, B, 4H) = x @ W_ih^T + b_ih + b_hh (precomputed, tiled in time)
    # whh_ref: (H, 4H) bf16; gate order i, f, g, o (PyTorch).  h/c scratch (f32)
    # persists across grid steps, so the recurrence streams through time tiles.
    @pl.when(pl.program_id(0) == 0)
    def _():
        h_ref[...] = jnp.zeros_like(h_ref)
        c_ref[...] = jnp.zeros_like(c_ref)

    @pl.loop(0, TT // unroll)
    def _(tb):
        for u in range(unroll):          # unrolled: scheduler hides casts/stores
            t = tb * unroll + u
            g = xg_ref[t] + jnp.dot(h_ref[...].astype(whh_ref.dtype),
                                    whh_ref[...],
                                    preferred_element_type=jnp.float32)
            i = jax.nn.sigmoid(g[:, 0:H])
            f = jax.nn.sigmoid(g[:, H:2 * H])
            gg = jnp.tanh(g[:, 2 * H:3 * H])
            o = jax.nn.sigmoid(g[:, 3 * H:4 * H])
            c = f * c_ref[...] + i * gg
            h = o * jnp.tanh(c)
            c_ref[...] = c
            h_ref[...] = h
            y_ref[t] = h.astype(y_ref.dtype)


def lstm_layer(xg, whh_t, tt=_LSTM_TT, unroll=_LSTM_UNROLL):
    """xg: (T, B, 4H) precomputed input projection; whh_t: (H, 4H)."""
    T, B, H4 = xg.shape
    H = H4 // 4
    TT = min(tt, _round_up(T, unroll))
    Tp = _round_up(T, TT)
    if Tp != T:
        xg = jnp.pad(xg, ((0, Tp - T), (0, 0), (0, 0)))
    need = (2 * TT * B * H4 * 4 + H * H4 * 2 + 2 * TT * B * H * 4
            + 2 * B * H * 4 + 8 * B * H4 * 4)
    y = pl.pallas_call(
        functools.partial(_lstm_layer_kernel, TT=TT, H=H, unroll=unroll),
        out_shape=jax.ShapeDtypeStruct((Tp, B, H), jnp.float32),
        grid=(Tp // TT,),
        in_specs=[pl.BlockSpec((TT, B, H4), lambda i: (i, 0, 0)),
                  _const_spec((H, H4))],
        out_specs=pl.BlockSpec((TT, B, H), lambda i: (i, 0, 0)),
        scratch_shapes=[pltpu.VMEM((B, H), jnp.float32),
                        pltpu.VMEM((B, H), jnp.float32)],
        compiler_params=_cparams(("arbitrary",), need),
    )(xg, whh_t.astype(jnp.bfloat16))
    return y[:T]


# ----------------------------- normalization ----------------------------------

def _norm_stats_kernel(x_ref, s1_ref, s2_ref, *, inv_c):
    @pl.when(pl.program_id(0) == 0)
    def _():
        s1_ref[...] = jnp.zeros_like(s1_ref)
        s2_ref[...] = jnp.zeros_like(s2_ref)
    x = x_ref[...].astype(jnp.float32)                    # (B, C, TT)
    mono = jnp.sum(x, axis=1) * inv_c                     # (B, TT)
    s1_ref[...] += jnp.sum(mono, axis=-1, keepdims=True)  # running sum
    s2_ref[...] += jnp.sum(mono * mono, axis=-1, keepdims=True)


def normalize(x, floor):
    """Streaming mean / unbiased std of the mono mix; returns x/(floor+std), std."""
    B, C, T = x.shape
    TT = T if T <= _NORM_TT else _NORM_TT
    Tp = _round_up(T, TT)
    xp = jnp.pad(x, ((0, 0), (0, 0), (0, Tp - T))) if Tp != T else x
    need = 2 * B * C * TT * x.dtype.itemsize + 8 * B * C * TT + 256
    s1, s2 = pl.pallas_call(
        functools.partial(_norm_stats_kernel, inv_c=1.0 / C),
        out_shape=(jax.ShapeDtypeStruct((B, 1), jnp.float32),
                   jax.ShapeDtypeStruct((B, 1), jnp.float32)),
        grid=(Tp // TT,),
        in_specs=[pl.BlockSpec((B, C, TT), lambda j: (0, 0, j))],
        out_specs=(pl.BlockSpec((B, 1), lambda j: (0, 0)),
                   pl.BlockSpec((B, 1), lambda j: (0, 0))),
        compiler_params=_cparams(("arbitrary",), need),
    )(xp)
    mean = s1 / T
    var = jnp.maximum(s2 - T * mean * mean, 0.0) / max(T - 1, 1)  # unbiased std
    std = jnp.sqrt(var).reshape(B, 1, 1).astype(x.dtype)
    return x / (floor + std), std


# ----------------------------- sinc resampling --------------------------------

def make_resample_kernel(zeros=56, dtype=jnp.float32):
    # identical formula for kernel_upsample2 / kernel_downsample2
    n = 4 * zeros + 1
    idx = jnp.arange(n, dtype=dtype)
    win = 0.5 * (1.0 - jnp.cos(2.0 * jnp.pi * idx / (n - 1)))   # hann, periodic=False
    winodd = win[1::2]
    t = jnp.linspace(-zeros + 0.5, zeros - 0.5, 2 * zeros, dtype=dtype) * jnp.pi
    s = jnp.where(t == 0, jnp.ones((), dtype), jnp.sin(t) / t)
    return (s * winodd).astype(dtype)                            # (2*zeros,)


def _fir_banded_weight(ker, width, tb):
    """W[m, l] = ker[m - l] if 0 <= m - l < ntaps else 0.  Shape (width, tb)."""
    ntaps = ker.shape[0]
    m = jnp.arange(width)[:, None]
    l = jnp.arange(tb)[None, :]
    k = m - l
    valid = (k >= 0) & (k < ntaps)
    return jnp.where(valid, ker[jnp.clip(k, 0, ntaps - 1)], 0.0)


def fir_rows(xsig, ker, off, zeros=56, tb=_FIR_TB):
    """Lane-dense sinc FIR on (R, T) rows.
    out[:, i] = sum_k ker[k] * pad(xsig, zeros)[:, i + off + k], i in [0, T).
    Implemented as a banded (width, tb) matmul so tb output samples occupy the
    lane dim; bf16 operands with f32 accumulation."""
    R, T = xsig.shape
    ntaps = ker.shape[0]
    nblk = pl.cdiv(T, tb)
    Tp = nblk * tb
    width = tb + ntaps - 1
    right = (Tp - T) + zeros + 1            # enough zero right-padding for all windows
    xp = jnp.pad(xsig.astype(jnp.bfloat16), ((0, 0), (zeros, right)))
    starts = jnp.arange(nblk) * tb + off
    idx = starts[:, None] + jnp.arange(width)[None, :]            # (nblk, width)
    cols = xp[:, idx].reshape(R * nblk, width)
    wm = _fir_banded_weight(ker, width, tb)                       # (width, tb)
    out = mm_act(cols, wm, jnp.zeros((tb,), jnp.float32), "none",
                 operand_dtype=jnp.bfloat16)                      # f32 accumulate
    return out.reshape(R, Tp)[:, :T]


def upsample2_p(x, ker, zeros=56):
    """x: (B, C, T) -> (B, C, 2T) (matches upsample2: conv then drop output[0])."""
    B, C, T = x.shape
    flat = x.reshape(B * C, T)
    interp = fir_rows(flat, ker, off=1, zeros=zeros)
    return jnp.stack([flat, interp], axis=-1).reshape(B, C, 2 * T)


def downsample2_p(x, ker, zeros=56):
    """x: (B, C, T) -> (B, C, ceil(T/2)) (matches downsample2: drop output[-1])."""
    B, C, T = x.shape
    if T % 2 != 0:
        x = jnp.pad(x, ((0, 0), (0, 0), (0, 1)))
        T += 1
    t = T // 2
    xeven = x[..., ::2].reshape(B * C, t)
    xodd = x[..., 1::2].reshape(B * C, t)
    conv = fir_rows(xodd, ker, off=0, zeros=zeros)
    return ((xeven + conv) * 0.5).reshape(B, C, t)


# --------------------------- encoder / decoder layers -------------------------

def encode_layer(x, w1, b1, w2, b2, K, stride):
    """x: (B, T, Cin) -> (B, Tout, Cout). Conv1d(K,stride)+ReLU + 1x1+GLU, fused."""
    B, T, Cin = x.shape
    Cout = w1.shape[0]
    Tout = (T - K) // stride + 1
    xb = x.astype(jnp.bfloat16)                          # cast BEFORE the gather
    idx = jnp.arange(Tout)[:, None] * stride + jnp.arange(K)[None, :]
    cols = xb[:, idx, :].reshape(B * Tout, Cin * K if Cin == 1 else K * Cin)
    # cols are in (k, cin)-minor order: reorder the (small, static) weight instead
    # of transposing the im2col tensor.
    w1m = jnp.transpose(w1, (2, 1, 0)).reshape(K * Cin, Cout)
    w2m = w2[:, :, 0].T                                  # (Cout, 2*Cout)
    y = encode_fused(cols, w1m, b1, w2m, b2)             # (B*Tout, Cout) bf16
    return y.reshape(B, Tout, Cout)


def decode_layer(x, w1, b1, wt, bt, K, stride, relu):
    """x: (B, T, C) -> (B, (T-1)*stride+K, Cout). 1x1+GLU + ConvTranspose1d."""
    B, T, C = x.shape
    Cout = wt.shape[1]
    w1m = w1[:, :, 0].T                                  # (C, 2C)
    wtm = wt.reshape(C, Cout * K)                        # (C, Cout*K)
    y = decode_fused(x.astype(jnp.bfloat16).reshape(B * T, C), w1m, b1, wtm)
    y = y.reshape(B, T, Cout, K)
    L = (T - 1) * stride + K
    if K % stride == 0:
        # overlap-add as K//stride shifted pad+adds (2 for K=8, stride=4)
        nseg = K // stride
        yseg = y.reshape(B, T, Cout, nseg, stride)
        out = jnp.zeros((B, L, Cout), jnp.float32)
        for s in range(nseg):
            seg = yseg[:, :, :, s, :].transpose(0, 1, 3, 2)   # (B, T, stride, Cout)
            seg = seg.reshape(B, T * stride, Cout)
            seg = jnp.pad(seg, ((0, 0),
                                (s * stride, L - s * stride - T * stride),
                                (0, 0)))
            out = out + seg
    else:  # generic fallback (not hit for Demucs defaults)
        out = jnp.zeros((B, L, Cout), jnp.float32)
        for k in range(K):
            out = out.at[:, k:(T - 1) * stride + k + 1:stride, :].add(y[:, :, :, k])
    out = out + bt[None, None, :]
    if relu:                                             # static Python bool
        out = jnp.maximum(out, 0.0)
    return out


# -------------------------------- parameters ----------------------------------

def _rescale(w, b, reference):
    std = jnp.std(w, ddof=1)
    scale = jnp.sqrt(std / reference)
    return w / scale, b / scale


def init_demucs_params(key, cfg):
    chin, chout, hidden = cfg["chin"], cfg["chout"], cfg["hidden"]
    depth, K, growth = cfg["depth"], cfg["kernel_size"], cfg["growth"]
    max_hidden, ref = cfg["max_hidden"], cfg["rescale"]
    keys = list(jax.random.split(key, 16 * depth + 16))
    kcount = iter(range(len(keys)))

    def unif(shape, bound):
        return jax.random.uniform(keys[next(kcount)], shape, jnp.float32,
                                  -bound, bound)

    enc, dec = [], []
    for index in range(depth):
        bnd1 = 1.0 / math.sqrt(chin * K)
        w_e1 = unif((hidden, chin, K), bnd1)
        be1 = unif((hidden,), bnd1)
        bnd2 = 1.0 / math.sqrt(hidden)
        w_e2 = unif((2 * hidden, hidden, 1), bnd2)
        be2 = unif((2 * hidden,), bnd2)
        w_e1, be1 = _rescale(w_e1, be1, ref)
        w_e2, be2 = _rescale(w_e2, be2, ref)
        enc.append((w_e1, be1, w_e2, be2))

        w_d1 = unif((2 * hidden, hidden, 1), bnd2)
        bd1 = unif((2 * hidden,), bnd2)
        bndt = 1.0 / math.sqrt(hidden * K)
        w_dt = unif((hidden, chout, K), bndt)            # ConvTranspose1d weight
        bdt = unif((chout,), bndt)
        w_d1, bd1 = _rescale(w_d1, bd1, ref)
        w_dt, bdt = _rescale(w_dt, bdt, ref)
        # NOTE: no relu flag stored here (would become a traced bool under jit);
        # the ReLU placement is derived statically in demucs_forward.
        dec.insert(0, (w_d1, bd1, w_dt, bdt))

        chout = hidden
        chin = hidden
        hidden = min(int(growth * hidden), max_hidden)

    dim = chin                                           # LSTM dim
    lstm = []
    bnd = 1.0 / math.sqrt(dim)
    for _ in range(2):                                   # 2 unidirectional layers
        w_ih = unif((4 * dim, dim), bnd)
        w_hh = unif((4 * dim, dim), bnd)
        b_ih = unif((4 * dim,), bnd)
        b_hh = unif((4 * dim,), bnd)
        lstm.append((w_ih.T, w_hh.T, b_ih + b_hh))
    return {"enc": enc, "dec": dec, "lstm": lstm}


def valid_length(length, depth, kernel_size, stride, resample):
    length = math.ceil(length * resample)
    for _ in range(depth):
        length = math.ceil((length - kernel_size) / stride) + 1
        length = max(length, 1)
    for _ in range(depth):
        length = (length - 1) * stride + kernel_size
    return int(math.ceil(length / resample))


# --------------------------------- forward ------------------------------------

def demucs_forward(params, mix, cfg):
    depth, K, stride = cfg["depth"], cfg["kernel_size"], cfg["stride"]
    resample, floor = cfg["resample"], cfg["floor"]
    if mix.ndim == 2:
        mix = mix[:, None, :]                            # (B, 1, T)
    if cfg["normalize"]:
        mix, std = normalize(mix, floor)
    else:
        std = jnp.ones((mix.shape[0], 1, 1), mix.dtype)
    length = mix.shape[-1]
    pad = valid_length(length, depth, K, stride, resample) - length
    x = jnp.pad(mix, ((0, 0), (0, 0), (0, pad)))

    rk = make_resample_kernel()
    if resample >= 2:
        x = upsample2_p(x, rk)
    if resample == 4:
        x = upsample2_p(x, rk)

    x = jnp.transpose(x, (0, 2, 1))                      # (B, T, C)
    skips = []
    for (w1, b1, w2, b2) in params["enc"]:
        x = encode_layer(x, w1, b1, w2, b2, K, stride)
        skips.append(x)

    # LSTM (causal -> unidirectional, 2 layers, no output linear)
    x = jnp.transpose(x, (1, 0, 2))                      # (T, B, D)
    T, B, D = x.shape
    for (w_ih_t, w_hh_t, bias) in params["lstm"]:
        xg = mm_act(x.reshape(T * B, D), w_ih_t, bias, "none",
                    operand_dtype=jnp.bfloat16).reshape(T, B, 4 * D)
        x = lstm_layer(xg, w_hh_t)
    x = jnp.transpose(x, (1, 0, 2))                      # (B, T, D)

    n_dec = len(params["dec"])
    for li, (w1, b1, wt, bt) in enumerate(params["dec"]):
        skip = skips.pop()
        x = x + skip[:, :x.shape[1], :]
        relu = li < n_dec - 1        # PyTorch: ReLU on all decoders except the last
        x = decode_layer(x, w1, b1, wt, bt, K, stride, relu)

    x = jnp.transpose(x, (0, 2, 1))                      # (B, Cout, T)
    if resample >= 2:
        x = downsample2_p(x, rk)
    if resample == 4:
        x = downsample2_p(x, rk)
    x = x[..., :length]
    return std * x


# ----------------------------------- main --------------------------------------

if __name__ == "__main__":
    cfg = dict(chin=1, chout=1, hidden=8, depth=3, kernel_size=8, stride=4,
               causal=True, resample=4, growth=2, max_hidden=10000,
               normalize=True, glu=True, rescale=0.1, floor=1e-3)
    key = jax.random.PRNGKey(0)
    pkey, xkey = jax.random.split(key)
    params = init_demucs_params(pkey, cfg)

    B, length = 2, 64
    mix = jax.random.normal(xkey, (B, length), jnp.float32)   # 2-D -> unsqueeze(1)

    fwd = jax.jit(functools.partial(demucs_forward, cfg=cfg))
    out = fwd(params, mix)
    out = jax.block_until_ready(out)
    assert out.shape == (B, cfg["chout"], length), out.shape
    assert bool(jnp.all(jnp.isfinite(out)))
    print("KERNEL_OK")
</pallas_src>

<mosaic_0001>
module attributes {stable_mosaic.version = 11 : i64} {
  func.func @_norm_stats_kernel(%arg0: i32, %arg1: memref<2x1x64xf32, #tpu.memory_space<vmem>>, %arg2: memref<2x1xf32, #tpu.memory_space<vmem>>, %arg3: memref<2x1xf32, #tpu.memory_space<vmem>>) attributes {dimension_semantics = [#tpu.dimension_semantics<arbitrary>], iteration_bounds = array<i64: 1>, scalar_prefetch = 0 : i64, scratch_operands = 0 : i64, tpu.core_type = #tpu.core_type<tc>, window_params = [{transform_indices = @transform_0, window_bounds = array<i64: 2, 1, 64>}, {pipeline_mode = #tpu.pipeline_mode<synchronous>, transform_indices = @transform_1, window_bounds = array<i64: 2, 1>}, {pipeline_mode = #tpu.pipeline_mode<synchronous>, transform_indices = @transform_2, window_bounds = array<i64: 2, 1>}]} {
    %c0_i32 = arith.constant 0 : i32
    %0 = arith.cmpi eq, %arg0, %c0_i32 : i32
    %1 = arith.extui %0 : i1 to i32
    %c0_i32_0 = arith.constant 0 : i32
    %2 = arith.cmpi ne, %1, %c0_i32_0 : i32
    scf.if %2 {
      %cst_14 = arith.constant 0.000000e+00 : f32
      %18 = vector.broadcast %cst_14 : f32 to vector<2x1xf32>
      %c0_15 = arith.constant 0 : index
      %c0_16 = arith.constant 0 : index
      %19 = vector.load %arg2[%c0_15, %c0_16] : memref<2x1xf32, #tpu.memory_space<vmem>>, vector<2x1xf32>
      tpu.vector_store %arg2[%c0_15, %c0_16], %18 {strides = array<i32>} : memref<2x1xf32, #tpu.memory_space<vmem>>, vector<2x1xf32>,
      %cst_17 = arith.constant 0.000000e+00 : f32
      %20 = vector.broadcast %cst_17 : f32 to vector<2x1xf32>
      %c0_18 = arith.constant 0 : index
      %c0_19 = arith.constant 0 : index
      %21 = vector.load %arg3[%c0_18, %c0_19] : memref<2x1xf32, #tpu.memory_space<vmem>>, vector<2x1xf32>
      tpu.vector_store %arg3[%c0_18, %c0_19], %20 {strides = array<i32>} : memref<2x1xf32, #tpu.memory_space<vmem>>, vector<2x1xf32>,
    } else {
    }
    %c0 = arith.constant 0 : index
    %c0_1 = arith.constant 0 : index
    %c0_2 = arith.constant 0 : index
    %3 = vector.load %arg1[%c0, %c0_1, %c0_2] : memref<2x1x64xf32, #tpu.memory_space<vmem>>, vector<2x1x64xf32>
    %cst = arith.constant dense<0.000000e+00> : vector<2x64xf32>
    %4 = vector.multi_reduction <add>, %3, %cst [1] : vector<2x1x64xf32> to vector<2x64xf32>
    %cst_3 = arith.constant 1.000000e+00 : f32
    %5 = vector.broadcast %cst_3 : f32 to vector<2x64xf32>
    %6 = arith.mulf %4, %5 : vector<2x64xf32>
    %c0_4 = arith.constant 0 : index
    %c0_5 = arith.constant 0 : index
    %7 = vector.load %arg2[%c0_4, %c0_5] : memref<2x1xf32, #tpu.memory_space<vmem>>, vector<2x1xf32>
    %cst_6 = arith.constant dense<0.000000e+00> : vector<2xf32>
    %8 = vector.multi_reduction <add>, %6, %cst_6 [1] : vector<2x64xf32> to vector<2xf32>
    %9 = vector.shape_cast %8 : vector<2xf32> to vector<2x1xf32>
    %10 = arith.addf %7, %9 : vector<2x1xf32>
    %c0_7 = arith.constant 0 : index
    %c0_8 = arith.constant 0 : index
    %11 = vector.load %arg2[%c0_7, %c0_8] : memref<2x1xf32, #tpu.memory_space<vmem>>, vector<2x1xf32>
    tpu.vector_store %arg2[%c0_7, %c0_8], %10 {strides = array<i32>} : memref<2x1xf32, #tpu.memory_space<vmem>>, vector<2x1xf32>,
    %c0_9 = arith.constant 0 : index
    %c0_10 = arith.constant 0 : index
    %12 = vector.load %arg3[%c0_9, %c0_10] : memref<2x1xf32, #tpu.memory_space<vmem>>, vector<2x1xf32>
    %13 = arith.mulf %6, %6 : vector<2x64xf32>
    %cst_11 = arith.constant dense<0.000000e+00> : vector<2xf32>
    %14 = vector.multi_reduction <add>, %13, %cst_11 [1] : vector<2x64xf32> to vector<2xf32>
    %15 = vector.shape_cast %14 : vector<2xf32> to vector<2x1xf32>
    %16 = arith.addf %12, %15 : vector<2x1xf32>
    %c0_12 = arith.constant 0 : index
    %c0_13 = arith.constant 0 : index
    %17 = vector.load %arg3[%c0_12, %c0_13] : memref<2x1xf32, #tpu.memory_space<vmem>>, vector<2x1xf32>
    tpu.vector_store %arg3[%c0_12, %c0_13], %16 {strides = array<i32>} : memref<2x1xf32, #tpu.memory_space<vmem>>, vector<2x1xf32>,
    return
  }
  func.func @transform_0(%arg0: i32) -> (i32, i32, i32) {
    %c0_i32 = arith.constant 0 : i32
    %c0_i32_0 = arith.constant 0 : i32
    %c0_i32_1 = arith.constant 0 : i32
    return %c0_i32, %c0_i32_0, %arg0 : i32, i32, i32
  }
  func.func @transform_1(%arg0: i32) -> (i32, i32) {
    %c0_i32 = arith.constant 0 : i32
    %c0_i32_0 = arith.constant 0 : i32
    %c0_i32_1 = arith.constant 0 : i32
    return %c0_i32, %c0_i32_0 : i32, i32
  }
  func.func @transform_2(%arg0: i32) -> (i32, i32) {
    %c0_i32 = arith.constant 0 : i32
    %c0_i32_0 = arith.constant 0 : i32
    %c0_i32_1 = arith.constant 0 : i32
    return %c0_i32, %c0_i32_0 : i32, i32
  }
}

module attributes {stable_mosaic.version = 11 : i64} {
  func.func @_mm_act_kernel(%arg0: i32, %arg1: memref<2x367xbf16, #tpu.memory_space<vmem>>, %arg2: memref<367x256xbf16, #tpu.memory_space<vmem>>, %arg3: memref<1x256xf32, #tpu.memory_space<vmem>>, %arg4: memref<2x256xf32, #tpu.memory_space<vmem>>) attributes {dimension_semantics = [#tpu.dimension_semantics<parallel>], iteration_bounds = array<i64: 1>, scalar_prefetch = 0 : i64, scratch_operands = 0 : i64, tpu.core_type = #tpu.core_type<tc>, window_params = [{transform_indices = @transform_0, window_bounds = array<i64: 2, 367>}, {pipeline_mode = #tpu.pipeline_mode<synchronous>, transform_indices = @transform_1, window_bounds = array<i64: 367, 256>}, {pipeline_mode = #tpu.pipeline_mode<synchronous>, transform_indices = @transform_2, window_bounds = array<i64: 1, 256>}, {transform_indices = @transform_3, window_bounds = array<i64: 2, 256>}]} {
    %c0 = arith.constant 0 : index
    %c0_0 = arith.constant 0 : index
    %0 = vector.load %arg1[%c0, %c0_0] : memref<2x367xbf16, #tpu.memory_space<vmem>>, vector<2x367xbf16>
    %c0_1 = arith.constant 0 : index
    %c0_2 = arith.constant 0 : index
    %1 = vector.load %arg2[%c0_1, %c0_2] : memref<367x256xbf16, #tpu.memory_space<vmem>>, vector<367x256xbf16>
    %cst = arith.constant dense<0.000000e+00> : vector<2x256xf32>
    %2 = tpu.matmul %0, %1, %cst {dimension_numbers = #tpu.dot_dimension_numbers<[1], [0], [0], [1], [0, 0, 1, 1], [], []>} : vector<2x367xbf16>, vector<367x256xbf16>, vector<2x256xf32> -> vector<2x256xf32>
    %c0_3 = arith.constant 0 : index
    %c0_4 = arith.constant 0 : index
    %3 = vector.load %arg3[%c0_3, %c0_4] : memref<1x256xf32, #tpu.memory_space<vmem>>, vector<1x256xf32>
    %4 = vector.broadcast %3 : vector<1x256xf32> to vector<2x256xf32>
    %5 = arith.addf %2, %4 : vector<2x256xf32>
    %c0_5 = arith.constant 0 : index
    %c0_6 = arith.constant 0 : index
    %6 = vector.load %arg4[%c0_5, %c0_6] : memref<2x256xf32, #tpu.memory_space<vmem>>, vector<2x256xf32>
    tpu.vector_store %arg4[%c0_5, %c0_6], %5 {strides = array<i32>} : memref<2x256xf32, #tpu.memory_space<vmem>>, vector<2x256xf32>,
    return
  }
  func.func @transform_0(%arg0: i32) -> (i32, i32) {
    %c0_i32 = arith.constant 0 : i32
    %c0_i32_0 = arith.constant 0 : i32
    return %arg0, %c0_i32 : i32, i32
  }
  func.func @transform_1(%arg0: i32) -> (i32, i32) {
    %c0_i32 = arith.constant 0 : i32
    %c0_i32_0 = arith.constant 0 : i32
    %c0_i32_1 = arith.constant 0 : i32
    return %c0_i32, %c0_i32_0 : i32, i32
  }
  func.func @transform_2(%arg0: i32) -> (i32, i32) {
    %c0_i32 = arith.constant 0 : i32
    %c0_i32_0 = arith.constant 0 : i32
    %c0_i32_1 = arith.constant 0 : i32
    return %c0_i32, %c0_i32_0 : i32, i32
  }
  func.func @transform_3(%arg0: i32) -> (i32, i32) {
    %c0_i32 = arith.constant 0 : i32
    %c0_i32_0 = arith.constant 0 : i32
    return %arg0, %c0_i32 : i32, i32
  }
}

module attributes {stable_mosaic.version = 11 : i64} {
  func.func @_encode_fused_kernel(%arg0: i32, %arg1: memref<72x8xbf16, #tpu.memory_space<vmem>>, %arg2: memref<8x8xbf16, #tpu.memory_space<vmem>>, %arg3: memref<1x8xf32, #tpu.memory_space<vmem>>, %arg4: memref<8x16xbf16, #tpu.memory_space<vmem>>, %arg5: memref<1x16xf32, #tpu.memory_space<vmem>>, %arg6: memref<72x8xbf16, #tpu.memory_space<vmem>>) attributes {dimension_semantics = [#tpu.dimension_semantics<parallel>], iteration_bounds = array<i64: 2>, scalar_prefetch = 0 : i64, scratch_operands = 0 : i64, tpu.core_type = #tpu.core_type<tc>, window_params = [{transform_indices = @transform_0, window_bounds = array<i64: 72, 8>}, {pipeline_mode = #tpu.pipeline_mode<synchronous>, transform_indices = @transform_1, window_bounds = array<i64: 8, 8>}, {pipeline_mode = #tpu.pipeline_mode<synchronous>, transform_indices = @transform_2, window_bounds = array<i64: 1, 8>}, {pipeline_mode = #tpu.pipeline_mode<synchronous>, transform_indices = @transform_3, window_bounds = array<i64: 8, 16>}, {pipeline_mode = #tpu.pipeline_mode<synchronous>, transform_indices = @transform_4, window_bounds = array<i64: 1, 16>}, {transform_indices = @transform_5, window_bounds = array<i64: 72, 8>}]} {
    %c0 = arith.constant 0 : index
    %c0_0 = arith.constant 0 : index
    %0 = vector.load %arg1[%c0, %c0_0] : memref<72x8xbf16, #tpu.memory_space<vmem>>, vector<72x8xbf16>
    %c0_1 = arith.constant 0 : index
    %c0_2 = arith.constant 0 : index
    %1 = vector.load %arg2[%c0_1, %c0_2] : memref<8x8xbf16, #tpu.memory_space<vmem>>, vector<8x8xbf16>
    %cst = arith.constant dense<0.000000e+00> : vector<72x8xf32>
    %2 = tpu.matmul %0, %1, %cst {dimension_numbers = #tpu.dot_dimension_numbers<[1], [0], [0], [1], [0, 0, 1, 1], [], []>} : vector<72x8xbf16>, vector<8x8xbf16>, vector<72x8xf32> -> vector<72x8xf32>
    %c0_3 = arith.constant 0 : index
    %c0_4 = arith.constant 0 : index
    %3 = vector.load %arg3[%c0_3, %c0_4] : memref<1x8xf32, #tpu.memory_space<vmem>>, vector<1x8xf32>
    %4 = vector.broadcast %3 : vector<1x8xf32> to vector<72x8xf32>
    %5 = arith.addf %2, %4 : vector<72x8xf32>
    %cst_5 = arith.constant 0.000000e+00 : f32
    %6 = vector.broadcast %cst_5 : f32 to vector<72x8xf32>
    %7 = arith.maximumf %5, %6 : vector<72x8xf32>
    %8 = arith.truncf %7 : vector<72x8xf32> to vector<72x8xbf16>
    %c0_6 = arith.constant 0 : index
    %c0_7 = arith.constant 0 : index
    %9 = vector.load %arg4[%c0_6, %c0_7] : memref<8x16xbf16, #tpu.memory_space<vmem>>, vector<8x16xbf16>
    %cst_8 = arith.constant dense<0.000000e+00> : vector<72x16xf32>
    %10 = tpu.matmul %8, %9, %cst_8 {dimension_numbers = #tpu.dot_dimension_numbers<[1], [0], [0], [1], [0, 0, 1, 1], [], []>} : vector<72x8xbf16>, vector<8x16xbf16>, vector<72x16xf32> -> vector<72x16xf32>
    %c0_9 = arith.constant 0 : index
    %c0_10 = arith.constant 0 : index
    %11 = vector.load %arg5[%c0_9, %c0_10] : memref<1x16xf32, #tpu.memory_space<vmem>>, vector<1x16xf32>
    %12 = vector.broadcast %11 : vector<1x16xf32> to vector<72x16xf32>
    %13 = arith.addf %10, %12 : vector<72x16xf32>
    %14 = vector.extract_strided_slice %13 {offsets = [0, 0], sizes = [72, 8], strides = [1, 1]} : vector<72x16xf32> to vector<72x8xf32>
    %15 = vector.extract_strided_slice %13 {offsets = [0, 8], sizes = [72, 8], strides = [1, 1]} : vector<72x16xf32> to vector<72x8xf32>
    %16 = arith.negf %15 : vector<72x8xf32>
    %17 = math.exp %16 : vector<72x8xf32>
    %cst_11 = arith.constant 1.000000e+00 : f32
    %18 = vector.broadcast %cst_11 : f32 to vector<72x8xf32>
    %19 = arith.addf %18, %17 : vector<72x8xf32>
    %20 = arith.divf %18, %19 : vector<72x8xf32>
    %21 = arith.mulf %14, %20 : vector<72x8xf32>
    %22 = arith.truncf %21 : vector<72x8xf32> to vector<72x8xbf16>
    %c0_12 = arith.constant 0 : index
    %c0_13 = arith.constant 0 : index
    %23 = vector.load %arg6[%c0_12, %c0_13] : memref<72x8xbf16, #tpu.memory_space<vmem>>, vector<72x8xbf16>
    tpu.vector_store %arg6[%c0_12, %c0_13], %22 {strides = array<i32>} : memref<72x8xbf16, #tpu.memory_space<vmem>>, vector<72x8xbf16>,
    return
  }
  func.func @transform_0(%arg0: i32) -> (i32, i32) {
    %c0_i32 = arith.constant 0 : i32
    %c0_i32_0 = arith.constant 0 : i32
    return %arg0, %c0_i32 : i32, i32
  }
  func.func @transform_1(%arg0: i32) -> (i32, i32) {
    %c0_i32 = arith.constant 0 : i32
    %c0_i32_0 = arith.constant 0 : i32
    %c0_i32_1 = arith.constant 0 : i32
    return %c0_i32, %c0_i32_0 : i32, i32
  }
  func.func @transform_2(%arg0: i32) -> (i32, i32) {
    %c0_i32 = arith.constant 0 : i32
    %c0_i32_0 = arith.constant 0 : i32
    %c0_i32_1 = arith.constant 0 : i32
    return %c0_i32, %c0_i32_0 : i32, i32
  }
  func.func @transform_3(%arg0: i32) -> (i32, i32) {
    %c0_i32 = arith.constant 0 : i32
    %c0_i32_0 = arith.constant 0 : i32
    %c0_i32_1 = arith.constant 0 : i32
    return %c0_i32, %c0_i32_0 : i32, i32
  }
  func.func @transform_4(%arg0: i32) -> (i32, i32) {
    %c0_i32 = arith.constant 0 : i32
    %c0_i32_0 = arith.constant 0 : i32
    %c0_i32_1 = arith.constant 0 : i32
    return %c0_i32, %c0_i32_0 : i32, i32
  }
  func.func @transform_5(%arg0: i32) -> (i32, i32) {
    %c0_i32 = arith.constant 0 : i32
    %c0_i32_0 = arith.constant 0 : i32
    return %arg0, %c0_i32 : i32, i32
  }
}

module attributes {stable_mosaic.version = 11 : i64} {
  func.func @_encode_fused_kernel(%arg0: i32, %arg1: memref<16x64xbf16, #tpu.memory_space<vmem>>, %arg2: memref<64x16xbf16, #tpu.memory_space<vmem>>, %arg3: memref<1x16xf32, #tpu.memory_space<vmem>>, %arg4: memref<16x32xbf16, #tpu.memory_space<vmem>>, %arg5: memref<1x32xf32, #tpu.memory_space<vmem>>, %arg6: memref<16x16xbf16, #tpu.memory_space<vmem>>) attributes {dimension_semantics = [#tpu.dimension_semantics<parallel>], iteration_bounds = array<i64: 2>, scalar_prefetch = 0 : i64, scratch_operands = 0 : i64, tpu.core_type = #tpu.core_type<tc>, window_params = [{transform_indices = @transform_0, window_bounds = array<i64: 16, 64>}, {pipeline_mode = #tpu.pipeline_mode<synchronous>, transform_indices = @transform_1, window_bounds = array<i64: 64, 16>}, {pipeline_mode = #tpu.pipeline_mode<synchronous>, transform_indices = @transform_2, window_bounds = array<i64: 1, 16>}, {pipeline_mode = #tpu.pipeline_mode<synchronous>, transform_indices = @transform_3, window_bounds = array<i64: 16, 32>}, {pipeline_mode = #tpu.pipeline_mode<synchronous>, transform_indices = @transform_4, window_bounds = array<i64: 1, 32>}, {transform_indices = @transform_5, window_bounds = array<i64: 16, 16>}]} {
    %c0 = arith.constant 0 : index
    %c0_0 = arith.constant 0 : index
    %0 = vector.load %arg1[%c0, %c0_0] : memref<16x64xbf16, #tpu.memory_space<vmem>>, vector<16x64xbf16>
    %c0_1 = arith.constant 0 : index
    %c0_2 = arith.constant 0 : index
    %1 = vector.load %arg2[%c0_1, %c0_2] : memref<64x16xbf16, #tpu.memory_space<vmem>>, vector<64x16xbf16>
    %cst = arith.constant dense<0.000000e+00> : vector<16x16xf32>
    %2 = tpu.matmul %0, %1, %cst {dimension_numbers = #tpu.dot_dimension_numbers<[1], [0], [0], [1], [0, 0, 1, 1], [], []>} : vector<16x64xbf16>, vector<64x16xbf16>, vector<16x16xf32> -> vector<16x16xf32>
    %c0_3 = arith.constant 0 : index
    %c0_4 = arith.constant 0 : index
    %3 = vector.load %arg3[%c0_3, %c0_4] : memref<1x16xf32, #tpu.memory_space<vmem>>, vector<1x16xf32>
    %4 = vector.broadcast %3 : vector<1x16xf32> to vector<16x16xf32>
    %5 = arith.addf %2, %4 : vector<16x16xf32>
    %cst_5 = arith.constant 0.000000e+00 : f32
    %6 = vector.broadcast %cst_5 : f32 to vector<16x16xf32>
    %7 = arith.maximumf %5, %6 : vector<16x16xf32>
    %8 = arith.truncf %7 : vector<16x16xf32> to vector<16x16xbf16>
    %c0_6 = arith.constant 0 : index
    %c0_7 = arith.constant 0 : index
    %9 = vector.load %arg4[%c0_6, %c0_7] : memref<16x32xbf16, #tpu.memory_space<vmem>>, vector<16x32xbf16>
    %cst_8 = arith.constant dense<0.000000e+00> : vector<16x32xf32>
    %10 = tpu.matmul %8, %9, %cst_8 {dimension_numbers = #tpu.dot_dimension_numbers<[1], [0], [0], [1], [0, 0, 1, 1], [], []>} : vector<16x16xbf16>, vector<16x32xbf16>, vector<16x32xf32> -> vector<16x32xf32>
    %c0_9 = arith.constant 0 : index
    %c0_10 = arith.constant 0 : index
    %11 = vector.load %arg5[%c0_9, %c0_10] : memref<1x32xf32, #tpu.memory_space<vmem>>, vector<1x32xf32>
    %12 = vector.broadcast %11 : vector<1x32xf32> to vector<16x32xf32>
    %13 = arith.addf %10, %12 : vector<16x32xf32>
    %14 = vector.extract_strided_slice %13 {offsets = [0, 0], sizes = [16, 16], strides = [1, 1]} : vector<16x32xf32> to vector<16x16xf32>
    %15 = vector.extract_strided_slice %13 {offsets = [0, 16], sizes = [16, 16], strides = [1, 1]} : vector<16x32xf32> to vector<16x16xf32>
    %16 = arith.negf %15 : vector<16x16xf32>
    %17 = math.exp %16 : vector<16x16xf32>
    %cst_11 = arith.constant 1.000000e+00 : f32
    %18 = vector.broadcast %cst_11 : f32 to vector<16x16xf32>
    %19 = arith.addf %18, %17 : vector<16x16xf32>
    %20 = arith.divf %18, %19 : vector<16x16xf32>
    %21 = arith.mulf %14, %20 : vector<16x16xf32>
    %22 = arith.truncf %21 : vector<16x16xf32> to vector<16x16xbf16>
    %c0_12 = arith.constant 0 : index
    %c0_13 = arith.constant 0 : index
    %23 = vector.load %arg6[%c0_12, %c0_13] : memref<16x16xbf16, #tpu.memory_space<vmem>>, vector<16x16xbf16>
    tpu.vector_store %arg6[%c0_12, %c0_13], %22 {strides = array<i32>} : memref<16x16xbf16, #tpu.memory_space<vmem>>, vector<16x16xbf16>,
    return
  }
  func.func @transform_0(%arg0: i32) -> (i32, i32) {
    %c0_i32 = arith.constant 0 : i32
    %c0_i32_0 = arith.constant 0 : i32
    return %arg0, %c0_i32 : i32, i32
  }
  func.func @transform_1(%arg0: i32) -> (i32, i32) {
    %c0_i32 = arith.constant 0 : i32
    %c0_i32_0 = arith.constant 0 : i32
    %c0_i32_1 = arith.constant 0 : i32
    return %c0_i32, %c0_i32_0 : i32, i32
  }
  func.func @transform_2(%arg0: i32) -> (i32, i32) {
    %c0_i32 = arith.constant 0 : i32
    %c0_i32_0 = arith.constant 0 : i32
    %c0_i32_1 = arith.constant 0 : i32
    return %c0_i32, %c0_i32_0 : i32, i32
  }
  func.func @transform_3(%arg0: i32) -> (i32, i32) {
    %c0_i32 = arith.constant 0 : i32
    %c0_i32_0 = arith.constant 0 : i32
    %c0_i32_1 = arith.constant 0 : i32
    return %c0_i32, %c0_i32_0 : i32, i32
  }
  func.func @transform_4(%arg0: i32) -> (i32, i32) {
    %c0_i32 = arith.constant 0 : i32
    %c0_i32_0 = arith.constant 0 : i32
    %c0_i32_1 = arith.constant 0 : i32
    return %c0_i32, %c0_i32_0 : i32, i32
  }
  func.func @transform_5(%arg0: i32) -> (i32, i32) {
    %c0_i32 = arith.constant 0 : i32
    %c0_i32_0 = arith.constant 0 : i32
    return %arg0, %c0_i32 : i32, i32
  }
}

module attributes {stable_mosaic.version = 11 : i64} {
  func.func @_encode_fused_kernel(%arg0: i32, %arg1: memref<6x128xbf16, #tpu.memory_space<vmem>>, %arg2: memref<128x32xbf16, #tpu.memory_space<vmem>>, %arg3: memref<1x32xf32, #tpu.memory_space<vmem>>, %arg4: memref<32x64xbf16, #tpu.memory_space<vmem>>, %arg5: memref<1x64xf32, #tpu.memory_space<vmem>>, %arg6: memref<6x32xbf16, #tpu.memory_space<vmem>>) attributes {dimension_semantics = [#tpu.dimension_semantics<parallel>], iteration_bounds = array<i64: 1>, scalar_prefetch = 0 : i64, scratch_operands = 0 : i64, tpu.core_type = #tpu.core_type<tc>, window_params = [{transform_indices = @transform_0, window_bounds = array<i64: 6, 128>}, {pipeline_mode = #tpu.pipeline_mode<synchronous>, transform_indices = @transform_1, window_bounds = array<i64: 128, 32>}, {pipeline_mode = #tpu.pipeline_mode<synchronous>, transform_indices = @transform_2, window_bounds = array<i64: 1, 32>}, {pipeline_mode = #tpu.pipeline_mode<synchronous>, transform_indices = @transform_3, window_bounds = array<i64: 32, 64>}, {pipeline_mode = #tpu.pipeline_mode<synchronous>, transform_indices = @transform_4, window_bounds = array<i64: 1, 64>}, {transform_indices = @transform_5, window_bounds = array<i64: 6, 32>}]} {
    %c0 = arith.constant 0 : index
    %c0_0 = arith.constant 0 : index
    %0 = vector.load %arg1[%c0, %c0_0] : memref<6x128xbf16, #tpu.memory_space<vmem>>, vector<6x128xbf16>
    %c0_1 = arith.constant 0 : index
    %c0_2 = arith.constant 0 : index
    %1 = vector.load %arg2[%c0_1, %c0_2] : memref<128x32xbf16, #tpu.memory_space<vmem>>, vector<128x32xbf16>
    %cst = arith.constant dense<0.000000e+00> : vector<6x32xf32>
    %2 = tpu.matmul %0, %1, %cst {dimension_numbers = #tpu.dot_dimension_numbers<[1], [0], [0], [1], [0, 0, 1, 1], [], []>} : vector<6x128xbf16>, vector<128x32xbf16>, vector<6x32xf32> -> vector<6x32xf32>
    %c0_3 = arith.constant 0 : index
    %c0_4 = arith.constant 0 : index
    %3 = vector.load %arg3[%c0_3, %c0_4] : memref<1x32xf32, #tpu.memory_space<vmem>>, vector<1x32xf32>
    %4 = vector.broadcast %3 : vector<1x32xf32> to vector<6x32xf32>
    %5 = arith.addf %2, %4 : vector<6x32xf32>
    %cst_5 = arith.constant 0.000000e+00 : f32
    %6 = vector.broadcast %cst_5 : f32 to vector<6x32xf32>
    %7 = arith.maximumf %5, %6 : vector<6x32xf32>
    %8 = arith.truncf %7 : vector<6x32xf32> to vector<6x32xbf16>
    %c0_6 = arith.constant 0 : index
    %c0_7 = arith.constant 0 : index
    %9 = vector.load %arg4[%c0_6, %c0_7] : memref<32x64xbf16, #tpu.memory_space<vmem>>, vector<32x64xbf16>
    %cst_8 = arith.constant dense<0.000000e+00> : vector<6x64xf32>
    %10 = tpu.matmul %8, %9, %cst_8 {dimension_numbers = #tpu.dot_dimension_numbers<[1], [0], [0], [1], [0, 0, 1, 1], [], []>} : vector<6x32xbf16>, vector<32x64xbf16>, vector<6x64xf32> -> vector<6x64xf32>
    %c0_9 = arith.constant 0 : index
    %c0_10 = arith.constant 0 : index
    %11 = vector.load %arg5[%c0_9, %c0_10] : memref<1x64xf32, #tpu.memory_space<vmem>>, vector<1x64xf32>
    %12 = vector.broadcast %11 : vector<1x64xf32> to vector<6x64xf32>
    %13 = arith.addf %10, %12 : vector<6x64xf32>
    %14 = vector.extract_strided_slice %13 {offsets = [0, 0], sizes = [6, 32], strides = [1, 1]} : vector<6x64xf32> to vector<6x32xf32>
    %15 = vector.extract_strided_slice %13 {offsets = [0, 32], sizes = [6, 32], strides = [1, 1]} : vector<6x64xf32> to vector<6x32xf32>
    %16 = arith.negf %15 : vector<6x32xf32>
    %17 = math.exp %16 : vector<6x32xf32>
    %cst_11 = arith.constant 1.000000e+00 : f32
    %18 = vector.broadcast %cst_11 : f32 to vector<6x32xf32>
    %19 = arith.addf %18, %17 : vector<6x32xf32>
    %20 = arith.divf %18, %19 : vector<6x32xf32>
    %21 = arith.mulf %14, %20 : vector<6x32xf32>
    %22 = arith.truncf %21 : vector<6x32xf32> to vector<6x32xbf16>
    %c0_12 = arith.constant 0 : index
    %c0_13 = arith.constant 0 : index
    %23 = vector.load %arg6[%c0_12, %c0_13] : memref<6x32xbf16, #tpu.memory_space<vmem>>, vector<6x32xbf16>
    tpu.vector_store %arg6[%c0_12, %c0_13], %22 {strides = array<i32>} : memref<6x32xbf16, #tpu.memory_space<vmem>>, vector<6x32xbf16>,
    return
  }
  func.func @transform_0(%arg0: i32) -> (i32, i32) {
    %c0_i32 = arith.constant 0 : i32
    %c0_i32_0 = arith.constant 0 : i32
    return %arg0, %c0_i32 : i32, i32
  }
  func.func @transform_1(%arg0: i32) -> (i32, i32) {
    %c0_i32 = arith.constant 0 : i32
    %c0_i32_0 = arith.constant 0 : i32
    %c0_i32_1 = arith.constant 0 : i32
    return %c0_i32, %c0_i32_0 : i32, i32
  }
  func.func @transform_2(%arg0: i32) -> (i32, i32) {
    %c0_i32 = arith.constant 0 : i32
    %c0_i32_0 = arith.constant 0 : i32
    %c0_i32_1 = arith.constant 0 : i32
    return %c0_i32, %c0_i32_0 : i32, i32
  }
  func.func @transform_3(%arg0: i32) -> (i32, i32) {
    %c0_i32 = arith.constant 0 : i32
    %c0_i32_0 = arith.constant 0 : i32
    %c0_i32_1 = arith.constant 0 : i32
    return %c0_i32, %c0_i32_0 : i32, i32
  }
  func.func @transform_4(%arg0: i32) -> (i32, i32) {
    %c0_i32 = arith.constant 0 : i32
    %c0_i32_0 = arith.constant 0 : i32
    %c0_i32_1 = arith.constant 0 : i32
    return %c0_i32, %c0_i32_0 : i32, i32
  }
  func.func @transform_5(%arg0: i32) -> (i32, i32) {
    %c0_i32 = arith.constant 0 : i32
    %c0_i32_0 = arith.constant 0 : i32
    return %arg0, %c0_i32 : i32, i32
  }
}

module attributes {stable_mosaic.version = 11 : i64} {
  func.func @_mm_act_kernel(%arg0: i32, %arg1: memref<6x32xbf16, #tpu.memory_space<vmem>>, %arg2: memref<32x128xbf16, #tpu.memory_space<vmem>>, %arg3: memref<1x128xf32, #tpu.memory_space<vmem>>, %arg4: memref<6x128xf32, #tpu.memory_space<vmem>>) attributes {dimension_semantics = [#tpu.dimension_semantics<parallel>], iteration_bounds = array<i64: 1>, scalar_prefetch = 0 : i64, scratch_operands = 0 : i64, tpu.core_type = #tpu.core_type<tc>, window_params = [{transform_indices = @transform_0, window_bounds = array<i64: 6, 32>}, {pipeline_mode = #tpu.pipeline_mode<synchronous>, transform_indices = @transform_1, window_bounds = array<i64: 32, 128>}, {pipeline_mode = #tpu.pipeline_mode<synchronous>, transform_indices = @transform_2, window_bounds = array<i64: 1, 128>}, {transform_indices = @transform_3, window_bounds = array<i64: 6, 128>}]} {
    %c0 = arith.constant 0 : index
    %c0_0 = arith.constant 0 : index
    %0 = vector.load %arg1[%c0, %c0_0] : memref<6x32xbf16, #tpu.memory_space<vmem>>, vector<6x32xbf16>
    %c0_1 = arith.constant 0 : index
    %c0_2 = arith.constant 0 : index
    %1 = vector.load %arg2[%c0_1, %c0_2] : memref<32x128xbf16, #tpu.memory_space<vmem>>, vector<32x128xbf16>
    %cst = arith.constant dense<0.000000e+00> : vector<6x128xf32>
    %2 = tpu.matmul %0, %1, %cst {dimension_numbers = #tpu.dot_dimension_numbers<[1], [0], [0], [1], [0, 0, 1, 1], [], []>} : vector<6x32xbf16>, vector<32x128xbf16>, vector<6x128xf32> -> vector<6x128xf32>
    %c0_3 = arith.constant 0 : index
    %c0_4 = arith.constant 0 : index
    %3 = vector.load %arg3[%c0_3, %c0_4] : memref<1x128xf32, #tpu.memory_space<vmem>>, vector<1x128xf32>
    %4 = vector.broadcast %3 : vector<1x128xf32> to vector<6x128xf32>
    %5 = arith.addf %2, %4 : vector<6x128xf32>
    %c0_5 = arith.constant 0 : index
    %c0_6 = arith.constant 0 : index
    %6 = vector.load %arg4[%c0_5, %c0_6] : memref<6x128xf32, #tpu.memory_space<vmem>>, vector<6x128xf32>
    tpu.vector_store %arg4[%c0_5, %c0_6], %5 {strides = array<i32>} : memref<6x128xf32, #tpu.memory_space<vmem>>, vector<6x128xf32>,
    return
  }
  func.func @transform_0(%arg0: i32) -> (i32, i32) {
    %c0_i32 = arith.constant 0 : i32
    %c0_i32_0 = arith.constant 0 : i32
    return %arg0, %c0_i32 : i32, i32
  }
  func.func @transform_1(%arg0: i32) -> (i32, i32) {
    %c0_i32 = arith.constant 0 : i32
    %c0_i32_0 = arith.constant 0 : i32
    %c0_i32_1 = arith.constant 0 : i32
    return %c0_i32, %c0_i32_0 : i32, i32
  }
  func.func @transform_2(%arg0: i32) -> (i32, i32) {
    %c0_i32 = arith.constant 0 : i32
    %c0_i32_0 = arith.constant 0 : i32
    %c0_i32_1 = arith.constant 0 : i32
    return %c0_i32, %c0_i32_0 : i32, i32
  }
  func.func @transform_3(%arg0: i32) -> (i32, i32) {
    %c0_i32 = arith.constant 0 : i32
    %c0_i32_0 = arith.constant 0 : i32
    return %arg0, %c0_i32 : i32, i32
  }
}

module attributes {stable_mosaic.version = 11 : i64} {
  func.func @_lstm_layer_kernel(%arg0: i32, %arg1: memref<4x2x128xf32, #tpu.memory_space<vmem>>, %arg2: memref<32x128xbf16, #tpu.memory_space<vmem>>, %arg3: memref<4x2x32xf32, #tpu.memory_space<vmem>>, %arg4: memref<2x32xf32, #tpu.memory_space<vmem>>, %arg5: memref<2x32xf32, #tpu.memory_space<vmem>>) attributes {dimension_semantics = [#tpu.dimension_semantics<arbitrary>], iteration_bounds = array<i64: 1>, scalar_prefetch = 0 : i64, scratch_operands = 2 : i64, tpu.core_type = #tpu.core_type<tc>, window_params = [{transform_indices = @transform_0, window_bounds = array<i64: 4, 2, 128>}, {pipeline_mode = #tpu.pipeline_mode<synchronous>, transform_indices = @transform_1, window_bounds = array<i64: 32, 128>}, {transform_indices = @transform_2, window_bounds = array<i64: 4, 2, 32>}]} {
    %c0_i32 = arith.constant 0 : i32
    %0 = arith.cmpi eq, %arg0, %c0_i32 : i32
    %1 = arith.extui %0 : i1 to i32
    %c0_i32_0 = arith.constant 0 : i32
    %2 = arith.cmpi ne, %1, %c0_i32_0 : i32
    scf.if %2 {
      %cst_79 = arith.constant 0.000000e+00 : f32
      %173 = vector.broadcast %cst_79 : f32 to vector<2x32xf32>
      %c0_80 = arith.constant 0 : index
      %c0_81 = arith.constant 0 : index
      %174 = vector.load %arg4[%c0_80, %c0_81] : memref<2x32xf32, #tpu.memory_space<vmem>>, vector<2x32xf32>
      tpu.vector_store %arg4[%c0_80, %c0_81], %173 {strides = array<i32>} : memref<2x32xf32, #tpu.memory_space<vmem>>, vector<2x32xf32>,
      %cst_82 = arith.constant 0.000000e+00 : f32
      %175 = vector.broadcast %cst_82 : f32 to vector<2x32xf32>
      %c0_83 = arith.constant 0 : index
      %c0_84 = arith.constant 0 : index
      %176 = vector.load %arg5[%c0_83, %c0_84] : memref<2x32xf32, #tpu.memory_space<vmem>>, vector<2x32xf32>
      tpu.vector_store %arg5[%c0_83, %c0_84], %175 {strides = array<i32>} : memref<2x32xf32, #tpu.memory_space<vmem>>, vector<2x32xf32>,
    } else {
    }
    %c0_i32_1 = arith.constant 0 : i32
    %c1_i32 = arith.constant 1 : i32
    %3 = arith.muli %c0_i32_1, %c1_i32 : i32
    %c0_i32_2 = arith.constant 0 : i32
    %4 = arith.addi %c0_i32_2, %3 : i32
    %c4_i32 = arith.constant 4 : i32
    %5 = arith.muli %4, %c4_i32 : i32
    %c0_i32_3 = arith.constant 0 : i32
    %6 = arith.addi %5, %c0_i32_3 : i32
    %7 = arith.index_cast %6 : i32 to index
    %c0 = arith.constant 0 : index
    %c0_4 = arith.constant 0 : index
    %8 = vector.load %arg1[%7, %c0, %c0_4] : memref<4x2x128xf32, #tpu.memory_space<vmem>>, vector<1x2x128xf32>
    %9 = vector.shape_cast %8 : vector<1x2x128xf32> to vector<2x128xf32>
    %c0_5 = arith.constant 0 : index
    %c0_6 = arith.constant 0 : index
    %10 = vector.load %arg4[%c0_5, %c0_6] : memref<2x32xf32, #tpu.memory_space<vmem>>, vector<2x32xf32>
    %11 = arith.truncf %10 : vector<2x32xf32> to vector<2x32xbf16>
    %c0_7 = arith.constant 0 : index
    %c0_8 = arith.constant 0 : index
    %12 = vector.load %arg2[%c0_7, %c0_8] : memref<32x128xbf16, #tpu.memory_space<vmem>>, vector<32x128xbf16>
    %cst = arith.constant dense<0.000000e+00> : vector<2x128xf32>
    %13 = tpu.matmul %11, %12, %cst {dimension_numbers = #tpu.dot_dimension_numbers<[1], [0], [0], [1], [0, 0, 1, 1], [], []>} : vector<2x32xbf16>, vector<32x128xbf16>, vector<2x128xf32> -> vector<2x128xf32>
    %14 = arith.addf %9, %13 : vector<2x128xf32>
    %15 = vector.extract_strided_slice %14 {offsets = [0, 0], sizes = [2, 32], strides = [1, 1]} : vector<2x128xf32> to vector<2x32xf32>
    %16 = arith.negf %15 : vector<2x32xf32>
    %17 = math.exp %16 : vector<2x32xf32>
    %cst_9 = arith.constant 1.000000e+00 : f32
    %18 = vector.broadcast %cst_9 : f32 to vector<2x32xf32>
    %19 = arith.addf %18, %17 : vector<2x32xf32>
    %20 = arith.divf %18, %19 : vector<2x32xf32>
    %21 = vector.extract_strided_slice %14 {offsets = [0, 32], sizes = [2, 32], strides = [1, 1]} : vector<2x128xf32> to vector<2x32xf32>
    %22 = arith.negf %21 : vector<2x32xf32>
    %23 = math.exp %22 : vector<2x32xf32>
    %cst_10 = arith.constant 1.000000e+00 : f32
    %24 = vector.broadcast %cst_10 : f32 to vector<2x32xf32>
    %25 = arith.addf %24, %23 : vector<2x32xf32>
    %26 = arith.divf %24, %25 : vector<2x32xf32>
    %27 = vector.extract_strided_slice %14 {offsets = [0, 64], sizes = [2, 32], strides = [1, 1]} : vector<2x128xf32> to vector<2x32xf32>
    %28 = math.tanh %27 : vector<2x32xf32>
    %29 = vector.extract_strided_slice %14 {offsets = [0, 96], sizes = [2, 32], strides = [1, 1]} : vector<2x128xf32> to vector<2x32xf32>
    %30 = arith.negf %29 : vector<2x32xf32>
    %31 = math.exp %30 : vector<2x32xf32>
    %cst_11 = arith.constant 1.000000e+00 : f32
    %32 = vector.broadcast %cst_11 : f32 to vector<2x32xf32>
    %33 = arith.addf %32, %31 : vector<2x32xf32>
    %34 = arith.divf %32, %33 : vector<2x32xf32>
    %c0_12 = arith.constant 0 : index
    %c0_13 = arith.constant 0 : index
    %35 = vector.load %arg5[%c0_12, %c0_13] : memref<2x32xf32, #tpu.memory_space<vmem>>, vector<2x32xf32>
    %36 = arith.mulf %26, %35 : vector<2x32xf32>
    %37 = arith.mulf %20, %28 : vector<2x32xf32>
    %38 = arith.addf %36, %37 : vector<2x32xf32>
    %39 = math.tanh %38 : vector<2x32xf32>
    %40 = arith.mulf %34, %39 : vector<2x32xf32>
    %c0_14 = arith.constant 0 : index
    %c0_15 = arith.constant 0 : index
    %41 = vector.load %arg5[%c0_14, %c0_15] : memref<2x32xf32, #tpu.memory_space<vmem>>, vector<2x32xf32>
    tpu.vector_store %arg5[%c0_14, %c0_15], %38 {strides = array<i32>} : memref<2x32xf32, #tpu.memory_space<vmem>>, vector<2x32xf32>,
    %c0_16 = arith.constant 0 : index
    %c0_17 = arith.constant 0 : index
    %42 = vector.load %arg4[%c0_16, %c0_17] : memref<2x32xf32, #tpu.memory_space<vmem>>, vector<2x32xf32>
    tpu.vector_store %arg4[%c0_16, %c0_17], %40 {strides = array<i32>} : memref<2x32xf32, #tpu.memory_space<vmem>>, vector<2x32xf32>,
    %43 = arith.index_cast %6 : i32 to index
    %c0_18 = arith.constant 0 : index
    %c0_19 = arith.constant 0 : index
    %44 = vector.load %arg3[%43, %c0_18, %c0_19] : memref<4x2x32xf32, #tpu.memory_space<vmem>>, vector<1x2x32xf32>
    %45 = vector.shape_cast %44 : vector<1x2x32xf32> to vector<2x32xf32>
    %46 = vector.shape_cast %40 : vector<2x32xf32> to vector<1x2x32xf32>
    tpu.vector_store %arg3[%43, %c0_18, %c0_19], %46 {strides = array<i32>} : memref<4x2x32xf32, #tpu.memory_space<vmem>>, vector<1x2x32xf32>,
    %c4_i32_20 = arith.constant 4 : i32
    %47 = arith.muli %4, %c4_i32_20 : i32
    %c1_i32_21 = arith.constant 1 : i32
    %48 = arith.addi %47, %c1_i32_21 : i32
    %49 = arith.index_cast %48 : i32 to index
    %c0_22 = arith.constant 0 : index
    %c0_23 = arith.constant 0 : index
    %50 = vector.load %arg1[%49, %c0_22, %c0_23] : memref<4x2x128xf32, #tpu.memory_space<vmem>>, vector<1x2x128xf32>
    %51 = vector.shape_cast %50 : vector<1x2x128xf32> to vector<2x128xf32>
    %c0_24 = arith.constant 0 : index
    %c0_25 = arith.constant 0 : index
    %52 = vector.load %arg4[%c0_24, %c0_25] : memref<2x32xf32, #tpu.memory_space<vmem>>, vector<2x32xf32>
    %53 = arith.truncf %52 : vector<2x32xf32> to vector<2x32xbf16>
    %c0_26 = arith.constant 0 : index
    %c0_27 = arith.constant 0 : index
    %54 = vector.load %arg2[%c0_26, %c0_27] : memref<32x128xbf16, #tpu.memory_space<vmem>>, vector<32x128xbf16>
    %cst_28 = arith.constant dense<0.000000e+00> : vector<2x128xf32>
    %55 = tpu.matmul %53, %54, %cst_28 {dimension_numbers = #tpu.dot_dimension_numbers<[1], [0], [0], [1], [0, 0, 1, 1], [], []>} : vector<2x32xbf16>, vector<32x128xbf16>, vector<2x128xf32> -> vector<2x128xf32>
    %56 = arith.addf %51, %55 : vector<2x128xf32>
    %57 = vector.extract_strided_slice %56 {offsets = [0, 0], sizes = [2, 32], strides = [1, 1]} : vector<2x128xf32> to vector<2x32xf32>
    %58 = arith.negf %57 : vector<2x32xf32>
    %59 = math.exp %58 : vector<2x32xf32>
    %cst_29 = arith.constant 1.000000e+00 : f32
    %60 = vector.broadcast %cst_29 : f32 to vector<2x32xf32>
    %61 = arith.addf %60, %59 : vector<2x32xf32>
    %62 = arith.divf %60, %61 : vector<2x32xf32>
    %63 = vector.extract_strided_slice %56 {offsets = [0, 32], sizes = [2, 32], strides = [1, 1]} : vector<2x128xf32> to vector<2x32xf32>
    %64 = arith.negf %63 : vector<2x32xf32>
    %65 = math.exp %64 : vector<2x32xf32>
    %cst_30 = arith.constant 1.000000e+00 : f32
    %66 = vector.broadcast %cst_30 : f32 to vector<2x32xf32>
    %67 = arith.addf %66, %65 : vector<2x32xf32>
    %68 = arith.divf %66, %67 : vector<2x32xf32>
    %69 = vector.extract_strided_slice %56 {offsets = [0, 64], sizes = [2, 32], strides = [1, 1]} : vector<2x128xf32> to vector<2x32xf32>
    %70 = math.tanh %69 : vector<2x32xf32>
    %71 = vector.extract_strided_slice %56 {offsets = [0, 96], sizes = [2, 32], strides = [1, 1]} : vector<2x128xf32> to vector<2x32xf32>
    %72 = arith.negf %71 : vector<2x32xf32>
    %73 = math.exp %72 : vector<2x32xf32>
    %cst_31 = arith.constant 1.000000e+00 : f32
    %74 = vector.broadcast %cst_31 : f32 to vector<2x32xf32>
    %75 = arith.addf %74, %73 : vector<2x32xf32>
    %76 = arith.divf %74, %75 : vector<2x32xf32>
    %c0_32 = arith.constant 0 : index
    %c0_33 = arith.constant 0 : index
    %77 = vector.load %arg5[%c0_32, %c0_33] : memref<2x32xf32, #tpu.memory_space<vmem>>, vector<2x32xf32>
    %78 = arith.mulf %68, %77 : vector<2x32xf32>
    %79 = arith.mulf %62, %70 : vector<2x32xf32>
    %80 = arith.addf %78, %79 : vector<2x32xf32>
    %81 = math.tanh %80 : vector<2x32xf32>
    %82 = arith.mulf %76, %81 : vector<2x32xf32>
    %c0_34 = arith.constant 0 : index
    %c0_35 = arith.constant 0 : index
    %83 = vector.load %arg5[%c0_34, %c0_35] : memref<2x32xf32, #tpu.memory_space<vmem>>, vector<2x32xf32>
    tpu.vector_store %arg5[%c0_34, %c0_35], %80 {strides = array<i32>} : memref<2x32xf32, #tpu.memory_space<vmem>>, vector<2x32xf32>,
    %c0_36 = arith.constant 0 : index
    %c0_37 = arith.constant 0 : index
    %84 = vector.load %arg4[%c0_36, %c0_37] : memref<2x32xf32, #tpu.memory_space<vmem>>, vector<2x32xf32>
    tpu.vector_store %arg4[%c0_36, %c0_37], %82 {strides = array<i32>} : memref<2x32xf32, #tpu.memory_space<vmem>>, vector<2x32xf32>,
    %85 = arith.index_cast %48 : i32 to index
    %c0_38 = arith.constant 0 : index
    %c0_39 = arith.constant 0 : index
    %86 = vector.load %arg3[%85, %c0_38, %c0_39] : memref<4x2x32xf32, #tpu.memory_space<vmem>>, vector<1x2x32xf32>
    %87 = vector.shape_cast %86 : vector<1x2x32xf32> to vector<2x32xf32>
    %88 = vector.shape_cast %82 : vector<2x32xf32> to vector<1x2x32xf32>
    tpu.vector_store %arg3[%85, %c0_38, %c0_39], %88 {strides = array<i32>} : memref<4x2x32xf32, #tpu.memory_space<vmem>>, vector<1x2x32xf32>,
    %c4_i32_40 = arith.constant 4 : i32
    %89 = arith.muli %4, %c4_i32_40 : i32
    %c2_i32 = arith.constant 2 : i32
    %90 = arith.addi %89, %c2_i32 : i32
    %91 = arith.index_cast %90 : i32 to index
    %c0_41 = arith.constant 0 : index
    %c0_42 = arith.constant 0 : index
    %92 = vector.load %arg1[%91, %c0_41, %c0_42] : memref<4x2x128xf32, #tpu.memory_space<vmem>>, vector<1x2x128xf32>
    %93 = vector.shape_cast %92 : vector<1x2x128xf32> to vector<2x128xf32>
    %c0_43 = arith.constant 0 : index
    %c0_44 = arith.constant 0 : index
    %94 = vector.load %arg4[%c0_43, %c0_44] : memref<2x32xf32, #tpu.memory_space<vmem>>, vector<2x32xf32>
    %95 = arith.truncf %94 : vector<2x32xf32> to vector<2x32xbf16>
    %c0_45 = arith.constant 0 : index
    %c0_46 = arith.constant 0 : index
    %96 = vector.load %arg2[%c0_45, %c0_46] : memref<32x128xbf16, #tpu.memory_space<vmem>>, vector<32x128xbf16>
    %cst_47 = arith.constant dense<0.000000e+00> : vector<2x128xf32>
    %97 = tpu.matmul %95, %96, %cst_47 {dimension_numbers = #tpu.dot_dimension_numbers<[1], [0], [0], [1], [0, 0, 1, 1], [], []>} : vector<2x32xbf16>, vector<32x128xbf16>, vector<2x128xf32> -> vector<2x128xf32>
    %98 = arith.addf %93, %97 : vector<2x128xf32>
    %99 = vector.extract_strided_slice %98 {offsets = [0, 0], sizes = [2, 32], strides = [1, 1]} : vector<2x128xf32> to vector<2x32xf32>
    %100 = arith.negf %99 : vector<2x32xf32>
    %101 = math.exp %100 : vector<2x32xf32>
    %cst_48 = arith.constant 1.000000e+00 : f32
    %102 = vector.broadcast %cst_48 : f32 to vector<2x32xf32>
    %103 = arith.addf %102, %101 : vector<2x32xf32>
    %104 = arith.divf %102, %103 : vector<2x32xf32>
    %105 = vector.extract_strided_slice %98 {offsets = [0, 32], sizes = [2, 32], strides = [1, 1]} : vector<2x128xf32> to vector<2x32xf32>
    %106 = arith.negf %105 : vector<2x32xf32>
    %107 = math.exp %106 : vector<2x32xf32>
    %cst_49 = arith.constant 1.000000e+00 : f32
    %108 = vector.broadcast %cst_49 : f32 to vector<2x32xf32>
    %109 = arith.addf %108, %107 : vector<2x32xf32>
    %110 = arith.divf %108, %109 : vector<2x32xf32>
    %111 = vector.extract_strided_slice %98 {offsets = [0, 64], sizes = [2, 32], strides = [1, 1]} : vector<2x128xf32> to vector<2x32xf32>
    %112 = math.tanh %111 : vector<2x32xf32>
    %113 = vector.extract_strided_slice %98 {offsets = [0, 96], sizes = [2, 32], strides = [1, 1]} : vector<2x128xf32> to vector<2x32xf32>
    %114 = arith.negf %113 : vector<2x32xf32>
    %115 = math.exp %114 : vector<2x32xf32>
    %cst_50 = arith.constant 1.000000e+00 : f32
    %116 = vector.broadcast %cst_50 : f32 to vector<2x32xf32>
    %117 = arith.addf %116, %115 : vector<2x32xf32>
    %118 = arith.divf %116, %117 : vector<2x32xf32>
    %c0_51 = arith.constant 0 : index
    %c0_52 = arith.constant 0 : index
    %119 = vector.load %arg5[%c0_51, %c0_52] : memref<2x32xf32, #tpu.memory_space<vmem>>, vector<2x32xf32>
    %120 = arith.mulf %110, %119 : vector<2x32xf32>
    %121 = arith.mulf %104, %112 : vector<2x32xf32>
    %122 = arith.addf %120, %121 : vector<2x32xf32>
    %123 = math.tanh %122 : vector<2x32xf32>
    %124 = arith.mulf %118, %123 : vector<2x32xf32>
    %c0_53 = arith.constant 0 : index
    %c0_54 = arith.constant 0 : index
    %125 = vector.load %arg5[%c0_53, %c0_54] : memref<2x32xf32, #tpu.memory_space<vmem>>, vector<2x32xf32>
    tpu.vector_store %arg5[%c0_53, %c0_54], %122 {strides = array<i32>} : memref<2x32xf32, #tpu.memory_space<vmem>>, vector<2x32xf32>,
    %c0_55 = arith.constant 0 : index
    %c0_56 = arith.constant 0 : index
    %126 = vector.load %arg4[%c0_55, %c0_56] : memref<2x32xf32, #tpu.memory_space<vmem>>, vector<2x32xf32>
    tpu.vector_store %arg4[%c0_55, %c0_56], %124 {strides = array<i32>} : memref<2x32xf32, #tpu.memory_space<vmem>>, vector<2x32xf32>,
    %127 = arith.index_cast %90 : i32 to index
    %c0_57 = arith.constant 0 : index
    %c0_58 = arith.constant 0 : index
    %128 = vector.load %arg3[%127, %c0_57, %c0_58] : memref<4x2x32xf32, #tpu.memory_space<vmem>>, vector<1x2x32xf32>
    %129 = vector.shape_cast %128 : vector<1x2x32xf32> to vector<2x32xf32>
    %130 = vector.shape_cast %124 : vector<2x32xf32> to vector<1x2x32xf32>
    tpu.vector_store %arg3[%127, %c0_57, %c0_58], %130 {strides = array<i32>} : memref<4x2x32xf32, #tpu.memory_space<vmem>>, vector<1x2x32xf32>,
    %c4_i32_59 = arith.constant 4 : i32
    %131 = arith.muli %4, %c4_i32_59 : i32
    %c3_i32 = arith.constant 3 : i32
    %132 = arith.addi %131, %c3_i32 : i32
    %133 = arith.index_cast %132 : i32 to index
    %c0_60 = arith.constant 0 : index
    %c0_61 = arith.constant 0 : index
    %134 = vector.load %arg1[%133, %c0_60, %c0_61] : memref<4x2x128xf32, #tpu.memory_space<vmem>>, vector<1x2x128xf32>
    %135 = vector.shape_cast %134 : vector<1x2x128xf32> to vector<2x128xf32>
    %c0_62 = arith.constant 0 : index
    %c0_63 = arith.constant 0 : index
    %136 = vector.load %arg4[%c0_62, %c0_63] : memref<2x32xf32, #tpu.memory_space<vmem>>, vector<2x32xf32>
    %137 = arith.truncf %136 : vector<2x32xf32> to vector<2x32xbf16>
    %c0_64 = arith.constant 0 : index
    %c0_65 = arith.constant 0 : index
    %138 = vector.load %arg2[%c0_64, %c0_65] : memref<32x128xbf16, #tpu.memory_space<vmem>>, vector<32x128xbf16>
    %cst_66 = arith.constant dense<0.000000e+00> : vector<2x128xf32>
    %139 = tpu.matmul %137, %138, %cst_66 {dimension_numbers = #tpu.dot_dimension_numbers<[1], [0], [0], [1], [0, 0, 1, 1], [], []>} : vector<2x32xbf16>, vector<32x128xbf16>, vector<2x128xf32> -> vector<2x128xf32>
    %140 = arith.addf %135, %139 : vector<2x128xf32>
    %141 = vector.extract_strided_slice %140 {offsets = [0, 0], sizes = [2, 32], strides = [1, 1]} : vector<2x128xf32> to vector<2x32xf32>
    %142 = arith.negf %141 : vector<2x32xf32>
    %143 = math.exp %142 : vector<2x32xf32>
    %cst_67 = arith.constant 1.000000e+00 : f32
    %144 = vector.broadcast %cst_67 : f32 to vector<2x32xf32>
    %145 = arith.addf %144, %143 : vector<2x32xf32>
    %146 = arith.divf %144, %145 : vector<2x32xf32>
    %147 = vector.extract_strided_slice %140 {offsets = [0, 32], sizes = [2, 32], strides = [1, 1]} : vector<2x128xf32> to vector<2x32xf32>
    %148 = arith.negf %147 : vector<2x32xf32>
    %149 = math.exp %148 : vector<2x32xf32>
    %cst_68 = arith.constant 1.000000e+00 : f32
    %150 = vector.broadcast %cst_68 : f32 to vector<2x32xf32>
    %151 = arith.addf %150, %149 : vector<2x32xf32>
    %152 = arith.divf %150, %151 : vector<2x32xf32>
    %153 = vector.extract_strided_slice %140 {offsets = [0, 64], sizes = [2, 32], strides = [1, 1]} : vector<2x128xf32> to vector<2x32xf32>
    %154 = math.tanh %153 : vector<2x32xf32>
    %155 = vector.extract_strided_slice %140 {offsets = [0, 96], sizes = [2, 32], strides = [1, 1]} : vector<2x128xf32> to vector<2x32xf32>
    %156 = arith.negf %155 : vector<2x32xf32>
    %157 = math.exp %156 : vector<2x32xf32>
    %cst_69 = arith.constant 1.000000e+00 : f32
    %158 = vector.broadcast %cst_69 : f32 to vector<2x32xf32>
    %159 = arith.addf %158, %157 : vector<2x32xf32>
    %160 = arith.divf %158, %159 : vector<2x32xf32>
    %c0_70 = arith.constant 0 : index
    %c0_71 = arith.constant 0 : index
    %161 = vector.load %arg5[%c0_70, %c0_71] : memref<2x32xf32, #tpu.memory_space<vmem>>, vector<2x32xf32>
    %162 = arith.mulf %152, %161 : vector<2x32xf32>
    %163 = arith.mulf %146, %154 : vector<2x32xf32>
    %164 = arith.addf %162, %163 : vector<2x32xf32>
    %165 = math.tanh %164 : vector<2x32xf32>
    %166 = arith.mulf %160, %165 : vector<2x32xf32>
    %c0_72 = arith.constant 0 : index
    %c0_73 = arith.constant 0 : index
    %167 = vector.load %arg5[%c0_72, %c0_73] : memref<2x32xf32, #tpu.memory_space<vmem>>, vector<2x32xf32>
    tpu.vector_store %arg5[%c0_72, %c0_73], %164 {strides = array<i32>} : memref<2x32xf32, #tpu.memory_space<vmem>>, vector<2x32xf32>,
    %c0_74 = arith.constant 0 : index
    %c0_75 = arith.constant 0 : index
    %168 = vector.load %arg4[%c0_74, %c0_75] : memref<2x32xf32, #tpu.memory_space<vmem>>, vector<2x32xf32>
    tpu.vector_store %arg4[%c0_74, %c0_75], %166 {strides = array<i32>} : memref<2x32xf32, #tpu.memory_space<vmem>>, vector<2x32xf32>,
    %169 = arith.index_cast %132 : i32 to index
    %c0_76 = arith.constant 0 : index
    %c0_77 = arith.constant 0 : index
    %170 = vector.load %arg3[%169, %c0_76, %c0_77] : memref<4x2x32xf32, #tpu.memory_space<vmem>>, vector<1x2x32xf32>
    %171 = vector.shape_cast %170 : vector<1x2x32xf32> to vector<2x32xf32>
    %172 = vector.shape_cast %166 : vector<2x32xf32> to vector<1x2x32xf32>
    tpu.vector_store %arg3[%169, %c0_76, %c0_77], %172 {strides = array<i32>} : memref<4x2x32xf32, #tpu.memory_space<vmem>>, vector<1x2x32xf32>,
    %c1_i32_78 = arith.constant 1 : i32
    return
  }
  func.func @transform_0(%arg0: i32) -> (i32, i32, i32) {
    %c0_i32 = arith.constant 0 : i32
    %c0_i32_0 = arith.constant 0 : i32
    %c0_i32_1 = arith.constant 0 : i32
    return %arg0, %c0_i32, %c0_i32_0 : i32, i32, i32
  }
  func.func @transform_1(%arg0: i32) -> (i32, i32) {
    %c0_i32 = arith.constant 0 : i32
    %c0_i32_0 = arith.constant 0 : i32
    %c0_i32_1 = arith.constant 0 : i32
    return %c0_i32, %c0_i32_0 : i32, i32
  }
  func.func @transform_2(%arg0: i32) -> (i32, i32, i32) {
    %c0_i32 = arith.constant 0 : i32
    %c0_i32_0 = arith.constant 0 : i32
    %c0_i32_1 = arith.constant 0 : i32
    return %arg0, %c0_i32, %c0_i32_0 : i32, i32, i32
  }
}

module attributes {stable_mosaic.version = 11 : i64} {
  func.func @_decode_fused_kernel(%arg0: i32, %arg1: memref<6x32xbf16, #tpu.memory_space<vmem>>, %arg2: memref<32x64xbf16, #tpu.memory_space<vmem>>, %arg3: memref<1x64xf32, #tpu.memory_space<vmem>>, %arg4: memref<32x128xbf16, #tpu.memory_space<vmem>>, %arg5: memref<6x128xf32, #tpu.memory_space<vmem>>) attributes {dimension_semantics = [#tpu.dimension_semantics<parallel>], iteration_bounds = array<i64: 1>, scalar_prefetch = 0 : i64, scratch_operands = 0 : i64, tpu.core_type = #tpu.core_type<tc>, window_params = [{transform_indices = @transform_0, window_bounds = array<i64: 6, 32>}, {pipeline_mode = #tpu.pipeline_mode<synchronous>, transform_indices = @transform_1, window_bounds = array<i64: 32, 64>}, {pipeline_mode = #tpu.pipeline_mode<synchronous>, transform_indices = @transform_2, window_bounds = array<i64: 1, 64>}, {pipeline_mode = #tpu.pipeline_mode<synchronous>, transform_indices = @transform_3, window_bounds = array<i64: 32, 128>}, {transform_indices = @transform_4, window_bounds = array<i64: 6, 128>}]} {
    %c0 = arith.constant 0 : index
    %c0_0 = arith.constant 0 : index
    %0 = vector.load %arg1[%c0, %c0_0] : memref<6x32xbf16, #tpu.memory_space<vmem>>, vector<6x32xbf16>
    %c0_1 = arith.constant 0 : index
    %c0_2 = arith.constant 0 : index
    %1 = vector.load %arg2[%c0_1, %c0_2] : memref<32x64xbf16, #tpu.memory_space<vmem>>, vector<32x64xbf16>
    %cst = arith.constant dense<0.000000e+00> : vector<6x64xf32>
    %2 = tpu.matmul %0, %1, %cst {dimension_numbers = #tpu.dot_dimension_numbers<[1], [0], [0], [1], [0, 0, 1, 1], [], []>} : vector<6x32xbf16>, vector<32x64xbf16>, vector<6x64xf32> -> vector<6x64xf32>
    %c0_3 = arith.constant 0 : index
    %c0_4 = arith.constant 0 : index
    %3 = vector.load %arg3[%c0_3, %c0_4] : memref<1x64xf32, #tpu.memory_space<vmem>>, vector<1x64xf32>
    %4 = vector.broadcast %3 : vector<1x64xf32> to vector<6x64xf32>
    %5 = arith.addf %2, %4 : vector<6x64xf32>
    %6 = vector.extract_strided_slice %5 {offsets = [0, 0], sizes = [6, 32], strides = [1, 1]} : vector<6x64xf32> to vector<6x32xf32>
    %7 = vector.extract_strided_slice %5 {offsets = [0, 32], sizes = [6, 32], strides = [1, 1]} : vector<6x64xf32> to vector<6x32xf32>
    %8 = arith.negf %7 : vector<6x32xf32>
    %9 = math.exp %8 : vector<6x32xf32>
    %cst_5 = arith.constant 1.000000e+00 : f32
    %10 = vector.broadcast %cst_5 : f32 to vector<6x32xf32>
    %11 = arith.addf %10, %9 : vector<6x32xf32>
    %12 = arith.divf %10, %11 : vector<6x32xf32>
    %13 = arith.mulf %6, %12 : vector<6x32xf32>
    %14 = arith.truncf %13 : vector<6x32xf32> to vector<6x32xbf16>
    %c0_6 = arith.constant 0 : index
    %c0_7 = arith.constant 0 : index
    %15 = vector.load %arg4[%c0_6, %c0_7] : memref<32x128xbf16, #tpu.memory_space<vmem>>, vector<32x128xbf16>
    %cst_8 = arith.constant dense<0.000000e+00> : vector<6x128xf32>
    %16 = tpu.matmul %14, %15, %cst_8 {dimension_numbers = #tpu.dot_dimension_numbers<[1], [0], [0], [1], [0, 0, 1, 1], [], []>} : vector<6x32xbf16>, vector<32x128xbf16>, vector<6x128xf32> -> vector<6x128xf32>
    %c0_9 = arith.constant 0 : index
    %c0_10 = arith.constant 0 : index
    %17 = vector.load %arg5[%c0_9, %c0_10] : memref<6x128xf32, #tpu.memory_space<vmem>>, vector<6x128xf32>
    tpu.vector_store %arg5[%c0_9, %c0_10], %16 {strides = array<i32>} : memref<6x128xf32, #tpu.memory_space<vmem>>, vector<6x128xf32>,
    return
  }
  func.func @transform_0(%arg0: i32) -> (i32, i32) {
    %c0_i32 = arith.constant 0 : i32
    %c0_i32_0 = arith.constant 0 : i32
    return %arg0, %c0_i32 : i32, i32
  }
  func.func @transform_1(%arg0: i32) -> (i32, i32) {
    %c0_i32 = arith.constant 0 : i32
    %c0_i32_0 = arith.constant 0 : i32
    %c0_i32_1 = arith.constant 0 : i32
    return %c0_i32, %c0_i32_0 : i32, i32
  }
  func.func @transform_2(%arg0: i32) -> (i32, i32) {
    %c0_i32 = arith.constant 0 : i32
    %c0_i32_0 = arith.constant 0 : i32
    %c0_i32_1 = arith.constant 0 : i32
    return %c0_i32, %c0_i32_0 : i32, i32
  }
  func.func @transform_3(%arg0: i32) -> (i32, i32) {
    %c0_i32 = arith.constant 0 : i32
    %c0_i32_0 = arith.constant 0 : i32
    %c0_i32_1 = arith.constant 0 : i32
    return %c0_i32, %c0_i32_0 : i32, i32
  }
  func.func @transform_4(%arg0: i32) -> (i32, i32) {
    %c0_i32 = arith.constant 0 : i32
    %c0_i32_0 = arith.constant 0 : i32
    return %arg0, %c0_i32 : i32, i32
  }
}

module attributes {stable_mosaic.version = 11 : i64} {
  func.func @_decode_fused_kernel(%arg0: i32, %arg1: memref<16x16xbf16, #tpu.memory_space<vmem>>, %arg2: memref<16x32xbf16, #tpu.memory_space<vmem>>, %arg3: memref<1x32xf32, #tpu.memory_space<vmem>>, %arg4: memref<16x64xbf16, #tpu.memory_space<vmem>>, %arg5: memref<16x64xf32, #tpu.memory_space<vmem>>) attributes {dimension_semantics = [#tpu.dimension_semantics<parallel>], iteration_bounds = array<i64: 2>, scalar_prefetch = 0 : i64, scratch_operands = 0 : i64, tpu.core_type = #tpu.core_type<tc>, window_params = [{transform_indices = @transform_0, window_bounds = array<i64: 16, 16>}, {pipeline_mode = #tpu.pipeline_mode<synchronous>, transform_indices = @transform_1, window_bounds = array<i64: 16, 32>}, {pipeline_mode = #tpu.pipeline_mode<synchronous>, transform_indices = @transform_2, window_bounds = array<i64: 1, 32>}, {pipeline_mode = #tpu.pipeline_mode<synchronous>, transform_indices = @transform_3, window_bounds = array<i64: 16, 64>}, {transform_indices = @transform_4, window_bounds = array<i64: 16, 64>}]} {
    %c0 = arith.constant 0 : index
    %c0_0 = arith.constant 0 : index
    %0 = vector.load %arg1[%c0, %c0_0] : memref<16x16xbf16, #tpu.memory_space<vmem>>, vector<16x16xbf16>
    %c0_1 = arith.constant 0 : index
    %c0_2 = arith.constant 0 : index
    %1 = vector.load %arg2[%c0_1, %c0_2] : memref<16x32xbf16, #tpu.memory_space<vmem>>, vector<16x32xbf16>
    %cst = arith.constant dense<0.000000e+00> : vector<16x32xf32>
    %2 = tpu.matmul %0, %1, %cst {dimension_numbers = #tpu.dot_dimension_numbers<[1], [0], [0], [1], [0, 0, 1, 1], [], []>} : vector<16x16xbf16>, vector<16x32xbf16>, vector<16x32xf32> -> vector<16x32xf32>
    %c0_3 = arith.constant 0 : index
    %c0_4 = arith.constant 0 : index
    %3 = vector.load %arg3[%c0_3, %c0_4] : memref<1x32xf32, #tpu.memory_space<vmem>>, vector<1x32xf32>
    %4 = vector.broadcast %3 : vector<1x32xf32> to vector<16x32xf32>
    %5 = arith.addf %2, %4 : vector<16x32xf32>
    %6 = vector.extract_strided_slice %5 {offsets = [0, 0], sizes = [16, 16], strides = [1, 1]} : vector<16x32xf32> to vector<16x16xf32>
    %7 = vector.extract_strided_slice %5 {offsets = [0, 16], sizes = [16, 16], strides = [1, 1]} : vector<16x32xf32> to vector<16x16xf32>
    %8 = arith.negf %7 : vector<16x16xf32>
    %9 = math.exp %8 : vector<16x16xf32>
    %cst_5 = arith.constant 1.000000e+00 : f32
    %10 = vector.broadcast %cst_5 : f32 to vector<16x16xf32>
    %11 = arith.addf %10, %9 : vector<16x16xf32>
    %12 = arith.divf %10, %11 : vector<16x16xf32>
    %13 = arith.mulf %6, %12 : vector<16x16xf32>
    %14 = arith.truncf %13 : vector<16x16xf32> to vector<16x16xbf16>
    %c0_6 = arith.constant 0 : index
    %c0_7 = arith.constant 0 : index
    %15 = vector.load %arg4[%c0_6, %c0_7] : memref<16x64xbf16, #tpu.memory_space<vmem>>, vector<16x64xbf16>
    %cst_8 = arith.constant dense<0.000000e+00> : vector<16x64xf32>
    %16 = tpu.matmul %14, %15, %cst_8 {dimension_numbers = #tpu.dot_dimension_numbers<[1], [0], [0], [1], [0, 0, 1, 1], [], []>} : vector<16x16xbf16>, vector<16x64xbf16>, vector<16x64xf32> -> vector<16x64xf32>
    %c0_9 = arith.constant 0 : index
    %c0_10 = arith.constant 0 : index
    %17 = vector.load %arg5[%c0_9, %c0_10] : memref<16x64xf32, #tpu.memory_space<vmem>>, vector<16x64xf32>
    tpu.vector_store %arg5[%c0_9, %c0_10], %16 {strides = array<i32>} : memref<16x64xf32, #tpu.memory_space<vmem>>, vector<16x64xf32>,
    return
  }
  func.func @transform_0(%arg0: i32) -> (i32, i32) {
    %c0_i32 = arith.constant 0 : i32
    %c0_i32_0 = arith.constant 0 : i32
    return %arg0, %c0_i32 : i32, i32
  }
  func.func @transform_1(%arg0: i32) -> (i32, i32) {
    %c0_i32 = arith.constant 0 : i32
    %c0_i32_0 = arith.constant 0 : i32
    %c0_i32_1 = arith.constant 0 : i32
    return %c0_i32, %c0_i32_0 : i32, i32
  }
  func.func @transform_2(%arg0: i32) -> (i32, i32) {
    %c0_i32 = arith.constant 0 : i32
    %c0_i32_0 = arith.constant 0 : i32
    %c0_i32_1 = arith.constant 0 : i32
    return %c0_i32, %c0_i32_0 : i32, i32
  }
  func.func @transform_3(%arg0: i32) -> (i32, i32) {
    %c0_i32 = arith.constant 0 : i32
    %c0_i32_0 = arith.constant 0 : i32
    %c0_i32_1 = arith.constant 0 : i32
    return %c0_i32, %c0_i32_0 : i32, i32
  }
  func.func @transform_4(%arg0: i32) -> (i32, i32) {
    %c0_i32 = arith.constant 0 : i32
    %c0_i32_0 = arith.constant 0 : i32
    return %arg0, %c0_i32 : i32, i32
  }
}

module attributes {stable_mosaic.version = 11 : i64} {
  func.func @_decode_fused_kernel(%arg0: i32, %arg1: memref<72x8xbf16, #tpu.memory_space<vmem>>, %arg2: memref<8x16xbf16, #tpu.memory_space<vmem>>, %arg3: memref<1x16xf32, #tpu.memory_space<vmem>>, %arg4: memref<8x8xbf16, #tpu.memory_space<vmem>>, %arg5: memref<72x8xf32, #tpu.memory_space<vmem>>) attributes {dimension_semantics = [#tpu.dimension_semantics<parallel>], iteration_bounds = array<i64: 2>, scalar_prefetch = 0 : i64, scratch_operands = 0 : i64, tpu.core_type = #tpu.core_type<tc>, window_params = [{transform_indices = @transform_0, window_bounds = array<i64: 72, 8>}, {pipeline_mode = #tpu.pipeline_mode<synchronous>, transform_indices = @transform_1, window_bounds = array<i64: 8, 16>}, {pipeline_mode = #tpu.pipeline_mode<synchronous>, transform_indices = @transform_2, window_bounds = array<i64: 1, 16>}, {pipeline_mode = #tpu.pipeline_mode<synchronous>, transform_indices = @transform_3, window_bounds = array<i64: 8, 8>}, {transform_indices = @transform_4, window_bounds = array<i64: 72, 8>}]} {
    %c0 = arith.constant 0 : index
    %c0_0 = arith.constant 0 : index
    %0 = vector.load %arg1[%c0, %c0_0] : memref<72x8xbf16, #tpu.memory_space<vmem>>, vector<72x8xbf16>
    %c0_1 = arith.constant 0 : index
    %c0_2 = arith.constant 0 : index
    %1 = vector.load %arg2[%c0_1, %c0_2] : memref<8x16xbf16, #tpu.memory_space<vmem>>, vector<8x16xbf16>
    %cst = arith.constant dense<0.000000e+00> : vector<72x16xf32>
    %2 = tpu.matmul %0, %1, %cst {dimension_numbers = #tpu.dot_dimension_numbers<[1], [0], [0], [1], [0, 0, 1, 1], [], []>} : vector<72x8xbf16>, vector<8x16xbf16>, vector<72x16xf32> -> vector<72x16xf32>
    %c0_3 = arith.constant 0 : index
    %c0_4 = arith.constant 0 : index
    %3 = vector.load %arg3[%c0_3, %c0_4] : memref<1x16xf32, #tpu.memory_space<vmem>>, vector<1x16xf32>
    %4 = vector.broadcast %3 : vector<1x16xf32> to vector<72x16xf32>
    %5 = arith.addf %2, %4 : vector<72x16xf32>
    %6 = vector.extract_strided_slice %5 {offsets = [0, 0], sizes = [72, 8], strides = [1, 1]} : vector<72x16xf32> to vector<72x8xf32>
    %7 = vector.extract_strided_slice %5 {offsets = [0, 8], sizes = [72, 8], strides = [1, 1]} : vector<72x16xf32> to vector<72x8xf32>
    %8 = arith.negf %7 : vector<72x8xf32>
    %9 = math.exp %8 : vector<72x8xf32>
    %cst_5 = arith.constant 1.000000e+00 : f32
    %10 = vector.broadcast %cst_5 : f32 to vector<72x8xf32>
    %11 = arith.addf %10, %9 : vector<72x8xf32>
    %12 = arith.divf %10, %11 : vector<72x8xf32>
    %13 = arith.mulf %6, %12 : vector<72x8xf32>
    %14 = arith.truncf %13 : vector<72x8xf32> to vector<72x8xbf16>
    %c0_6 = arith.constant 0 : index
    %c0_7 = arith.constant 0 : index
    %15 = vector.load %arg4[%c0_6, %c0_7] : memref<8x8xbf16, #tpu.memory_space<vmem>>, vector<8x8xbf16>
    %cst_8 = arith.constant dense<0.000000e+00> : vector<72x8xf32>
    %16 = tpu.matmul %14, %15, %cst_8 {dimension_numbers = #tpu.dot_dimension_numbers<[1], [0], [0], [1], [0, 0, 1, 1], [], []>} : vector<72x8xbf16>, vector<8x8xbf16>, vector<72x8xf32> -> vector<72x8xf32>
    %c0_9 = arith.constant 0 : index
    %c0_10 = arith.constant 0 : index
    %17 = vector.load %arg5[%c0_9, %c0_10] : memref<72x8xf32, #tpu.memory_space<vmem>>, vector<72x8xf32>
    tpu.vector_store %arg5[%c0_9, %c0_10], %16 {strides = array<i32>} : memref<72x8xf32, #tpu.memory_space<vmem>>, vector<72x8xf32>,
    return
  }
  func.func @transform_0(%arg0: i32) -> (i32, i32) {
    %c0_i32 = arith.constant 0 : i32
    %c0_i32_0 = arith.constant 0 : i32
    return %arg0, %c0_i32 : i32, i32
  }
  func.func @transform_1(%arg0: i32) -> (i32, i32) {
    %c0_i32 = arith.constant 0 : i32
    %c0_i32_0 = arith.constant 0 : i32
    %c0_i32_1 = arith.constant 0 : i32
    return %c0_i32, %c0_i32_0 : i32, i32
  }
  func.func @transform_2(%arg0: i32) -> (i32, i32) {
    %c0_i32 = arith.constant 0 : i32
    %c0_i32_0 = arith.constant 0 : i32
    %c0_i32_1 = arith.constant 0 : i32
    return %c0_i32, %c0_i32_0 : i32, i32
  }
  func.func @transform_3(%arg0: i32) -> (i32, i32) {
    %c0_i32 = arith.constant 0 : i32
    %c0_i32_0 = arith.constant 0 : i32
    %c0_i32_1 = arith.constant 0 : i32
    return %c0_i32, %c0_i32_0 : i32, i32
  }
  func.func @transform_4(%arg0: i32) -> (i32, i32) {
    %c0_i32 = arith.constant 0 : i32
    %c0_i32_0 = arith.constant 0 : i32
    return %arg0, %c0_i32 : i32, i32
  }
}

</mosaic_0001>

<bundles_post_ra>
// kernel: demucs_forward.15
= control target key start
LH: loop header
LB: loop body
LE: loop exit
PB: predicated region body
PF: predicated region fallthrough
CT: control target
= control target key end

     0   :  { %v28_v0 = vlaneseq  ;;  %vm14_vm0 = vcmask 1024   ;;  %v83_v3 = vmov 1966171168   ;;  %v84_v8 = vmov 0.0   ;;  %s128_s0 = inlined_call_operand.vmem [shape: f32[2,1,64], index: 0, kind: input, shape index: {}]   ;;  %s129_s1 = inlined_call_operand.vmem [shape: f32[2,1], index: 1, kind: output, shape index: {0}]   ;;  %s130_s2 = inlined_call_operand.vmem [shape: f32[2,1], index: 2, kind: output, shape index: {1}]  }
   0x1   :  { %v17_v1 = vld [vmem:[%s128_s0] sm:$0x1]  ;;  %v18_v2 = vld [vmem:[%s128_s0 + $0x1] sm:$0x1]  ;;  %v26_v4 = vunpack.c.l.s4 %v83_v3  ;;  %15 = vst.msk [vmem:[%s129_s1] sm:$0x3] %vm14_vm0, %v84_v8 }
   0x2   :  { %v29_v5 = vshrl.u32 %v28_v0, 7  ;;  %v48_v6 = vmul.f32 %v17_v1, %v17_v1  ;;  %v49_v7 = vmul.f32 %v18_v2, %v18_v2  ;;  %v24_v9 = vcombine.low %v17_v1, %v18_v2  ;;  %16 = vst.msk [vmem:[%s130_s2] sm:$0x3] %vm14_vm0, %v84_v8 }
   0x3   :  { %v27_v10 = vunpack.c.0.s8 %v26_v4  ;;  %vm40_vm1 = vcmask 517120  }
   0x4   :  { %v52_v11 = vcombine.low %v48_v6, %v49_v7 }
   0x5   :  { %v30_v12 = vsub.s32 %v27_v10, %v29_v5 }
   0x7   :  { %v31_v13 = vrot.slane %v24_v9, %v30_v12  ;;  %v59_v14 = vrot.slane %v52_v11, %v30_v12 }
   0x8   :  { %v21_v19 = vld [vmem:[%s129_s1] sm:$0x3] }
   0x9   :  { %v38_v15 = vrot.slane %v31_v13, %v30_v12  ;;  %v66_v16 = vrot.slane %v59_v14, %v30_v12  ;;  %v47_v22 = vld [vmem:[%s130_s2] sm:$0x3] }
   0xb   :  { %v41_v17 = vsel %vm40_vm1, %v38_v15, 0.0  ;;  %v68_v18 = vsel %vm40_vm1, %v66_v16, 0.0 }
   0xc   :  { %42 = vadd.xlane.f32.xlu0 %v41_v17 }
  0x10   :  { %69 = vadd.xlane.f32.xlu0 %v68_v18 }
  0x99   :  { %v43_v20 = vpop.xlane.xlu0 %42 }
  0x9a   :  { %v44_v21 = vadd.f32 %v43_v20, %v21_v19 }
  0x9c   :  { %46 = vst.msk [vmem:[%s129_s1] sm:$0x3] %vm14_vm0, %v44_v21 }
  0x9d   :  { %v70_v23 = vpop.xlane.xlu0 %69 }
  0x9e   :  { %v71_v24 = vadd.f32 %v70_v23, %v47_v22 }
  0xa0   :  { %72 = vst.msk [vmem:[%s130_s2] sm:$0x3] %vm14_vm0, %v71_v24 }

// kernel: demucs_forward.16
= control target key start
LH: loop header
LB: loop body
LE: loop exit
PB: predicated region body
PF: predicated region fallthrough
CT: control target
= control target key end

     0   :  { %v565_v1 = vmov 0   ;;  %v64_v21 = vlaneseq  ;;  %vm332_vm0 = vcmask 1046528   ;;  %v566_v23 = vmov 1966171168   ;;  %s740_s1 = inlined_call_operand.vmem [shape: bf16[367,256], index: 1, kind: input, shape index: {}]   ;;  %s741_s0 = inlined_call_operand.vmem [shape: bf16[2,367], index: 0, kind: input, shape index: {}]   ;;  %s742_s2 = inlined_call_operand.vmem [shape: f32[1,256], index: 2, kind: input, shape index: {}]   ;;  %s743_s3 = inlined_call_operand.vmem [shape: f32[2,256], index: 3, kind: output, shape index: {}]  }
   0x1   :  { %v496_v0 = vld [vmem:[%s740_s1 + $0x4] ss:$8 sps:$4 sm:$0xff]   ;;  %415 = vmatprep.mubr.bf16.mxu0 %v565_v1  ;;  %v498_v2 = vld [vmem:[%s740_s1] ss:$8 sps:$4 sm:$0xff]   ;;  %v499_v3 = vld [vmem:[%s740_s1 + $0x14] ss:$8 sps:$4 sm:$0xff]   ;;  %v84_v24 = vunpack.c.l.s4 %v566_v23 }
   0x2   :  { %342 = vmatprep.subr.bf16.mxu1 %v496_v0  ;;  %v501_v4 = vld [vmem:[%s740_s1 + $0x10] ss:$8 sps:$4 sm:$0xff]   ;;  %v502_v5 = vld [vmem:[%s740_s1 + $0x24] ss:$8 sps:$4 sm:$0xff]   ;;  %v504_v6 = vld [vmem:[%s740_s1 + $0x20] ss:$8 sps:$4 sm:$0xff]  }
   0x3   :  { %343 = vmatpush1.bf16.msra.mxu1 %v498_v2  ;;  %v505_v7 = vld [vmem:[%s740_s1 + $0x34] ss:$8 sps:$4 sm:$0xff]   ;;  %v507_v8 = vld [vmem:[%s740_s1 + $0x30] ss:$8 sps:$4 sm:$0xff]   ;;  %v508_v9 = vld [vmem:[%s740_s1 + $0x44] ss:$8 sps:$4 sm:$0xff]   ;;  %v85_v34 = vunpack.c.0.s8 %v84_v24 }
   0x4   :  { %344 = vmatprep.subr.bf16.mxu1 %v499_v3  ;;  %v523_v10 = vld [vmem:[%s740_s1 + $0x104] ss:$8 sps:$4 sm:$0xff]   ;;  %v510_v11 = vld [vmem:[%s740_s1 + $0x40] ss:$8 sps:$4 sm:$0xff]   ;;  %v529_v13 = vld [vmem:[%s740_s1 + $0x114] ss:$8 sps:$4 sm:$0xff]  }
   0x5   :  { %383 = vmatprep.subr.bf16.mxu0 %v523_v10  ;;  %v527_v12 = vld [vmem:[%s740_s1 + $0x100] ss:$8 sps:$4 sm:$0xff]   ;;  %v511_v14 = vld [vmem:[%s740_s1 + $0x54] ss:$8 sps:$4 sm:$0xff]   ;;  %v533_v15 = vld [vmem:[%s740_s1 + $0x110] ss:$8 sps:$4 sm:$0xff]  }
   0x6   :  { %384 = vmatpush1.bf16.msra.mxu0 %v527_v12  ;;  %v535_v16 = vld [vmem:[%s740_s1 + $0x124] ss:$8 sps:$4 sm:$0xff]   ;;  %v513_v17 = vld [vmem:[%s740_s1 + $0x50] ss:$8 sps:$4 sm:$0xff]   ;;  %v539_v19 = vld [vmem:[%s740_s1 + $0x120] ss:$8 sps:$4 sm:$0xff]  }
   0x7   :  { %345 = vmatpush1.bf16.msra.mxu1 %v501_v4  ;;  %385 = vmatprep.subr.bf16.mxu0 %v529_v13  ;;  %v514_v18 = vld [vmem:[%s740_s1 + $0x64] ss:$8 sps:$4 sm:$0xff]   ;;  %v541_v20 = vld [vmem:[%s740_s1 + $0x134] ss:$8 sps:$4 sm:$0xff]   ;;  %v516_v22 = vld [vmem:[%s740_s1 + $0x60] ss:$8 sps:$4 sm:$0xff]  }
   0x8   :  { %346 = vmatprep.subr.bf16.mxu1 %v502_v5  ;;  %v517_v25 = vld [vmem:[%s740_s1 + $0x74] ss:$8 sps:$4 sm:$0xff]   ;;  %v545_v26 = vld [vmem:[%s740_s1 + $0x130] ss:$8 sps:$4 sm:$0xff]   ;;  %v547_v27 = vld [vmem:[%s740_s1 + $0x144] ss:$8 sps:$4 sm:$0xff]  }
   0x9   :  { %vm333_vm1 = vcmask 1047552   ;;  %v567_v28 = vmov 65535   ;;  %v660_v30 = vshrl.u32 %v64_v21, 7  ;;  %v519_v31 = vld [vmem:[%s740_s1 + $0x70] ss:$8 sps:$4 sm:$0xff]   ;;  %vm328_vm2 = vcmask 908288  }
   0xa   :  { %386 = vmatpush1.bf16.msra.mxu0 %v533_v15  ;;  %v334_v29 = vsel %vm332_vm0, 4294967295, %v567_v28  ;;  %v520_v32 = vld [vmem:[%s740_s1 + $0x84] ss:$8 sps:$4 sm:$0xff]   ;;  %v551_v33 = vld [vmem:[%s740_s1 + $0x140] ss:$8 sps:$4 sm:$0xff]  }
   0xb   :  { %347 = vmatpush1.bf16.msra.mxu1 %v504_v6  ;;  %387 = vmatprep.subr.bf16.mxu0 %v535_v16  ;;  %v553_v35 = vld [vmem:[%s740_s1 + $0x154] ss:$8 sps:$4 sm:$0xff]   ;;  %v559_v36 = vld [vmem:[%s740_s1 + $0x164] ss:$8 sps:$4 sm:$0xff]   ;;  %v335_v37 = vsel %vm333_vm1, %v334_v29, 0  ;;  %v88_v40 = vsub.s32 %v85_v34, %v660_v30  ;;  %v66_v3 = vsub.s32 0, %v660_v30 }
   0xc   :  { %348 = vmatprep.subr.bf16.mxu1 %v505_v7  ;;  %v522_v38 = vld [vmem:[%s740_s1 + $0x80] ss:$8 sps:$4 sm:$0xff]   ;;  %v525_v41 = vld [vmem:[%s740_s1 + $0x94] ss:$8 sps:$4 sm:$0xff]   ;;  %v557_v42 = vld [vmem:[%s740_s1 + $0x150] ss:$8 sps:$4 sm:$0xff]   ;;  %v340_v45 = vand.u32 %v559_v36, %v335_v37 }
   0xd   :  { %v440_v39 = vld.sshfl [vmem:[%s741_s0] sm:$0x13 pattern:$0x75316420]  ;;  %v528_v47 = vld [vmem:[%s740_s1 + $0x90] ss:$8 sps:$4 sm:$0xff]  }
   0xe   :  { %388 = vmatpush1.bf16.msra.mxu0 %v539_v19  ;;  %v563_v43 = vld [vmem:[%s740_s1 + $0x160] ss:$8 sps:$4 sm:$0xff]   ;;  %v82_v44 = vcombine.high %v440_v39, %v440_v39  ;;  %v89_v48 = vrot.slane %v440_v39, %v88_v40  ;;  %v531_v49 = vld [vmem:[%s740_s1 + $0xa4] ss:$8 sps:$4 sm:$0xff]   ;;  %v537_v53 = vld [vmem:[%s740_s1 + $0xb4] ss:$8 sps:$4 sm:$0xff]  }
   0xf   :  { %349 = vmatpush1.bf16.msra.mxu1 %v507_v8  ;;  %389 = vmatprep.subr.bf16.mxu0 %v541_v20  ;;  %v337_v50 = vand.u32 %v563_v43, %v335_v37  ;;  %v534_v51 = vld [vmem:[%s740_s1 + $0xa0] ss:$8 sps:$4 sm:$0xff]   ;;  %v540_v54 = vld [vmem:[%s740_s1 + $0xb0] ss:$8 sps:$4 sm:$0xff]   ;;  %v543_v55 = vld [vmem:[%s740_s1 + $0xc4] ss:$8 sps:$4 sm:$0xff]  }
  0x10   :  { %350 = vmatprep.subr.bf16.mxu1 %v508_v9  ;;  %v96_v46 = vrot.slane %v82_v44, %v88_v40  ;;  %v97_v52 = vcombine.high %v89_v48, %v89_v48  ;;  %v546_v56 = vld [vmem:[%s740_s1 + $0xc0] ss:$8 sps:$4 sm:$0xff]   ;;  %v549_v57 = vld [vmem:[%s740_s1 + $0xd4] ss:$8 sps:$4 sm:$0xff]   ;;  %v552_v58 = vld [vmem:[%s740_s1 + $0xd0] ss:$8 sps:$4 sm:$0xff]  }
  0x11   :  { %v555_v59 = vld [vmem:[%s740_s1 + $0xe4] ss:$8 sps:$4 sm:$0xff]   ;;  %v558_v60 = vld [vmem:[%s740_s1 + $0xe0] ss:$8 sps:$4 sm:$0xff]   ;;  %v561_v61 = vld [vmem:[%s740_s1 + $0xf4] ss:$8 sps:$4 sm:$0xff]  }
  0x12   :  { %390 = vmatpush1.bf16.msra.mxu0 %v545_v26  ;;  %374 = vmatprep.mubr.bf16.mxu1 %v96_v46  ;;  %v564_v62 = vld [vmem:[%s740_s1 + $0xf0] ss:$8 sps:$4 sm:$0xff]   ;;  %v62_v4 = vld [vmem:[%s742_s2] sm:$0x3]  ;;  %v70_v5 = vsub.s32 1, %v660_v30 }
  0x13   :  { %351 = vmatpush1.bf16.msra.mxu1 %v510_v11  ;;  %391 = vmatprep.subr.bf16.mxu0 %v547_v27  ;;  %v67_v6 = vrot.slane %v62_v4, %v66_v3 }
  0x14   :  { %352 = vmatprep.subr.bf16.mxu1 %v511_v14  ;;  %v71_v7 = vrot.slane %v62_v4, %v70_v5 }
  0x16   :  { %392 = vmatpush1.bf16.msra.mxu0 %v551_v33 }
  0x17   :  { %353 = vmatpush1.bf16.msra.mxu1 %v513_v17  ;;  %393 = vmatprep.subr.bf16.mxu0 %v553_v35 }
  0x18   :  { %354 = vmatprep.subr.bf16.mxu1 %v514_v18 }
  0x1a   :  { %394 = vmatpush1.bf16.msra.mxu0 %v557_v42 }
  0x1b   :  { %355 = vmatpush1.bf16.msra.mxu1 %v516_v22  ;;  %395 = vmatprep.subr.bf16.mxu0 %v340_v45 }
  0x1c   :  { %356 = vmatprep.subr.bf16.mxu1 %v517_v25 }
  0x1e   :  { %396 = vmatpush1.bf16.msra.mxu0 %v337_v50 }
  0x1f   :  { %357 = vmatpush1.bf16.msra.mxu1 %v519_v31 }
  0x20   :  { %358 = vmatprep.subr.bf16.mxu1 %v520_v32 }
  0x21   :  { %487 = vmatmul.mubr.msk.bf16.vlgmr.msra.gmra.mrb[0].mxu0 %vm328_vm2, %v97_v52 }
  0x23   :  { %359 = vmatpush1.bf16.msra.mxu1 %v522_v38 }
  0x24   :  { %360 = vmatprep.subr.bf16.mxu1 %v525_v41 }
  0x27   :  { %361 = vmatpush1.bf16.msra.mxu1 %v528_v47 }
  0x28   :  { %362 = vmatprep.subr.bf16.mxu1 %v531_v49 }
  0x2b   :  { %363 = vmatpush1.bf16.msra.mxu1 %v534_v51 }
  0x2c   :  { %364 = vmatprep.subr.bf16.mxu1 %v537_v53 }
  0x2f   :  { %365 = vmatpush1.bf16.msra.mxu1 %v540_v54 }
  0x30   :  { %366 = vmatprep.subr.bf16.mxu1 %v543_v55 }
  0x33   :  { %367 = vmatpush1.bf16.msra.mxu1 %v546_v56 }
  0x34   :  { %368 = vmatprep.subr.bf16.mxu1 %v549_v57 }
  0x37   :  { %369 = vmatpush1.bf16.msra.mxu1 %v552_v58 }
  0x38   :  { %370 = vmatprep.subr.bf16.mxu1 %v555_v59 }
  0x3b   :  { %371 = vmatpush1.bf16.msra.mxu1 %v558_v60 }
  0x3c   :  { %372 = vmatprep.subr.bf16.mxu1 %v561_v61 }
  0x3f   :  { %373 = vmatpush1.bf16.msra.mxu1 %v564_v62 }
  0x42   :  { %375 = vmatmul.mubr.bf16.vlgmr.msra.gmra.mrb[0].mxu1 %v89_v48 }
  0xf4   :  { %v417_v63 = vpop.f32.mrb[0].mxu0 }
  0xf5   :  { %v419_v0 = vpop.f32.mrb[1].mxu0 }
  0xf6   :  { %v421_v1 = vpop.f32.mrb[2].mxu0 }
  0xf7   :  { %v422_v2 = vpop.f32.mrb[3].mxu0 }
 0x115   :  { %v376_v8 = vpop.f32.mrb[0].mxu1 }
 0x116   :  { %v377_v9 = vadd.f32 %v376_v8, %v67_v6  ;;  %v378_v10 = vpop.f32.mrb[1].mxu1 }
 0x117   :  { %v379_v11 = vadd.f32 %v378_v10, %v71_v7  ;;  %v380_v12 = vpop.f32.mrb[2].mxu1 }
 0x118   :  { %v418_v13 = vadd.f32 %v417_v63, %v377_v9  ;;  %v381_v14 = vpop.f32.mrb[3].mxu1 }
 0x119   :  { %v420_v15 = vadd.f32 %v419_v0, %v379_v11 }
 0x11b   :  { %v426_v16 = vcombine.low %v418_v13, %v420_v15 }
 0x11d   :  { %488 = vst.sshfl [vmem:[%s743_s3] sm:$0x33 pattern:$0x76325410] %v426_v16 }

// kernel: demucs_forward.18
= control target key start
LH: loop header
LB: loop body
LE: loop exit
PB: predicated region body
PF: predicated region fallthrough
CT: control target
= control target key end

     0   :  { %s1262_s18 = smov 0   ;;  %s1264_s19 = smov 0   ;;  %s1470_s0 = inlined_call_operand.vmem [shape: bf16[136,8], index: 0, kind: input, shape index: {}]   ;;  %s1471_s1 = inlined_call_operand.vmem [shape: bf16[8,8], index: 1, kind: input, shape index: {}]   ;;  %s1472_s2 = inlined_call_operand.vmem [shape: f32[1,8], index: 2, kind: input, shape index: {}]   ;;  %s1473_s3 = inlined_call_operand.vmem [shape: bf16[8,16], index: 3, kind: input, shape index: {}]   ;;  %s1474_s4 = inlined_call_operand.vmem [shape: f32[1,16], index: 4, kind: input, shape index: {}]   ;;  %s1475_s5 = inlined_call_operand.vmem [shape: bf16[136,8], index: 5, kind: output, shape index: {}]  }
   0x1   :  { %s1266_s20 = smov 0  }
   0x2 LB: > { %s1275_s21 = sadd.s32 4294967295, %s1195_s20   ;;  %s1277_s22 = sadd.s32 1, %s1195_s20   ;;  %s1195_s20 = sphi %s1266_s20, %s1482_s20   ;;  %s1191_s19 = sphi %s1264_s19, %s1481_s19   ;;  %s1187_s18 = sphi %s1262_s18, %s1480_s18  }
   0x3   : > { %s129_s23 = ssub.s32 %s1195_s20, %s1277_s22  ;;  %s132_s24 = sadd.s32 1, %s1191_s19 }
   0x4   : > { %p130_p0 = scmp.eq.s32.totalorder %s129_s23, 0  ;;  %p142_p1 = scmp.ne.s32.totalorder %s1191_s19, %s1187_s18 }
   0x5   : > { %p143_p2 = scmp.eq.s32.totalorder %s1275_s21, 1  ;;  %p888_p3 = scmp.ge.s32.totalorder %s1195_s20, 1 }
   0x6   : > { %s1285_s25 = scalar_select %p130_p0, %s1191_s19, %s132_s24  }
   0x7   : > { %p1287_p4 = por %p143_p2, %p142_p1  ;;  %p196_p5 = scmp.lt.s32.totalorder %s1195_s20, 3 }
   0x9   : > { %p197_p6 = pnand %p888_p3, %p196_p5 }
   0xa   : > { %v256_v0 = vld [vmem:[%s1471_s1] sm:$0xf] (!%p197_p6)  ;;  %vm303_vm0 = vcmask (!%p197_p6), 1043456   ;;  %s1295_s29 = smul.u32 (!%p197_p6), 9, %s1275_s21  ;;  %v1229_v1 = vmov (!%p197_p6), 0.0   ;;  %vm1230_vm1 = vmmov (!%p197_p6), 0  }
   0xb   : > { %200 = sbr.rel (%p197_p6) target bundleno = 702 (0x2be), region = 40  ;;  %959 = vmatprep.subr.bf16.mxu0 (!%p197_p6), %v1229_v1  ;;  %v305_v2 = vsel (!%p197_p6), %vm303_vm0, %v256_v0, 0  ;;  %961 = vmatprep.mubr.msk.bf16.mxu0 (!%p197_p6), %vm1230_vm1, %v1229_v1  ;;  %vm287_vm2 = vcmask (!%p197_p6), 64512   ;;  %v393_v8 = vld [vmem:[%s1473_s3] sm:$0xf] (!%p197_p6)  ;;  %s1231_s16 = smov (!%p197_p6), 120  }
   0xc   : > { %960 = vmatpush3.bf16.msra.mxu0 (!%p197_p6), %v305_v2  ;;  %p232_p7 = scmp.lt.s32.totalorder (!%p197_p6), %s1295_s29, 16  ;;  %981 = vmatprep.subr.bf16.mxu1 (!%p197_p6), %v1229_v1  ;;  %v417_v9 = vsel (!%p197_p6), %vm303_vm0, %v393_v8, 0  ;;  %v890_v10 = vld [vmem:[%s1472_s2] ss:$0 sm:$0xff] (!%p197_p6)  ;;  %s224_s17 = sand.u32 (!%p197_p6), 1, %s1187_s18   ;;  %vm627_vm3 = vcmask (!%p197_p6), 60416  }
   0xd   : > { %983 = vmatprep.mubr.msk.bf16.mxu1 (!%p197_p6), %vm1230_vm1, %v1229_v1  ;;  %982 = vmatpush3.bf16.msra.mxu1 (!%p197_p6), %v417_v9  ;;  %v901_v54 = vld [vmem:[%s1474_s4] ss:$0 sm:$0xff] (!%p197_p6)  ;;  %s1003_s20 = smul.u32 (!%p197_p6), 36, %s224_s17 }
   0xf   : > { %s1383_s23 = scalar_lea.vmem (!%p197_p6), [#allocation2], %s1003_s20  }
  0x12   : > { %s233_s30 = scalar_select %p232_p7, %s1295_s29, 16 }
  0x13   : > { %s645_s18 = ssub.s32 (%p1287_p4), 17, %s1295_s29  ;;  %s946_s24 = smul.u32 (%p1287_p4), 36, %s1275_s21 }
  0x14   : > { %s889_s6 = sshll.u32 %s233_s30, 2  ;;  %p646_p8 = scmp.lt.s32.totalorder (%p1287_p4), %s645_s18, 9 }
  0x15   : > { %s235_s9 = scalar_lea.vmem %s1470_s0, %s889_s6  ;;  %s1418_s30 = scalar_lea.vmem (%p1287_p4), %s1475_s5, %s946_s24  }
  0x16   : > { %v1096_v3 = vld [vmem:[%s235_s9] sm:$0xff]   ;;  %v1097_v4 = vld [vmem:[%s235_s9 + $0x8] sm:$0xff]   ;;  %v1098_v5 = vld [vmem:[%s235_s9 + $0x10] sm:$0xff]  }
  0x17   : > { %962 = vmatmul.mubr.msk.bf16.vlgmr.msra.gmra.mrb[0].mxu0 %vm287_vm2, %v1096_v3  ;;  %v1099_v6 = vld [vmem:[%s235_s9 + $0x18] sm:$0xff]   ;;  %v1100_v7 = vld [vmem:[%s235_s9 + $0x20] ss:$0 sps:$4 sm:$0xff]  }
  0x18   : > { %965 = vmatprep.mubr.msk.bf16.mxu0 %vm1230_vm1, %v1229_v1 }
  0x1f   : > { %966 = vmatmul.mubr.msk.bf16.gmra.mrb[4].mxu0 %vm287_vm2, %v1097_v4 }
  0x20   : > { %969 = vmatprep.mubr.msk.bf16.mxu0 %vm1230_vm1, %v1229_v1 }
  0x27   : > { %970 = vmatmul.mubr.msk.bf16.gmra.mrb[8].mxu0 %vm287_vm2, %v1098_v5 }
  0x28   : > { %973 = vmatprep.mubr.msk.bf16.mxu0 %vm1230_vm1, %v1229_v1 }
  0x2f   : > { %974 = vmatmul.mubr.msk.bf16.gmra.mrb[12].mxu0 %vm287_vm2, %v1099_v6 }
  0x30   : > { %977 = vmatprep.mubr.msk.bf16.mxu0 %vm1230_vm1, %v1229_v1 }
  0x37   : > { %978 = vmatmul.mubr.msk.bf16.gmra.mrb[16].mxu0 %vm287_vm2, %v1100_v7 }
  0xea   : > { %v341_v11 = vpop.f32.mrb[0].mxu0 }
  0xeb   : > { %v342_v12 = vadd.f32 %v890_v10, %v341_v11  ;;  %v963_v13 = vpop.f32.mrb[1].mxu0 }
  0xec   : > { %v344_v14 = vpop.f32.mrb[2].mxu0 }
  0xed   : > { %v345_v15 = vadd.f32 %v890_v10, %v344_v14  ;;  %v964_v16 = vpop.f32.mrb[3].mxu0  ;;  %v379_v17 = vmax.f32 %v342_v12, 0.0 }
  0xef   : > { %v380_v18 = vmax.f32 %v345_v15, 0.0 }
  0xf1   : > { %v388_v19 = vpack.c.bf16 %v380_v18, %v379_v17 }
  0xf2   : > { %v349_v20 = vpop.f32.mrb[4].mxu0 }
  0xf3   : > { %v350_v21 = vadd.f32 %v890_v10, %v349_v20  ;;  %v967_v22 = vpop.f32.mrb[5].mxu0  ;;  %984 = vmatmul.mubr.msk.bf16.vlgmr.msra.gmra.mrb[0].mxu1 %vm287_vm2, %v388_v19 }
  0xf4   : > { %v352_v23 = vpop.f32.mrb[6].mxu0  ;;  %987 = vmatprep.mubr.msk.bf16.mxu1 %vm1230_vm1, %v1229_v1 }
  0xf5   : > { %v353_v24 = vadd.f32 %v890_v10, %v352_v23  ;;  %v968_v25 = vpop.f32.mrb[7].mxu0  ;;  %v381_v26 = vmax.f32 %v350_v21, 0.0 }
  0xf7   : > { %v382_v27 = vmax.f32 %v353_v24, 0.0 }
  0xf9   : > { %v389_v28 = vpack.c.bf16 %v382_v27, %v381_v26 }
  0xfa   : > { %v357_v29 = vpop.f32.mrb[8].mxu0 }
  0xfb   : > { %v358_v30 = vadd.f32 %v890_v10, %v357_v29  ;;  %v971_v31 = vpop.f32.mrb[9].mxu0  ;;  %988 = vmatmul.mubr.msk.bf16.gmra.mrb[4].mxu1 %vm287_vm2, %v389_v28 }
  0xfc   : > { %v360_v32 = vpop.f32.mrb[10].mxu0  ;;  %991 = vmatprep.mubr.msk.bf16.mxu1 %vm1230_vm1, %v1229_v1 }
  0xfd   : > { %v361_v33 = vadd.f32 %v890_v10, %v360_v32  ;;  %v972_v34 = vpop.f32.mrb[11].mxu0  ;;  %v383_v35 = vmax.f32 %v358_v30, 0.0 }
  0xff   : > { %v384_v36 = vmax.f32 %v361_v33, 0.0 }
 0x101   : > { %v390_v37 = vpack.c.bf16 %v384_v36, %v383_v35 }
 0x102   : > { %v365_v38 = vpop.f32.mrb[12].mxu0 }
 0x103   : > { %v366_v39 = vadd.f32 %v890_v10, %v365_v38  ;;  %v975_v40 = vpop.f32.mrb[13].mxu0  ;;  %992 = vmatmul.mubr.msk.bf16.gmra.mrb[8].mxu1 %vm287_vm2, %v390_v37 }
 0x104   : > { %v368_v41 = vpop.f32.mrb[14].mxu0  ;;  %995 = vmatprep.mubr.msk.bf16.mxu1 %vm1230_vm1, %v1229_v1 }
 0x105   : > { %v369_v42 = vadd.f32 %v890_v10, %v368_v41  ;;  %v976_v43 = vpop.f32.mrb[15].mxu0  ;;  %v385_v44 = vmax.f32 %v366_v39, 0.0 }
 0x107   : > { %v386_v45 = vmax.f32 %v369_v42, 0.0 }
 0x109   : > { %v391_v46 = vpack.c.bf16 %v386_v45, %v385_v44 }
 0x10a   : > { %v373_v47 = vpop.f32.mrb[16].mxu0 }
 0x10b   : > { %v374_v48 = vadd.f32 %v890_v10, %v373_v47  ;;  %v979_v49 = vpop.f32.mrb[17].mxu0  ;;  %996 = vmatmul.mubr.msk.bf16.gmra.mrb[12].mxu1 %vm287_vm2, %v391_v46 }
 0x10c   : > { %v376_v50 = vpop.f32.mrb[18].mxu0  ;;  %999 = vmatprep.mubr.msk.bf16.mxu1 %vm1230_vm1, %v1229_v1 }
 0x10d   : > { %v387_v51 = vmax.f32 %v374_v48, 0.0  ;;  %v980_v52 = vpop.f32.mrb[19].mxu0 }
 0x10f   : > { %v392_v53 = vpack.c.bf16 %v387_v51, %v387_v51 }
 0x113   : > { %1000 = vmatmul.mubr.msk.bf16.gmra.mrb[16].mxu1 %vm287_vm2, %v392_v53 }
 0x1c6   : > { %v453_v55 = vpop.f32.mrb[0].mxu1 }
 0x1c7   : > { %v1345_v56 = vadd.f32 %v901_v54, %v453_v55  ;;  %v985_v57 = vpop.f32.mrb[1].mxu1 }
 0x1c8   : > { %v456_v58 = vpop.f32.mrb[2].mxu1 }
 0x1c9   : > { %v907_v59 = vmul.f32 -1.442695, %v1345_v56  ;;  %v1348_v60 = vadd.f32 %v901_v54, %v456_v58  ;;  %v986_v61 = vpop.f32.mrb[3].mxu1 }
 0x1cb   : > { %1101 = vpow2.f32 %v907_v59  ;;  %v908_v62 = vmul.f32 -1.442695, %v1348_v60 }
 0x1cd   : > { %1103 = vpow2.f32 %v908_v62 }
 0x1ce   : > { %v461_v63 = vpop.f32.mrb[4].mxu1 }
 0x1cf   : > { %v1351_v0 = vadd.f32 %v901_v54, %v461_v63  ;;  %v989_v1 = vpop.f32.mrb[5].mxu1 }
 0x1d0   : > { %v464_v2 = vpop.f32.mrb[6].mxu1 }
 0x1d1   : > { %v909_v3 = vmul.f32 -1.442695, %v1351_v0  ;;  %v1354_v4 = vadd.f32 %v901_v54, %v464_v2  ;;  %v990_v5 = vpop.f32.mrb[7].mxu1 }
 0x1d3   : > { %1105 = vpow2.f32 %v909_v3  ;;  %v910_v6 = vmul.f32 -1.442695, %v1354_v4 }
 0x1d5   : > { %v1102_v7 = vpop.eup %1101  ;;  %1107 = vpow2.f32 %v910_v6 }
 0x1d6   : > { %v518_v8 = vadd.f32 1.0, %v1102_v7  ;;  %v469_v9 = vpop.f32.mrb[8].mxu1 }
 0x1d7   : > { %v1104_v10 = vpop.eup %1103  ;;  %v1357_v11 = vadd.f32 %v901_v54, %v469_v9  ;;  %v993_v12 = vpop.f32.mrb[9].mxu1 }
 0x1d8   : > { %1109 = vrcp.f32 %v518_v8  ;;  %v519_v13 = vadd.f32 1.0, %v1104_v10  ;;  %v472_v14 = vpop.f32.mrb[10].mxu1 }
 0x1d9   : > { %v911_v15 = vmul.f32 -1.442695, %v1357_v11  ;;  %v1360_v16 = vadd.f32 %v901_v54, %v472_v14  ;;  %v994_v17 = vpop.f32.mrb[11].mxu1 }
 0x1db   : > { %1111 = vpow2.f32 %v911_v15  ;;  %v912_v18 = vmul.f32 -1.442695, %v1360_v16 }
 0x1dc   : > { %1113 = vrcp.f32 %v519_v13 }
 0x1dd   : > { %v1106_v19 = vpop.eup %1105  ;;  %1115 = vpow2.f32 %v912_v18 }
 0x1de   : > { %v520_v20 = vadd.f32 1.0, %v1106_v19  ;;  %v477_v21 = vpop.f32.mrb[12].mxu1 }
 0x1df   : > { %v1108_v22 = vpop.eup %1107  ;;  %v1363_v23 = vadd.f32 %v901_v54, %v477_v21  ;;  %v997_v24 = vpop.f32.mrb[13].mxu1 }
 0x1e0   : > { %1117 = vrcp.f32 %v520_v20  ;;  %v521_v25 = vadd.f32 1.0, %v1108_v22  ;;  %v480_v26 = vpop.f32.mrb[14].mxu1 }
 0x1e1   : > { %v913_v27 = vmul.f32 -1.442695, %v1363_v23  ;;  %v1366_v28 = vadd.f32 %v901_v54, %v480_v26  ;;  %v998_v29 = vpop.f32.mrb[15].mxu1 }
 0x1e2   : > { %v1110_v30 = vpop.eup %1109 }
 0x1e3   : > { %1119 = vpow2.f32 %v913_v27  ;;  %v914_v31 = vmul.f32 -1.442695, %v1366_v28  ;;  %554 = vrot.lane.b32.xlu0 %v1110_v30, %s1231_s16 }
 0x1e4   : > { %1121 = vrcp.f32 %v521_v25 }
 0x1e5   : > { %v1112_v32 = vpop.eup %1111  ;;  %1123 = vpow2.f32 %v914_v31 }
 0x1e6   : > { %v1114_v33 = vpop.eup %1113  ;;  %v522_v34 = vadd.f32 1.0, %v1112_v32  ;;  %v485_v35 = vpop.f32.mrb[16].mxu1 }
 0x1e7   : > { %v1116_v36 = vpop.eup %1115  ;;  %v1370_v37 = vadd.f32 %v901_v54, %v485_v35  ;;  %556 = vrot.lane.b32.xlu0 %v1114_v33, %s1231_s16  ;;  %v1001_v38 = vpop.f32.mrb[17].mxu1 }
 0x1e8   : > { %1125 = vrcp.f32 %v522_v34  ;;  %v523_v39 = vadd.f32 1.0, %v1116_v36  ;;  %v488_v40 = vpop.f32.mrb[18].mxu1 }
 0x1e9   : > { %v915_v41 = vmul.f32 -1.442695, %v1370_v37  ;;  %v1002_v42 = vpop.f32.mrb[19].mxu1 }
 0x1ea   : > { %v1118_v43 = vpop.eup %1117  ;;  %1127 = vrcp.f32 %v523_v39 }
 0x1eb   : > { %1129 = vpow2.f32 %v915_v41  ;;  %558 = vrot.lane.b32.xlu1 %v1118_v43, %s1231_s16 }
 0x1ed   : > { %v1120_v44 = vpop.eup %1119 }
 0x1ee   : > { %v1122_v45 = vpop.eup %1121  ;;  %v524_v46 = vadd.f32 1.0, %v1120_v44 }
 0x1ef   : > { %v1124_v47 = vpop.eup %1123  ;;  %560 = vrot.lane.b32.xlu1 %v1122_v45, %s1231_s16 }
 0x1f0   : > { %1131 = vrcp.f32 %v524_v46  ;;  %v525_v48 = vadd.f32 1.0, %v1124_v47 }
 0x1f2   : > { %v1126_v49 = vpop.eup %1125  ;;  %1133 = vrcp.f32 %v525_v48 }
 0x1f3   : > { %562 = vrot.lane.b32.xlu0 %v1126_v49, %s1231_s16 }
 0x1f4   : > { %v1128_v50 = vpop.eup %1127 }
 0x1f5   : > { %v1130_v51 = vpop.eup %1129  ;;  %564 = vrot.lane.b32.xlu1 %v1128_v50, %s1231_s16 }
 0x1f6   : > { %v526_v52 = vadd.f32 1.0, %v1130_v51 }
 0x1f8   : > { %1135 = vrcp.f32 %v526_v52 }
 0x1fa   : > { %v1132_v53 = vpop.eup %1131 }
 0x1fb   : > { %566 = vrot.lane.b32.xlu0 %v1132_v53, %s1231_s16 }
 0x1fc   : > { %v1134_v54 = vpop.eup %1133 }
 0x1fd   : > { %568 = vrot.lane.b32.xlu1 %v1134_v54, %s1231_s16 }
 0x202   : > { %v1136_v55 = vpop.eup %1135 }
 0x203   : > { %570 = vrot.lane.b32.xlu0 %v1136_v55, %s1231_s16 }
 0x255   : > { %v555_v57 = vpop.permute.xlu0 %554 }
 0x256   : > { %v581_v58 = vmul.f32 %v555_v57, %v1345_v56 }
 0x258   : > { %v937_v59 = vpack.c.bf16 %v581_v58, %v581_v58 }
 0x259   : > { %v557_v61 = vpop.permute.xlu0 %556 }
 0x25a   : > { %628 = vst.msk [vmem:[%s1383_s23] sm:$0xf] %vm627_vm3, %v937_v59  ;;  %v582_v62 = vmul.f32 %v557_v61, %v1348_v60 }
 0x25c   : > { %v938_v63 = vpack.c.bf16 %v582_v62, %v582_v62 }
 0x25d   : > { %v559_v1 = vpop.permute.xlu1 %558 }
 0x25e   : > { %629 = vst.msk [vmem:[%s1383_s23 + $0x4] sm:$0xf] %vm627_vm3, %v938_v63  ;;  %v583_v56 = vmul.f32 %v559_v1, %v1351_v0 }
 0x260   : > { %v939_v2 = vpack.c.bf16 %v583_v56, %v583_v56 }
 0x261   : > { %v561_v3 = vpop.permute.xlu1 %560 }
 0x262   : > { %630 = vst.msk [vmem:[%s1383_s23 + $0x8] sm:$0xf] %vm627_vm3, %v939_v2  ;;  %v584_v5 = vmul.f32 %v561_v3, %v1354_v4 }
 0x264   : > { %v940_v6 = vpack.c.bf16 %v584_v5, %v584_v5 }
 0x265   : > { %v563_v7 = vpop.permute.xlu0 %562 }
 0x266   : > { %631 = vst.msk [vmem:[%s1383_s23 + $0xc] sm:$0xf] %vm627_vm3, %v940_v6  ;;  %v585_v60 = vmul.f32 %v563_v7, %v1357_v11 }
 0x267   : > { %v565_v8 = vpop.permute.xlu1 %564 }
 0x268   : > { %v941_v9 = vpack.c.bf16 %v585_v60, %v585_v60  ;;  %v586_v10 = vmul.f32 %v565_v8, %v1360_v16 }
 0x26a   : > { %632 = vst.msk [vmem:[%s1383_s23 + $0x10] sm:$0xf] %vm627_vm3, %v941_v9  ;;  %v942_v0 = vpack.c.bf16 %v586_v10, %v586_v10 }
 0x26c   : > { %633 = vst.msk [vmem:[%s1383_s23 + $0x14] sm:$0xf] %vm627_vm3, %v942_v0 }
 0x26d   : > { %v567_v12 = vpop.permute.xlu0 %566 }
 0x26e   : > { %v587_v4 = vmul.f32 %v567_v12, %v1363_v23 }
 0x26f   : > { %v569_v13 = vpop.permute.xlu1 %568 }
 0x270   : > { %v943_v14 = vpack.c.bf16 %v587_v4, %v587_v4  ;;  %v588_v15 = vmul.f32 %v569_v13, %v1366_v28 }
 0x272   : > { %634 = vst.msk [vmem:[%s1383_s23 + $0x18] sm:$0xf] %vm627_vm3, %v943_v14  ;;  %v944_v11 = vpack.c.bf16 %v588_v15, %v588_v15 }
 0x274   : > { %635 = vst.msk [vmem:[%s1383_s23 + $0x1c] sm:$0xf] %vm627_vm3, %v944_v11  ;;  %643 = sbr.rel (!%p1287_p4) target bundleno = 702 (0x2be), region = 44 }
 0x275   : > { %v571_v17 = vpop.permute.xlu0 %570 }
 0x276   : > { %v589_v16 = vmul.f32 %v571_v17, %v1370_v37 }
 0x278   : > { %v945_v18 = vpack.c.bf16 %v589_v16, %v589_v16 }
 0x27a   : > { %636 = vst.msk [vmem:[%s1383_s23 + $0x20] sm:$0xf] %vm627_vm3, %v945_v18 }
 0x27b   : > { %s1484_s18 = smov (!%p646_p8, %s645_s18), 9 }
 0x27c   : > { %s925_s6 = sshll.u32 %s1484_s18, 6 }
 0x27d   : > { %p928_p9 = scmp.eq.s32.totalorder %s925_s6, 0 }
 0x27e   : > { %1137 = sdivrem.u32 (!%p928_p9), %s1484_s18, 9 }
 0x27f   : > { %654 = sbr.rel (%p928_p9) target bundleno = 702 (0x2be), region = 48 }
 0x287   : > { %s1424_s26 = spop.drf %1137 }
 0x288   : > { %p929_p10 = scmp.le.s32.totalorder %s1424_s26, 0 }
 0x289   : > { %s1477_s21 = smov (!%p929_p10), %s1418_s30  ;;  %s1478_s29 = smov (!%p929_p10), %s1383_s23 }
 0x28a   : > { %841 = sbr.rel (%p929_p10) target bundleno = 673 (0x2a1), region = 120  ;;  %s1433_s7 = smov (!%p929_p10), 0  }
 0x28b   : > { %s1435_s8 = smov (!%p929_p10), 0  }
 0x291 LB: >> { %v671_v19 = vld [vmem:[%s1203_s29] sm:$0xf]  ;;  %v673_v20 = vld [vmem:[%s1203_s29 + $0x4] sm:$0xf]  ;;  %v675_v21 = vld [vmem:[%s1203_s29 + $0x8] sm:$0xf]  ;;  %s1211_s8 = sphi %s1435_s8, %s665_s8   ;;  %s1207_s7 = sphi %s1433_s7, %s1479_s7   ;;  %s1203_s29 = sphi %s1478_s29, %s694_s29   ;;  %s1199_s21 = sphi %s1477_s21, %s695_s21  }
 0x292   : >> { %672 = vst [vmem:[%s1199_s21] sm:$0xf] %v671_v19  ;;  %674 = vst [vmem:[%s1199_s21 + $0x4] sm:$0xf] %v673_v20  ;;  %v677_v22 = vld [vmem:[%s1203_s29 + $0xc] sm:$0xf]  ;;  %s689_s9 = sadd.s32 1, %s1207_s7 }
 0x293   : >> { %676 = vst [vmem:[%s1199_s21 + $0x8] sm:$0xf] %v675_v21  ;;  %v679_v23 = vld [vmem:[%s1203_s29 + $0x10] sm:$0xf]  ;;  %v681_v24 = vld [vmem:[%s1203_s29 + $0x14] sm:$0xf]  ;;  %p690_p11 = scmp.ge.s32.totalorder %s689_s9, %s1424_s26 }
 0x294   : >> { %678 = vst [vmem:[%s1199_s21 + $0xc] sm:$0xf] %v677_v22  ;;  %680 = vst [vmem:[%s1199_s21 + $0x10] sm:$0xf] %v679_v23  ;;  %v683_v25 = vld [vmem:[%s1203_s29 + $0x18] sm:$0xf] }
 0x295   : >> { %682 = vst [vmem:[%s1199_s21 + $0x14] sm:$0xf] %v681_v24  ;;  %v685_v26 = vld [vmem:[%s1203_s29 + $0x1c] sm:$0xf]  ;;  %v687_v27 = vld [vmem:[%s1203_s29 + $0x20] sm:$0xf] }
 0x296   : >> { %684 = vst [vmem:[%s1199_s21 + $0x18] sm:$0xf] %v683_v25  ;;  %686 = vst [vmem:[%s1199_s21 + $0x1c] sm:$0xf] %v685_v26  ;;  %s1486_s9 = smov (%p690_p11, %s689_s9), 0  ;;  %s665_s8 = sadd.s32 1, %s1211_s8  }
 0x297   : >> { %688 = vst [vmem:[%s1199_s21 + $0x20] sm:$0xf] %v687_v27  ;;  %s692_s10 = smul.u32 36, %s1486_s9  ;;  %p664_p12 = scmp.ge.s32.totalorder %s665_s8, %s1424_s26 }
 0x298   : >> { %s1479_s7 = smov %s1486_s9 }
 0x299   : >> { %s694_s29 = scalar_lea.vmem %s1383_s23, %s692_s10 [#allocation2]   ;;  %s695_s21 = scalar_lea.vmem %s1418_s30, %s692_s10  }
 0x29a   : > { %667 = sbr.rel (!%p664_p12) target bundleno = 657 (0x291), region = 126 }
 0x2a1 PF: > { %1139 = sdivrem.u32 %s1484_s18, 9 }
 0x2a2   : > { %s930_s11 = smul.u32 36, %s1424_s26 }
 0x2a4   : > { %s700_s12 = scalar_lea.vmem %s1383_s23, %s930_s11 [#allocation2]   ;;  %s702_s13 = scalar_lea.vmem %s1418_s30, %s930_s11  }
 0x2aa   : > { %s1140_s14 = spop.drf %1139 }
 0x2ab   : > { %p932_p13 = scmp.le.s32.totalorder %s1140_s14, 0 }
 0x2ac   : > { %s1213_s15 = smov (!%p932_p13), %s702_s13   ;;  %s1217_s16 = smov (!%p932_p13), %s700_s12  }
 0x2ad   : > { %855 = sbr.rel (%p932_p13) target bundleno = 702 (0x2be), region = 131  ;;  %s1221_s17 = smov (!%p932_p13), 0  }
 0x2ae   : > { %s1225_s20 = smov (!%p932_p13), 0  }
 0x2b4 LB: >> { %v712_v28 = vld [vmem:[%s1219_s16] sm:$0xf]  ;;  %s714_s24 = sadd.s32 1, %s1223_s17  ;;  %s706_s20 = sadd.s32 1, %s1227_s20   ;;  %s1227_s20 = sphi %s1225_s20, %s706_s20   ;;  %s1223_s17 = sphi %s1221_s17, %s1222_s17   ;;  %s1219_s16 = sphi %s1217_s16, %s719_s16   ;;  %s1215_s15 = sphi %s1213_s15, %s720_s15  }
 0x2b5   : >> { %713 = vst [vmem:[%s1215_s15] sm:$0xf] %v712_v28  ;;  %p715_p0 = scmp.ge.s32.totalorder %s714_s24, %s1140_s14  ;;  %p705_p1 = scmp.ge.s32.totalorder %s706_s20, %s1140_s14 }
 0x2b7   : >> { %s1488_s24 = smov (%p715_p0, %s714_s24), 0  ;;  %708 = sbr.rel (!%p705_p1) target bundleno = 692 (0x2b4), region = 137 }
 0x2b8   : >> { %s933_s23 = sshll.u32 %s1488_s24, 2  ;;  %s1222_s17 = smov %s1488_s24  }
 0x2b9   : >> { %s719_s16 = scalar_lea.vmem %s700_s12, %s933_s23 [#allocation2]   ;;  %s720_s15 = scalar_lea.vmem %s702_s13, %s933_s23  }
 0x2be PF: > { %p12_p2 = scmp.ge.s32.totalorder %s1277_s22, 4   ;;  %s1480_s18 = smov %s1191_s19 }
 0x2bf   : > { %s1481_s19 = smov %s1285_s25  ;;  %s1482_s20 = smov %s1277_s22 }
 0x2c0   :  { %14 = sbr.rel (!%p12_p2) target bundleno = 2 (0x2), region = 148 }

// kernel: demucs_forward.19
= control target key start
LH: loop header
LB: loop body
LE: loop exit
PB: predicated region body
PF: predicated region fallthrough
CT: control target
= control target key end

     0   :  { %s590_s18 = smov 0   ;;  %s635_s0 = inlined_call_operand.vmem [shape: bf16[32,64], index: 0, kind: input, shape index: {}]   ;;  %s636_s1 = inlined_call_operand.vmem [shape: bf16[64,16], index: 1, kind: input, shape index: {}]   ;;  %s637_s2 = inlined_call_operand.vmem [shape: f32[1,16], index: 2, kind: input, shape index: {}]   ;;  %s638_s3 = inlined_call_operand.vmem [shape: bf16[16,32], index: 3, kind: input, shape index: {}]   ;;  %s639_s4 = inlined_call_operand.vmem [shape: f32[1,32], index: 4, kind: input, shape index: {}]   ;;  %s640_s5 = inlined_call_operand.vmem [shape: bf16[32,16], index: 5, kind: output, shape index: {}]  }
   0x1 LB: > { %s472_s19 = sadd.s32 4294967295, %s555_s18   ;;  %p476_p0 = scmp.ge.s32.totalorder %s555_s18, 1  ;;  %s555_s18 = sphi %s590_s18, %s15_s18  }
   0x2   : > { %p188_p1 = scmp.lt.s32.totalorder %s555_s18, 3 }
   0x4   : > { %p189_p2 = pnand %p476_p0, %p188_p1 }
   0x5   : > { %v535_v0 = vld [vmem:[%s636_s1] sm:$0xff] (!%p189_p2)   ;;  %v557_v1 = vmov (!%p189_p2), 0.0   ;;  %v536_v2 = vld [vmem:[%s636_s1 + $0x8] sm:$0xff] (!%p189_p2)   ;;  %vm558_vm0 = vmmov (!%p189_p2), 0   ;;  %s477_s24 = sshll.u32 (!%p189_p2), %s472_s19, 1  ;;  %v537_v3 = vld [vmem:[%s636_s1 + $0x10] sm:$0xff] (!%p189_p2)  }
   0x6   : > { %192 = sbr.rel (%p189_p2) target bundleno = 606 (0x25e), region = 40  ;;  %506 = vmatprep.subr.bf16.mxu0 (!%p189_p2), %v557_v1  ;;  %518 = vmatprep.subr.bf16.mxu1 (!%p189_p2), %v557_v1  ;;  %p217_p3 = scmp.lt.s32.totalorder (!%p189_p2), %s477_s24, 3  ;;  %v538_v4 = vld [vmem:[%s636_s1 + $0x18] sm:$0xff] (!%p189_p2)   ;;  %vm275_vm1 = vcmask (!%p189_p2), 523264   ;;  %v540_v6 = vld [vmem:[%s638_s3] sm:$0xff] (!%p189_p2)   ;;  %vm338_vm2 = vcmask (!%p189_p2), 130048  }
   0x7   : > { %507 = vmatpush3.bf16.msra.mxu0 (!%p189_p2), %v535_v0  ;;  %514 = vmatprep.mubr.msk.bf16.mxu0 (!%p189_p2), %vm558_vm0, %v557_v1  ;;  %v481_v7 = vld [vmem:[%s637_s2] ss:$0 sm:$0xff] (!%p189_p2)  ;;  %s559_s14 = smov (!%p189_p2), 112   ;;  %vm413_vm3 = vcmask (!%p189_p2), 125952  }
   0x8   : > { %508 = vmatprep.subr.bf16.mxu0 (!%p189_p2), %v557_v1  ;;  %520 = vmatprep.mubr.msk.bf16.mxu1 (!%p189_p2), %vm558_vm0, %v557_v1  ;;  %v488_v17 = vld [vmem:[%s639_s4] ss:$0 sm:$0xff] (!%p189_p2) }
   0x9   : > { %519 = vmatpush3.bf16.msra.mxu1 (!%p189_p2), %v540_v6 }
   0xb   : > { %509 = vmatpush3.bf16.msra.mxu0 (!%p189_p2), %v536_v2 }
   0xc   : > { %510 = vmatprep.subr.bf16.mxu0 (!%p189_p2), %v557_v1 }
   0xd   : > { %s642_s24 = smov (!%p217_p3, %s477_s24), 3 }
   0xe   : > { %s478_s27 = sshll.u32 %s642_s24, 2 }
   0xf   : > { %s220_s30 = scalar_lea.vmem %s635_s0, %s478_s27  ;;  %511 = vmatpush3.bf16.msra.mxu0 %v537_v3  ;;  %s226_s17 = scalar_lea.vmem %s640_s5, %s478_s27 }
  0x10   : > { %512 = vmatprep.subr.bf16.mxu0 %v557_v1  ;;  %v539_v5 = vld [vmem:[%s220_s30] sm:$0xff]  }
  0x13   : > { %513 = vmatpush3.bf16.msra.mxu0 %v538_v4 }
  0x16   : > { %515 = vmatmul.mubr.msk.bf16.vlgmr.msra.gmra.mrb[0].mxu0 %vm275_vm1, %v539_v5 }
  0xe9   : > { %v313_v8 = vpop.f32.mrb[0].mxu0 }
  0xea   : > { %v314_v9 = vadd.f32 %v481_v7, %v313_v8  ;;  %v516_v10 = vpop.f32.mrb[1].mxu0 }
  0xeb   : > { %v316_v11 = vpop.f32.mrb[2].mxu0 }
  0xec   : > { %v317_v12 = vadd.f32 %v481_v7, %v316_v11  ;;  %v517_v13 = vpop.f32.mrb[3].mxu0  ;;  %v320_v14 = vmax.f32 %v314_v9, 0.0 }
  0xee   : > { %v321_v15 = vmax.f32 %v317_v12, 0.0 }
  0xf0   : > { %v322_v16 = vpack.c.bf16 %v321_v15, %v320_v14 }
  0xf2   : > { %521 = vmatmul.mubr.msk.bf16.vlgmr.msra.gmra.mrb[0].mxu1 %vm338_vm2, %v322_v16 }
 0x1c5   : > { %v376_v18 = vpop.f32.mrb[0].mxu1 }
 0x1c6   : > { %v377_v19 = vadd.f32 %v488_v17, %v376_v18  ;;  %v522_v20 = vpop.f32.mrb[1].mxu1 }
 0x1c7   : > { %v379_v21 = vpop.f32.mrb[2].mxu1 }
 0x1c8   : > { %v491_v22 = vmul.f32 -1.442695, %v377_v19  ;;  %v380_v23 = vadd.f32 %v488_v17, %v379_v21  ;;  %v523_v24 = vpop.f32.mrb[3].mxu1 }
 0x1ca   : > { %541 = vpow2.f32 %v491_v22  ;;  %v492_v25 = vmul.f32 -1.442695, %v380_v23 }
 0x1cc   : > { %543 = vpow2.f32 %v492_v25 }
 0x1d4   : > { %v542_v26 = vpop.eup %541 }
 0x1d5   : > { %v389_v27 = vadd.f32 1.0, %v542_v26 }
 0x1d6   : > { %v544_v28 = vpop.eup %543 }
 0x1d7   : > { %545 = vrcp.f32 %v389_v27  ;;  %v390_v29 = vadd.f32 1.0, %v544_v28 }
 0x1d9   : > { %547 = vrcp.f32 %v390_v29 }
 0x1e1   : > { %v546_v30 = vpop.eup %545 }
 0x1e2   : > { %397 = vrot.lane.b32.xlu0 %v546_v30, %s559_s14 }
 0x1e3   : > { %v548_v31 = vpop.eup %547 }
 0x1e6   : > { %399 = vrot.lane.b32.xlu0 %v548_v31, %s559_s14 }
 0x254   : > { %v398_v32 = vpop.permute.xlu0 %397 }
 0x255   : > { %v403_v33 = vmul.f32 %v398_v32, %v377_v19 }
 0x257   : > { %v497_v34 = vpack.c.bf16 %v403_v33, %v403_v33 }
 0x258   : > { %v400_v35 = vpop.permute.xlu0 %399 }
 0x259   : > { %414 = vst.msk [vmem:[%s226_s17] sm:$0xf] %vm413_vm3, %v497_v34  ;;  %v404_v36 = vmul.f32 %v400_v35, %v380_v23 }
 0x25b   : > { %v498_v37 = vpack.c.bf16 %v404_v36, %v404_v36 }
 0x25d   : > { %415 = vst.msk [vmem:[%s226_s17 + $0x4] sm:$0xf] %vm413_vm3, %v498_v37 }
 0x25e PF: > { %s15_s18 = sadd.s32 1, %s555_s18  }
 0x25f   : > { %p12_p4 = scmp.ge.s32.totalorder %s15_s18, 4  }
 0x261   :  { %14 = sbr.rel (!%p12_p4) target bundleno = 1 (0x1), region = 70 }

// kernel: demucs_forward.20
= control target key start
LH: loop header
LB: loop body
LE: loop exit
PB: predicated region body
PF: predicated region fallthrough
CT: control target
= control target key end

     0   :  { %v291_v0 = vmov 0.0   ;;  %vm292_vm0 = vmmov 0   ;;  %vm158_vm1 = vcmask 261120   ;;  %vm214_vm2 = vcmask 256000   ;;  %s366_s1 = inlined_call_operand.vmem [shape: bf16[128,32], index: 1, kind: input, shape index: {}]   ;;  %s367_s0 = inlined_call_operand.vmem [shape: bf16[6,128], index: 0, kind: input, shape index: {}]   ;;  %s368_s3 = inlined_call_operand.vmem [shape: bf16[32,64], index: 3, kind: input, shape index: {}]   ;;  %s369_s2 = inlined_call_operand.vmem [shape: f32[1,32], index: 2, kind: input, shape index: {}]   ;;  %s370_s4 = inlined_call_operand.vmem [shape: f32[1,64], index: 4, kind: input, shape index: {}]   ;;  %s371_s5 = inlined_call_operand.vmem [shape: bf16[6,32], index: 5, kind: output, shape index: {}]  }
   0x1   :  { %246 = vmatprep.subr.bf16.mxu0 %v291_v0  ;;  %v277_v1 = vld [vmem:[%s366_s1] sm:$0xff]   ;;  %262 = vmatprep.mubr.msk.bf16.mxu0 %vm292_vm0, %v291_v0  ;;  %v278_v2 = vld [vmem:[%s366_s1 + $0x8] sm:$0xff]   ;;  %v279_v3 = vld [vmem:[%s366_s1 + $0x10] sm:$0xff]  }
   0x2   :  { %266 = vmatprep.subr.bf16.mxu1 %v291_v0  ;;  %270 = vmatprep.mubr.msk.bf16.mxu1 %vm292_vm0, %v291_v0  ;;  %v280_v4 = vld [vmem:[%s366_s1 + $0x18] sm:$0xff]   ;;  %v281_v5 = vld [vmem:[%s366_s1 + $0x20] sm:$0xff]   ;;  %v282_v6 = vld [vmem:[%s366_s1 + $0x28] sm:$0xff]  }
   0x3   :  { %247 = vmatpush3.bf16.msra.mxu0 %v277_v1  ;;  %v283_v7 = vld [vmem:[%s366_s1 + $0x30] sm:$0xff]   ;;  %v284_v8 = vld [vmem:[%s366_s1 + $0x38] sm:$0xff]   ;;  %v21_v9 = vld [vmem:[%s367_s0] sm:$0x7] }
   0x4   :  { %248 = vmatprep.subr.bf16.mxu0 %v291_v0  ;;  %v285_v10 = vld [vmem:[%s368_s3] sm:$0xff]   ;;  %v286_v11 = vld [vmem:[%s368_s3 + $0x8] sm:$0xff]  }
   0x5   :  { %267 = vmatpush3.bf16.msra.mxu1 %v285_v10  ;;  %v220_v12 = vld [vmem:[%s369_s2] ss:$0 sm:$0xff]  ;;  %s293_s2 = smov 96  }
   0x6   :  { %268 = vmatprep.subr.bf16.mxu1 %v291_v0  ;;  %v229_v20 = vld [vmem:[%s370_s4] ss:$0 sm:$0xff] }
   0x7   :  { %249 = vmatpush3.bf16.msra.mxu0 %v278_v2 }
   0x8   :  { %250 = vmatprep.subr.bf16.mxu0 %v291_v0 }
   0x9   :  { %269 = vmatpush3.bf16.msra.mxu1 %v286_v11 }
   0xb   :  { %251 = vmatpush3.bf16.msra.mxu0 %v279_v3 }
   0xc   :  { %252 = vmatprep.subr.bf16.mxu0 %v291_v0 }
   0xf   :  { %253 = vmatpush3.bf16.msra.mxu0 %v280_v4 }
  0x10   :  { %254 = vmatprep.subr.bf16.mxu0 %v291_v0 }
  0x13   :  { %255 = vmatpush3.bf16.msra.mxu0 %v281_v5 }
  0x14   :  { %256 = vmatprep.subr.bf16.mxu0 %v291_v0 }
  0x17   :  { %257 = vmatpush3.bf16.msra.mxu0 %v282_v6 }
  0x18   :  { %258 = vmatprep.subr.bf16.mxu0 %v291_v0 }
  0x1b   :  { %259 = vmatpush3.bf16.msra.mxu0 %v283_v7 }
  0x1c   :  { %260 = vmatprep.subr.bf16.mxu0 %v291_v0 }
  0x1f   :  { %261 = vmatpush3.bf16.msra.mxu0 %v284_v8 }
  0x22   :  { %263 = vmatmul.mubr.bf16.vlgmr.msra.gmra.mrb[0].mxu0 %v21_v9 }
  0xf5   :  { %v127_v13 = vpop.f32.mrb[0].mxu0 }
  0xf6   :  { %v128_v14 = vadd.f32 %v220_v12, %v127_v13  ;;  %v264_v15 = vpop.f32.mrb[1].mxu0 }
  0xf7   :  { %v130_v16 = vpop.f32.mrb[2].mxu0 }
  0xf8   :  { %v133_v17 = vmax.f32 %v128_v14, 0.0  ;;  %v265_v18 = vpop.f32.mrb[3].mxu0 }
  0xfa   :  { %v134_v19 = vpack.c.bf16 %v133_v17, %v133_v17 }
  0xfc   :  { %271 = vmatmul.mubr.msk.bf16.vlgmr.msra.gmra.mrb[0].mxu1 %vm158_vm1, %v134_v19 }
 0x1cf   :  { %v196_v21 = vpop.f32.mrb[0].mxu1 }
 0x1d0   :  { %v197_v22 = vadd.f32 %v229_v20, %v196_v21  ;;  %v272_v23 = vpop.f32.mrb[1].mxu1 }
 0x1d1   :  { %v199_v24 = vpop.f32.mrb[2].mxu1 }
 0x1d2   :  { %v233_v25 = vmul.f32 -1.442695, %v197_v22  ;;  %v273_v26 = vpop.f32.mrb[3].mxu1 }
 0x1d4   :  { %287 = vpow2.f32 %v233_v25 }
 0x1de   :  { %v288_v27 = vpop.eup %287 }
 0x1df   :  { %v205_v28 = vadd.f32 1.0, %v288_v27 }
 0x1e1   :  { %289 = vrcp.f32 %v205_v28 }
 0x1eb   :  { %v290_v29 = vpop.eup %289 }
 0x1ec   :  { %209 = vrot.lane.b32.xlu0 %v290_v29, %s293_s2 }
 0x25e   :  { %v210_v30 = vpop.permute.xlu0 %209 }
 0x25f   :  { %v212_v31 = vmul.f32 %v210_v30, %v197_v22 }
 0x261   :  { %v213_v32 = vpack.c.bf16 %v212_v31, %v212_v31 }
 0x263   :  { %215 = vst.msk [vmem:[%s371_s5] sm:$0x7] %vm214_vm2, %v213_v32 }

// kernel: demucs_forward.21
= control target key start
LH: loop header
LB: loop body
LE: loop exit
PB: predicated region body
PF: predicated region fallthrough
CT: control target
= control target key end

     0   :  { %v107_v0 = vmov 0.0   ;;  %vm108_vm0 = vmmov 0   ;;  %vm39_vm1 = vcmask 261120   ;;  %s144_s1 = inlined_call_operand.vmem [shape: bf16[32,128], index: 1, kind: input, shape index: {}]   ;;  %s145_s0 = inlined_call_operand.vmem [shape: bf16[6,32], index: 0, kind: input, shape index: {}]   ;;  %s146_s2 = inlined_call_operand.vmem [shape: f32[1,128], index: 2, kind: input, shape index: {}]   ;;  %s147_s3 = inlined_call_operand.vmem [shape: f32[6,128], index: 3, kind: output, shape index: {}]  }
   0x1   :  { %95 = vmatprep.subr.bf16.mxu0 %v107_v0  ;;  %v105_v1 = vld [vmem:[%s144_s1] sm:$0xff]   ;;  %99 = vmatprep.mubr.msk.bf16.mxu0 %vm108_vm0, %v107_v0  ;;  %v106_v2 = vld [vmem:[%s144_s1 + $0x8] sm:$0xff]  }
   0x2   :  { %96 = vmatpush3.bf16.msra.mxu0 %v105_v1  ;;  %v15_v3 = vld [vmem:[%s145_s0] sm:$0x7] }
   0x3   :  { %97 = vmatprep.subr.bf16.mxu0 %v107_v0  ;;  %v88_v4 = vld [vmem:[%s146_s2] ss:$0 sm:$0xff] }
   0x6   :  { %98 = vmatpush3.bf16.msra.mxu0 %v106_v2 }
   0x9   :  { %100 = vmatmul.mubr.msk.bf16.vlgmr.msra.gmra.mrb[0].mxu0 %vm39_vm1, %v15_v3 }
  0xdc   :  { %v77_v5 = vpop.f32.mrb[0].mxu0 }
  0xdd   :  { %v78_v6 = vadd.f32 %v88_v4, %v77_v5  ;;  %v101_v7 = vpop.f32.mrb[1].mxu0 }
  0xde   :  { %v80_v8 = vpop.f32.mrb[2].mxu0 }
  0xdf   :  { %83 = vst [vmem:[%s147_s3] sm:$0x3f] %v78_v6  ;;  %v102_v9 = vpop.f32.mrb[3].mxu0 }

// kernel: demucs_forward.22
= control target key start
LH: loop header
LB: loop body
LE: loop exit
PB: predicated region body
PF: predicated region fallthrough
CT: control target
= control target key end

     0   :  { %vm16_vm0 = vcmask 254976   ;;  %v554_v0 = vmov 0.0   ;;  %vm555_vm1 = vmmov 0   ;;  %vm38_vm2 = vcmask 261120   ;;  %s556_s15 = smov 64   ;;  %s557_s16 = smov 32   ;;  %s682_s1 = inlined_call_operand.vmem [shape: bf16[32,128], index: 1, kind: input, shape index: {}]   ;;  %s683_s0 = inlined_call_operand.vmem [shape: f32[4,2,128], index: 0, kind: input, shape index: {}]   ;;  %s684_s2 = inlined_call_operand.vmem [shape: f32[4,2,32], index: 2, kind: output, shape index: {}]  }
   0x1   :  { %477 = vmatprep.subr.bf16.mxu0 %v554_v0  ;;  %v514_v1 = vld [vmem:[%s682_s1] sm:$0xff]   ;;  %481 = vmatprep.mubr.msk.bf16.mxu0 %vm555_vm1, %v554_v0  ;;  %17 = vst.msk [vmem:[#allocation2] sm:$0x3] %vm16_vm0, %v554_v0  ;;  %18 = vst.msk [vmem:[#allocation3] sm:$0x3] %vm16_vm0, %v554_v0  ;;  %v515_v2 = vld [vmem:[%s682_s1 + $0x8] sm:$0xff]  }
   0x2   :  { %485 = vmatprep.subr.bf16.mxu1 %v554_v0  ;;  %489 = vmatprep.mubr.msk.bf16.mxu1 %vm555_vm1, %v554_v0  ;;  %v19_v5 = vld [vmem:[%s683_s0] sm:$0x3]  ;;  %s558_s17 = smov 96   ;;  %v517_v25 = vld [vmem:[%s682_s1 + $0x8] sm:$0xff]   ;;  %v447_v33 = vld [vmem:[%s683_s0 + $0x2] sm:$0x3] }
   0x3   :  { %478 = vmatpush3.bf16.msra.mxu0 %v514_v1  ;;  %v516_v24 = vld [vmem:[%s682_s1] sm:$0xff]   ;;  %v519_v52 = vld [vmem:[%s682_s1 + $0x8] sm:$0xff]  }
   0x4   :  { %479 = vmatprep.subr.bf16.mxu0 %v554_v0  ;;  %486 = vmatpush3.bf16.msra.mxu1 %v516_v24  ;;  %v518_v51 = vld [vmem:[%s682_s1] sm:$0xff]  }
   0x5   :  { %487 = vmatprep.subr.bf16.mxu1 %v554_v0  ;;  %v453_v60 = vld [vmem:[%s683_s0 + $0x4] sm:$0x3] }
   0x7   :  { %480 = vmatpush3.bf16.msra.mxu0 %v515_v2 }
   0x8   :  { %v20_v3 = vld [vmem:[#allocation2] sm:$0x3]  ;;  %493 = vmatprep.subr.bf16.mxu0 %v554_v0  ;;  %v90_v12 = vld [vmem:[#allocation3] sm:$0x3]  ;;  %488 = vmatpush3.bf16.msra.mxu1 %v517_v25 }
   0x9   :  { %v21_v4 = vpack.c.bf16 %v20_v3, %v20_v3  ;;  %501 = vmatprep.subr.bf16.mxu1 %v554_v0 }
   0xb   :  { %482 = vmatmul.mubr.msk.bf16.vlgmr.msra.gmra.mrb[0].mxu0 %vm38_vm2, %v21_v4 }
   0xc   :  { %497 = vmatprep.mubr.msk.bf16.mxu0 %vm555_vm1, %v554_v0  ;;  %494 = vmatpush3.bf16.msra.mxu0 %v518_v51 }
   0xd   :  { %495 = vmatprep.subr.bf16.mxu0 %v554_v0 }
  0x10   :  { %496 = vmatpush3.bf16.msra.mxu0 %v519_v52 }
  0xde   :  { %v76_v6 = vpop.f32.mrb[0].mxu0 }
  0xdf   :  { %v82_v7 = vadd.f32 %v76_v6, %v19_v5  ;;  %v483_v8 = vpop.f32.mrb[1].mxu0 }
  0xe0   :  { %v79_v9 = vpop.f32.mrb[2].mxu0 }
  0xe1   :  { %522 = vtanh.f32 %v82_v7  ;;  %v484_v10 = vpop.f32.mrb[3].mxu0  ;;  %v446_v13 = vmul.f32 -1.442695, %v82_v7 }
  0xe3   :  { %524 = vpow2.f32 %v446_v13 }
  0xeb   :  { %v523_v11 = vpop.eup %522 }
  0xec   :  { %97 = vrot.lane.b32.xlu0 %v523_v11, %s556_s15 }
  0xed   :  { %v525_v14 = vpop.eup %524 }
  0xee   :  { %v86_v15 = vadd.f32 1.0, %v525_v14 }
  0xf0   :  { %92 = vrot.lane.b32.xlu0 %v90_v12, %s557_s16  ;;  %526 = vrcp.f32 %v86_v15  ;;  %v520_v15 = vld [vmem:[%s682_s1] sm:$0xff]  }
  0xfa   :  { %v527_v16 = vpop.eup %526 }
 0x15e   :  { %v98_v17 = vpop.permute.xlu0 %97 }
 0x15f   :  { %v100_v18 = vmul.f32 %v527_v16, %v98_v17 }
 0x161   :  { %102 = vrot.lane.b32.xlu1 %v100_v18, %s557_s16 }
 0x162   :  { %v93_v19 = vpop.permute.xlu0 %92 }
 0x163   :  { %v95_v20 = vmul.f32 %v527_v16, %v93_v19 }
 0x1d3   :  { %v103_v21 = vpop.permute.xlu1 %102 }
 0x1d4   :  { %v105_v22 = vadd.f32 %v103_v21, %v95_v20 }
 0x1d6   :  { %528 = vtanh.f32 %v105_v22 }
 0x1e0   :  { %v529_v23 = vpop.eup %528 }
 0x1e1   :  { %108 = vrot.lane.b32.xlu1 %v529_v23, %s556_s15  ;;  %v459_v23 = vld [vmem:[%s683_s0 + $0x6] sm:$0x3] }
 0x1e5   :  { %113 = vrot.lane.b32.xlu1 %v105_v22, %s558_s17 }
 0x253   :  { %v109_v26 = vpop.permute.xlu1 %108 }
 0x254   :  { %v111_v27 = vmul.f32 %v527_v16, %v109_v26  ;;  %v521_v16 = vld [vmem:[%s682_s1 + $0x8] sm:$0xff]  }
 0x256   :  { %119 = vrot.lane.b32.xlu0 %v111_v27, %s557_s16 }
 0x257   :  { %v114_v28 = vpop.permute.xlu1 %113 }
 0x258   :  { %117 = vst.msk [vmem:[#allocation3] sm:$0x3] %vm16_vm0, %v114_v28 }
 0x25f   :  { %v195_v29 = vld [vmem:[#allocation3] sm:$0x3] }
 0x260   :  { %197 = vrot.lane.b32.xlu1 %v195_v29, %s557_s16 }
 0x2c8   :  { %v120_v30 = vpop.permute.xlu0 %119 }
 0x2c9   :  { %122 = vst.msk [vmem:[#allocation2] sm:$0x3] %vm16_vm0, %v120_v30  ;;  %123 = vst.msk [vmem:[%s684_s2] sm:$0x3] %vm16_vm0, %v120_v30 }
 0x2d0   :  { %v126_v31 = vld [vmem:[#allocation2] sm:$0x3] }
 0x2d1   :  { %v127_v32 = vpack.c.bf16 %v126_v31, %v126_v31 }
 0x2d2   :  { %v198_v46 = vpop.permute.xlu1 %197 }
 0x2d3   :  { %490 = vmatmul.mubr.msk.bf16.vlgmr.msra.gmra.mrb[0].mxu1 %vm38_vm2, %v127_v32 }
 0x2d4   :  { %505 = vmatprep.mubr.msk.bf16.mxu1 %vm555_vm1, %v554_v0  ;;  %502 = vmatpush3.bf16.msra.mxu1 %v520_v15 }
 0x2d5   :  { %503 = vmatprep.subr.bf16.mxu1 %v554_v0 }
 0x2d8   :  { %504 = vmatpush3.bf16.msra.mxu1 %v521_v16 }
 0x3a6   :  { %v181_v34 = vpop.f32.mrb[0].mxu1 }
 0x3a7   :  { %v187_v35 = vadd.f32 %v447_v33, %v181_v34  ;;  %v491_v36 = vpop.f32.mrb[1].mxu1 }
 0x3a8   :  { %v184_v37 = vpop.f32.mrb[2].mxu1 }
 0x3a9   :  { %530 = vtanh.f32 %v187_v35  ;;  %v492_v38 = vpop.f32.mrb[3].mxu1  ;;  %v451_v40 = vmul.f32 -1.442695, %v187_v35 }
 0x3ab   :  { %532 = vpow2.f32 %v451_v40 }
 0x3b3   :  { %v531_v39 = vpop.eup %530 }
 0x3b4   :  { %202 = vrot.lane.b32.xlu0 %v531_v39, %s556_s15 }
 0x3b5   :  { %v533_v41 = vpop.eup %532 }
 0x3b6   :  { %v191_v42 = vadd.f32 1.0, %v533_v41 }
 0x3b8   :  { %534 = vrcp.f32 %v191_v42 }
 0x3c2   :  { %v535_v43 = vpop.eup %534 }
 0x3c3   :  { %v200_v47 = vmul.f32 %v535_v43, %v198_v46 }
 0x426   :  { %v203_v44 = vpop.permute.xlu0 %202 }
 0x427   :  { %v205_v45 = vmul.f32 %v535_v43, %v203_v44 }
 0x429   :  { %207 = vrot.lane.b32.xlu0 %v205_v45, %s557_s16 }
 0x49b   :  { %v208_v48 = vpop.permute.xlu0 %207 }
 0x49c   :  { %v210_v49 = vadd.f32 %v208_v48, %v200_v47 }
 0x49e   :  { %536 = vtanh.f32 %v210_v49 }
 0x4a8   :  { %v537_v50 = vpop.eup %536 }
 0x4a9   :  { %213 = vrot.lane.b32.xlu1 %v537_v50, %s556_s15 }
 0x4ad   :  { %218 = vrot.lane.b32.xlu1 %v210_v49, %s558_s17 }
 0x51b   :  { %v214_v53 = vpop.permute.xlu1 %213 }
 0x51c   :  { %v216_v54 = vmul.f32 %v535_v43, %v214_v53 }
 0x51e   :  { %223 = vrot.lane.b32.xlu0 %v216_v54, %s557_s16 }
 0x51f   :  { %v219_v55 = vpop.permute.xlu1 %218 }
 0x520   :  { %221 = vst.msk [vmem:[#allocation3] sm:$0x3] %vm16_vm0, %v219_v55 }
 0x527   :  { %v300_v56 = vld [vmem:[#allocation3] sm:$0x3] }
 0x528   :  { %302 = vrot.lane.b32.xlu1 %v300_v56, %s557_s16 }
 0x590   :  { %v224_v57 = vpop.permute.xlu0 %223 }
 0x591   :  { %226 = vst.msk [vmem:[#allocation2] sm:$0x3] %vm16_vm0, %v224_v57  ;;  %452 = vst.msk [vmem:[%s684_s2 + $0x2] sm:$0x3] %vm16_vm0, %v224_v57 }
 0x598   :  { %v231_v58 = vld [vmem:[#allocation2] sm:$0x3] }
 0x599   :  { %v232_v59 = vpack.c.bf16 %v231_v58, %v231_v58 }
 0x59a   :  { %v303_v10 = vpop.permute.xlu1 %302 }
 0x59b   :  { %498 = vmatmul.mubr.msk.bf16.vlgmr.msra.gmra.mrb[4].mxu0 %vm38_vm2, %v232_v59 }
 0x66e   :  { %v286_v61 = vpop.f32.mrb[4].mxu0 }
 0x66f   :  { %v292_v62 = vadd.f32 %v453_v60, %v286_v61  ;;  %v499_v63 = vpop.f32.mrb[5].mxu0 }
 0x670   :  { %v289_v1 = vpop.f32.mrb[6].mxu0 }
 0x671   :  { %538 = vtanh.f32 %v292_v62  ;;  %v500_v2 = vpop.f32.mrb[7].mxu0  ;;  %v457_v4 = vmul.f32 -1.442695, %v292_v62 }
 0x673   :  { %540 = vpow2.f32 %v457_v4 }
 0x67b   :  { %v539_v3 = vpop.eup %538 }
 0x67c   :  { %307 = vrot.lane.b32.xlu0 %v539_v3, %s556_s15 }
 0x67d   :  { %v541_v5 = vpop.eup %540 }
 0x67e   :  { %v296_v6 = vadd.f32 1.0, %v541_v5 }
 0x680   :  { %542 = vrcp.f32 %v296_v6 }
 0x68a   :  { %v543_v7 = vpop.eup %542 }
 0x68b   :  { %v305_v11 = vmul.f32 %v543_v7, %v303_v10 }
 0x6ee   :  { %v308_v8 = vpop.permute.xlu0 %307 }
 0x6ef   :  { %v310_v9 = vmul.f32 %v543_v7, %v308_v8 }
 0x6f1   :  { %312 = vrot.lane.b32.xlu0 %v310_v9, %s557_s16 }
 0x763   :  { %v313_v12 = vpop.permute.xlu0 %312 }
 0x764   :  { %v315_v13 = vadd.f32 %v313_v12, %v305_v11 }
 0x766   :  { %544 = vtanh.f32 %v315_v13 }
 0x770   :  { %v545_v14 = vpop.eup %544 }
 0x771   :  { %318 = vrot.lane.b32.xlu1 %v545_v14, %s556_s15 }
 0x775   :  { %323 = vrot.lane.b32.xlu1 %v315_v13, %s558_s17 }
 0x7e3   :  { %v319_v17 = vpop.permute.xlu1 %318 }
 0x7e4   :  { %v321_v18 = vmul.f32 %v543_v7, %v319_v17 }
 0x7e6   :  { %328 = vrot.lane.b32.xlu0 %v321_v18, %s557_s16 }
 0x7e7   :  { %v324_v19 = vpop.permute.xlu1 %323 }
 0x7e8   :  { %326 = vst.msk [vmem:[#allocation3] sm:$0x3] %vm16_vm0, %v324_v19 }
 0x7ef   :  { %v405_v20 = vld [vmem:[#allocation3] sm:$0x3] }
 0x7f0   :  { %407 = vrot.lane.b32.xlu1 %v405_v20, %s557_s16 }
 0x858   :  { %v329_v21 = vpop.permute.xlu0 %328 }
 0x859   :  { %331 = vst.msk [vmem:[#allocation2] sm:$0x3] %vm16_vm0, %v329_v21  ;;  %458 = vst.msk [vmem:[%s684_s2 + $0x4] sm:$0x3] %vm16_vm0, %v329_v21 }
 0x860   :  { %v336_v0 = vld [vmem:[#allocation2] sm:$0x3] }
 0x861   :  { %v337_v22 = vpack.c.bf16 %v336_v0, %v336_v0 }
 0x862   :  { %v408_v36 = vpop.permute.xlu1 %407 }
 0x863   :  { %506 = vmatmul.mubr.msk.bf16.vlgmr.msra.gmra.mrb[4].mxu1 %vm38_vm2, %v337_v22 }
 0x936   :  { %v391_v24 = vpop.f32.mrb[4].mxu1 }
 0x937   :  { %v397_v25 = vadd.f32 %v459_v23, %v391_v24  ;;  %v507_v26 = vpop.f32.mrb[5].mxu1 }
 0x938   :  { %v394_v27 = vpop.f32.mrb[6].mxu1 }
 0x939   :  { %546 = vtanh.f32 %v397_v25  ;;  %v508_v28 = vpop.f32.mrb[7].mxu1  ;;  %v463_v30 = vmul.f32 -1.442695, %v397_v25 }
 0x93b   :  { %548 = vpow2.f32 %v463_v30 }
 0x943   :  { %v547_v29 = vpop.eup %546 }
 0x944   :  { %412 = vrot.lane.b32.xlu0 %v547_v29, %s556_s15 }
 0x945   :  { %v549_v31 = vpop.eup %548 }
 0x946   :  { %v401_v32 = vadd.f32 1.0, %v549_v31 }
 0x948   :  { %550 = vrcp.f32 %v401_v32 }
 0x952   :  { %v551_v33 = vpop.eup %550 }
 0x953   :  { %v410_v37 = vmul.f32 %v551_v33, %v408_v36 }
 0x9b6   :  { %v413_v34 = vpop.permute.xlu0 %412 }
 0x9b7   :  { %v415_v35 = vmul.f32 %v551_v33, %v413_v34 }
 0x9b9   :  { %417 = vrot.lane.b32.xlu0 %v415_v35, %s557_s16 }
 0xa2b   :  { %v418_v38 = vpop.permute.xlu0 %417 }
 0xa2c   :  { %v420_v39 = vadd.f32 %v418_v38, %v410_v37 }
 0xa2e   :  { %552 = vtanh.f32 %v420_v39  ;;  %428 = vrot.lane.b32.xlu0 %v420_v39, %s558_s17 }
 0xa38   :  { %v553_v40 = vpop.eup %552 }
 0xa39   :  { %423 = vrot.lane.b32.xlu1 %v553_v40, %s556_s15 }
 0xaa0   :  { %v429_v41 = vpop.permute.xlu0 %428 }
 0xaa1   :  { %431 = vst.msk [vmem:[#allocation3] sm:$0x3] %vm16_vm0, %v429_v41 }
 0xaab   :  { %v424_v42 = vpop.permute.xlu1 %423 }
 0xaac   :  { %v426_v43 = vmul.f32 %v551_v33, %v424_v42 }
 0xaae   :  { %433 = vrot.lane.b32.xlu1 %v426_v43, %s557_s16 }
 0xb20   :  { %v434_v44 = vpop.permute.xlu1 %433 }
 0xb21   :  { %436 = vst.msk [vmem:[#allocation2] sm:$0x3] %vm16_vm0, %v434_v44  ;;  %464 = vst.msk [vmem:[%s684_s2 + $0x6] sm:$0x3] %vm16_vm0, %v434_v44 }

// kernel: demucs_forward.25
= control target key start
LH: loop header
LB: loop body
LE: loop exit
PB: predicated region body
PF: predicated region fallthrough
CT: control target
= control target key end

     0   :  { %v203_v0 = vmov 0.0   ;;  %vm204_vm0 = vmmov 0   ;;  %vm42_vm1 = vcmask 261120   ;;  %s205_s25 = smov 96   ;;  %s254_s1 = inlined_call_operand.vmem [shape: bf16[32,64], index: 1, kind: input, shape index: {}]   ;;  %s255_s0 = inlined_call_operand.vmem [shape: bf16[6,32], index: 0, kind: input, shape index: {}]   ;;  %s256_s3 = inlined_call_operand.vmem [shape: bf16[32,128], index: 3, kind: input, shape index: {}]   ;;  %s257_s2 = inlined_call_operand.vmem [shape: f32[1,64], index: 2, kind: input, shape index: {}]   ;;  %s258_s4 = inlined_call_operand.vmem [shape: f32[6,128], index: 4, kind: output, shape index: {}]  }
   0x1   :  { %176 = vmatprep.subr.bf16.mxu0 %v203_v0  ;;  %v195_v1 = vld [vmem:[%s254_s1] sm:$0xff]   ;;  %180 = vmatprep.mubr.msk.bf16.mxu0 %vm204_vm0, %v203_v0  ;;  %v196_v2 = vld [vmem:[%s254_s1 + $0x8] sm:$0xff]  }
   0x2   :  { %184 = vmatprep.subr.bf16.mxu1 %v203_v0  ;;  %188 = vmatprep.mubr.msk.bf16.mxu1 %vm204_vm0, %v203_v0  ;;  %v18_v3 = vld [vmem:[%s255_s0] sm:$0x7]  ;;  %v198_v13 = vld [vmem:[%s256_s3 + $0x8] sm:$0xff]  }
   0x3   :  { %177 = vmatpush3.bf16.msra.mxu0 %v195_v1  ;;  %v197_v4 = vld [vmem:[%s256_s3] sm:$0xff]  }
   0x4   :  { %178 = vmatprep.subr.bf16.mxu0 %v203_v0  ;;  %185 = vmatpush3.bf16.msra.mxu1 %v197_v4  ;;  %v162_v5 = vld [vmem:[%s257_s2] ss:$0 sm:$0xff] }
   0x5   :  { %186 = vmatprep.subr.bf16.mxu1 %v203_v0 }
   0x7   :  { %179 = vmatpush3.bf16.msra.mxu0 %v196_v2 }
   0x8   :  { %187 = vmatpush3.bf16.msra.mxu1 %v198_v13 }
   0xa   :  { %181 = vmatmul.mubr.msk.bf16.vlgmr.msra.gmra.mrb[0].mxu0 %vm42_vm1, %v18_v3 }
  0xdd   :  { %v80_v6 = vpop.f32.mrb[0].mxu0 }
  0xde   :  { %v81_v7 = vadd.f32 %v162_v5, %v80_v6  ;;  %v182_v8 = vpop.f32.mrb[1].mxu0 }
  0xdf   :  { %v83_v9 = vpop.f32.mrb[2].mxu0 }
  0xe0   :  { %v166_v10 = vmul.f32 -1.442695, %v81_v7  ;;  %v183_v11 = vpop.f32.mrb[3].mxu0 }
  0xe2   :  { %199 = vpow2.f32 %v166_v10 }
  0xec   :  { %v200_v12 = vpop.eup %199 }
  0xed   :  { %v89_v14 = vadd.f32 1.0, %v200_v12 }
  0xef   :  { %201 = vrcp.f32 %v89_v14 }
  0xf9   :  { %v202_v15 = vpop.eup %201 }
  0xfa   :  { %93 = vrot.lane.b32.xlu0 %v202_v15, %s205_s25 }
 0x16c   :  { %v94_v16 = vpop.permute.xlu0 %93 }
 0x16d   :  { %v96_v17 = vmul.f32 %v94_v16, %v81_v7 }
 0x16f   :  { %v97_v18 = vpack.c.bf16 %v96_v17, %v96_v17 }
 0x171   :  { %189 = vmatmul.mubr.msk.bf16.vlgmr.msra.gmra.mrb[0].mxu1 %vm42_vm1, %v97_v18 }
 0x244   :  { %v151_v19 = vpop.f32.mrb[0].mxu1 }
 0x245   :  { %157 = vst [vmem:[%s258_s4] sm:$0x3f] %v151_v19  ;;  %v190_v20 = vpop.f32.mrb[1].mxu1 }
 0x246   :  { %v154_v21 = vpop.f32.mrb[2].mxu1 }
 0x247   :  { %v191_v22 = vpop.f32.mrb[3].mxu1 }

// kernel: squeeze.22
= control target key start
LH: loop header
LB: loop body
LE: loop exit
PB: predicated region body
PF: predicated region fallthrough
CT: control target
= control target key end

     0   :  { %s27_s6 = smov 3  ;;  %s30_s7 = smov 12  ;;  %vm32_vm0 = vcmask 1043458   ;;  %vm5_vm1 = vcmask 1041409   ;;  %vm9_vm2 = vcmask 1042434   ;;  %vm11_vm3 = vcmask 31744   ;;  %s905_s0 = inlined_call_operand.vmem [shape: f32[2,68,1,1,4], index: 0, kind: input, shape index: {}]   ;;  %s906_s1 = inlined_call_operand.vmem [shape: f32[2,272,1], index: 1, kind: output, shape index: {}]  }
   0x1   :  { %v504_v0 = vld [vmem:[%s905_s0 + $0x1f] ss:$72 sm:%s27_s6]   ;;  %s55_s12 = smov 3  ;;  %s58_s15 = smov 12  ;;  %v2_v4 = vld [vmem:[%s905_s0] sm:$0x1]  }
   0x2   :  { %v505_v1 = vld [vmem:[%s905_s0 - $0x51] ss:$72 sm:%s30_s7]   ;;  %v508_v3 = vld [vmem:[%s905_s0 + $0x1d] ss:$72 sm:%s55_s12]   ;;  %s602_s18 = smov 124   ;;  %s41_s21 = smov 3 }
   0x3   :  { %v33_v2 = vsel %vm32_vm0, %v505_v1, %v504_v0  ;;  %v509_v5 = vld [vmem:[%s905_s0 - $0x53] ss:$72 sm:%s58_s15]   ;;  %s44_s22 = smov 12  ;;  %v499_v6 = vld [vmem:[%s905_s0 + $0x1f] sm:$0x2]   ;;  %s69_s29 = smov 3 }
   0x4   :  { %34 = vrot.lane.b32.xlu0 %v33_v2, %s602_s18  ;;  %v61_v7 = vsel %vm32_vm0, %v509_v5, %v508_v3  ;;  %v506_v8 = vld [vmem:[%s905_s0 + $0x1e] ss:$72 sm:%s41_s21]   ;;  %v6_v10 = vsel %vm5_vm1, %v499_v6, %v2_v4  ;;  %s603_s30 = smov 116   ;;  %s72_s4 = smov 12  ;;  %v500_v13 = vld [vmem:[%s905_s0 + $0x3e] sm:$0x4]  }
   0x5   :  { %v507_v9 = vld [vmem:[%s905_s0 - $0x52] ss:$72 sm:%s44_s22]   ;;  %62 = vrot.lane.b32.xlu1 %v61_v7, %s603_s30  ;;  %s83_s9 = smov 3  ;;  %s86_s10 = smov 12  ;;  %v10_v17 = vsel %vm9_vm2, %v500_v13, %v6_v10  ;;  %v501_v18 = vld [vmem:[%s905_s0 + $0x48] sm:$0x1]  }
   0x6   :  { %v47_v11 = vsel %vm32_vm0, %v507_v9, %v506_v8  ;;  %v510_v12 = vld [vmem:[%s905_s0 + $0x1c] ss:$72 sm:%s69_s29]   ;;  %s604_s11 = smov 120   ;;  %v512_v16 = vld [vmem:[%s905_s0 + $0x1b] ss:$72 sm:%s83_s9]   ;;  %s97_s14 = smov 3 }
   0x7   :  { %v511_v14 = vld [vmem:[%s905_s0 - $0x54] ss:$72 sm:%s72_s4]   ;;  %v513_v19 = vld [vmem:[%s905_s0 - $0x55] ss:$72 sm:%s86_s10]   ;;  %s100_s21 = smov 12  ;;  %s605_s22 = smov 112  }
   0x8   :  { %48 = vrot.lane.b32.xlu0 %v47_v11, %s604_s11  ;;  %v75_v15 = vsel %vm32_vm0, %v511_v14, %v510_v12  ;;  %v514_v20 = vld [vmem:[%s905_s0 + $0x1a] ss:$72 sm:%s97_s14]   ;;  %12 = vst.msk [vmem:[#allocation0] ss:$8 sm:$0x7] %vm11_vm3, %v10_v17   ;;  %v89_v21 = vsel %vm32_vm0, %v513_v19, %v512_v16  ;;  %s111_s25 = smov 3 }
   0x9   :  { %76 = vrot.lane.b32.xlu1 %v75_v15, %s605_s22  ;;  %v515_v22 = vld [vmem:[%s905_s0 - $0x56] ss:$72 sm:%s100_s21]   ;;  %s114_s26 = smov 12  ;;  %v502_v23 = vld [vmem:[%s905_s0 + $0x67] sm:$0x2]   ;;  %s125_s4 = smov 3 }
   0xa   :  { %v103_v24 = vsel %vm32_vm0, %v515_v22, %v514_v20  ;;  %v516_v25 = vld [vmem:[%s905_s0 + $0x19] ss:$72 sm:%s111_s25]   ;;  %v18_v27 = vsel %vm5_vm1, %v502_v23, %v501_v18  ;;  %s606_s5 = smov 108   ;;  %v518_v28 = vld [vmem:[%s905_s0 + $0x18] ss:$72 sm:%s125_s4]   ;;  %s128_s8 = smov 12 }
   0xb   :  { %v517_v26 = vld [vmem:[%s905_s0 - $0x57] ss:$72 sm:%s114_s26]   ;;  %v503_v29 = vld [vmem:[%s905_s0 + $0x86] sm:$0x4]   ;;  %s139_s13 = smov 3  ;;  %s142_s14 = smov 12 }
   0xc   :  { %90 = vrot.lane.b32.xlu0 %v89_v21, %s606_s5  ;;  %v117_v30 = vsel %vm32_vm0, %v517_v26, %v516_v25  ;;  %v519_v31 = vld [vmem:[%s905_s0 - $0x58] ss:$72 sm:%s128_s8]   ;;  %v22_v32 = vsel %vm9_vm2, %v503_v29, %v18_v27  ;;  %s607_s15 = smov 104   ;;  %s153_s18 = smov 3  ;;  %vm429_vm4 = vcmask 1045508   ;;  %vm36_vm5 = vcmask 1048544  }
   0xd   :  { %104 = vrot.lane.b32.xlu1 %v103_v24, %s607_s15  ;;  %v520_v33 = vld [vmem:[%s905_s0 + $0x17] ss:$72 sm:%s139_s13]   ;;  %25 = vst.msk [vmem:[#allocation0 + $0x1] ss:$8 sm:$0x7] %vm11_vm3, %v22_v32   ;;  %v131_v34 = vsel %vm32_vm0, %v519_v31, %v518_v28  ;;  %s156_s23 = smov 12 }
   0xe   :  { %v521_v35 = vld [vmem:[%s905_s0 - $0x59] ss:$72 sm:%s142_s14]   ;;  %v522_v36 = vld [vmem:[%s905_s0 + $0x16] ss:$72 sm:%s153_s18]   ;;  %s608_s24 = smov 100   ;;  %s167_s27 = smov 3 }
   0xf   :  { %v523_v37 = vld [vmem:[%s905_s0 - $0x5a] ss:$72 sm:%s156_s23]   ;;  %s170_s28 = smov 12  ;;  %v145_v38 = vsel %vm32_vm0, %v521_v35, %v520_v33  ;;  %v524_v39 = vld [vmem:[%s905_s0 + $0x15] ss:$72 sm:%s167_s27]   ;;  %s181_s2 = smov 3 }
  0x10   :  { %118 = vrot.lane.b32.xlu0 %v117_v30, %s608_s24  ;;  %s609_s3 = smov 96   ;;  %v525_v40 = vld [vmem:[%s905_s0 - $0x5b] ss:$72 sm:%s170_s28]   ;;  %s184_s6 = smov 12  ;;  %v159_v41 = vsel %vm32_vm0, %v523_v37, %v522_v36  ;;  %vm50_vm6 = vcmask 1015744   ;;  %vm64_vm7 = vcmask 982944  }
  0x11   :  { %132 = vrot.lane.b32.xlu1 %v131_v34, %s609_s3  ;;  %v526_v42 = vld [vmem:[%s905_s0 + $0x14] ss:$72 sm:%s181_s2]   ;;  %s195_s9 = smov 3  ;;  %s198_s10 = smov 12  ;;  %v173_v44 = vsel %vm32_vm0, %v525_v40, %v524_v39  ;;  %vm78_vm8 = vcmask 950144   ;;  %vm92_vm9 = vcmask 917344  }
  0x12   :  { %s610_s11 = smov 92   ;;  %v527_v43 = vld [vmem:[%s905_s0 - $0x5c] ss:$72 sm:%s184_s6]   ;;  %s209_s14 = smov 3  ;;  %v528_v45 = vld [vmem:[%s905_s0 + $0x13] ss:$72 sm:%s195_s9]  }
  0x13   :  { %s212_s17 = smov 12  ;;  %s611_s18 = smov 88   ;;  %v529_v46 = vld [vmem:[%s905_s0 - $0x5d] ss:$72 sm:%s198_s10]   ;;  %v187_v47 = vsel %vm32_vm0, %v527_v43, %v526_v42  ;;  %v530_v48 = vld [vmem:[%s905_s0 + $0x12] ss:$72 sm:%s209_s14]  }
  0x14   :  { %146 = vrot.lane.b32.xlu0 %v145_v38, %s610_s11  ;;  %s223_s21 = smov 3  ;;  %s226_s24 = smov 12  ;;  %v531_v49 = vld [vmem:[%s905_s0 - $0x5e] ss:$72 sm:%s212_s17]   ;;  %v201_v50 = vsel %vm32_vm0, %v529_v46, %v528_v45  ;;  %vm106_vm10 = vcmask 884544   ;;  %vm120_vm11 = vcmask 851744  }
  0x15   :  { %160 = vrot.lane.b32.xlu1 %v159_v41, %s611_s18  ;;  %s612_s25 = smov 84   ;;  %s237_s28 = smov 3  ;;  %v532_v51 = vld [vmem:[%s905_s0 + $0x11] ss:$72 sm:%s223_s21]   ;;  %v215_v53 = vsel %vm32_vm0, %v531_v49, %v530_v48  ;;  %vm134_vm12 = vcmask 818944   ;;  %vm148_vm13 = vcmask 786144  }
  0x16   :  { %s240_s2 = smov 12  ;;  %s613_s3 = smov 80   ;;  %v533_v52 = vld [vmem:[%s905_s0 - $0x5f] ss:$72 sm:%s226_s24]   ;;  %v534_v54 = vld [vmem:[%s905_s0 + $0x10] ss:$72 sm:%s237_s28]  }
  0x17   :  { %s251_s6 = smov 3  ;;  %s254_s9 = smov 12  ;;  %v535_v55 = vld [vmem:[%s905_s0 - $0x60] ss:$72 sm:%s240_s2]   ;;  %v229_v56 = vsel %vm32_vm0, %v533_v52, %v532_v51  ;;  %vm162_vm14 = vcmask 753344   ;;  %vm176_vm15 = vcmask 720544  }
  0x18   :  { %174 = vrot.lane.b32.xlu0 %v173_v44, %s612_s25  ;;  %s614_s10 = smov 76   ;;  %s265_s13 = smov 3  ;;  %v536_v57 = vld [vmem:[%s905_s0 + $0xf] ss:$72 sm:%s251_s6]   ;;  %v243_v59 = vsel %vm32_vm0, %v535_v55, %v534_v54  ;;  %vm204_vm1 = vcmask 654944   ;;  %vm218_vm2 = vcmask 622144  }
  0x19   :  { %188 = vrot.lane.b32.xlu1 %v187_v47, %s613_s3  ;;  %s268_s16 = smov 12  ;;  %s615_s17 = smov 72   ;;  %v537_v58 = vld [vmem:[%s905_s0 - $0x61] ss:$72 sm:%s254_s9]   ;;  %vm232_vm3 = vcmask 589344  }
  0x1a   :  { %s279_s20 = smov 3  ;;  %v538_v60 = vld [vmem:[%s905_s0 + $0xe] ss:$72 sm:%s265_s13]   ;;  %s282_s23 = smov 12  ;;  %v257_v62 = vsel %vm32_vm0, %v537_v58, %v536_v57 }
  0x1b   :  { %s616_s24 = smov 68   ;;  %v539_v61 = vld [vmem:[%s905_s0 - $0x62] ss:$72 sm:%s268_s16]   ;;  %s293_s27 = smov 3  ;;  %v540_v63 = vld [vmem:[%s905_s0 + $0xd] ss:$72 sm:%s279_s20]  }
  0x1c   :  { %202 = vrot.lane.b32.xlu0 %v201_v50, %s614_s10  ;;  %s296_s30 = smov 12  ;;  %s617_s2 = smov 64   ;;  %v541_v0 = vld [vmem:[%s905_s0 - $0x63] ss:$72 sm:%s282_s23]   ;;  %v271_v1 = vsel %vm32_vm0, %v539_v61, %v538_v60 }
  0x1d   :  { %216 = vrot.lane.b32.xlu1 %v215_v53, %s615_s17  ;;  %s307_s5 = smov 3  ;;  %v542_v2 = vld [vmem:[%s905_s0 + $0xc] ss:$72 sm:%s293_s27]   ;;  %s310_s8 = smov 12  ;;  %v285_v4 = vsel %vm32_vm0, %v541_v0, %v540_v63 }
  0x1e   :  { %s618_s9 = smov 60   ;;  %v543_v3 = vld [vmem:[%s905_s0 - $0x64] ss:$72 sm:%s296_s30]   ;;  %s321_s12 = smov 3  ;;  %v544_v5 = vld [vmem:[%s905_s0 + $0xb] ss:$72 sm:%s307_s5]  }
  0x1f   :  { %s324_s15 = smov 12  ;;  %s619_s16 = smov 56   ;;  %v545_v6 = vld [vmem:[%s905_s0 - $0x65] ss:$72 sm:%s310_s8]   ;;  %v299_v7 = vsel %vm32_vm0, %v543_v3, %v542_v2  ;;  %v546_v8 = vld [vmem:[%s905_s0 + $0xa] ss:$72 sm:%s321_s12]  }
  0x20   :  { %230 = vrot.lane.b32.xlu0 %v229_v56, %s616_s24  ;;  %s335_s19 = smov 3  ;;  %s338_s22 = smov 12  ;;  %v547_v9 = vld [vmem:[%s905_s0 - $0x66] ss:$72 sm:%s324_s15]   ;;  %v313_v10 = vsel %vm32_vm0, %v545_v6, %v544_v5 }
  0x21   :  { %244 = vrot.lane.b32.xlu1 %v243_v59, %s617_s2  ;;  %s620_s23 = smov 52   ;;  %s349_s26 = smov 3  ;;  %v548_v11 = vld [vmem:[%s905_s0 + $0x9] ss:$72 sm:%s335_s19]   ;;  %v327_v13 = vsel %vm32_vm0, %v547_v9, %v546_v8 }
  0x22   :  { %s352_s29 = smov 12  ;;  %s621_s30 = smov 48   ;;  %v549_v12 = vld [vmem:[%s905_s0 - $0x67] ss:$72 sm:%s338_s22]   ;;  %v550_v14 = vld [vmem:[%s905_s0 + $0x8] ss:$72 sm:%s349_s26]  }
  0x23   :  { %s363_s4 = smov 3  ;;  %s366_s7 = smov 12  ;;  %v551_v15 = vld [vmem:[%s905_s0 - $0x68] ss:$72 sm:%s352_s29]   ;;  %v341_v16 = vsel %vm32_vm0, %v549_v12, %v548_v11 }
  0x24   :  { %258 = vrot.lane.b32.xlu0 %v257_v62, %s618_s9  ;;  %s622_s8 = smov 44   ;;  %s377_s11 = smov 3  ;;  %v552_v17 = vld [vmem:[%s905_s0 + $0x7] ss:$72 sm:%s363_s4]   ;;  %v355_v19 = vsel %vm32_vm0, %v551_v15, %v550_v14 }
  0x25   :  { %272 = vrot.lane.b32.xlu1 %v271_v1, %s619_s16  ;;  %s380_s14 = smov 12  ;;  %s623_s15 = smov 40   ;;  %v553_v18 = vld [vmem:[%s905_s0 - $0x69] ss:$72 sm:%s366_s7]  }
  0x26   :  { %s391_s18 = smov 3  ;;  %s394_s19 = smov 12  ;;  %v554_v20 = vld [vmem:[%s905_s0 + $0x6] ss:$72 sm:%s377_s11]   ;;  %v369_v22 = vsel %vm32_vm0, %v553_v18, %v552_v17 }
  0x27   :  { %s405_s22 = smov 3  ;;  %v555_v21 = vld [vmem:[%s905_s0 - $0x6a] ss:$72 sm:%s380_s14]   ;;  %s419_s26 = smov 3  ;;  %v556_v23 = vld [vmem:[%s905_s0 + $0x5] ss:$72 sm:%s391_s18]  }
  0x28   :  { %286 = vrot.lane.b32.xlu0 %v285_v4, %s620_s23  ;;  %s624_s23 = smov 36   ;;  %s422_s27 = smov 12  ;;  %v557_v24 = vld [vmem:[%s905_s0 - $0x6b] ss:$72 sm:%s394_s19]   ;;  %v383_v26 = vsel %vm32_vm0, %v555_v21, %v554_v20 }
  0x29   :  { %300 = vrot.lane.b32.xlu1 %v299_v7, %s621_s30  ;;  %s408_s3 = smov 12  ;;  %s625_s4 = smov 32   ;;  %v558_v25 = vld [vmem:[%s905_s0 + $0x4] ss:$72 sm:%s405_s22]   ;;  %v397_v30 = vsel %vm32_vm0, %v557_v24, %v556_v23 }
  0x2a   :  { %s440_s7 = smov 3  ;;  %v560_v27 = vld [vmem:[%s905_s0 + $0x3] ss:$72 sm:%s419_s26]   ;;  %s427_s13 = smov 48  ;;  %v559_v29 = vld [vmem:[%s905_s0 - $0x6c] ss:$72 sm:%s408_s3]  }
  0x2b   :  { %v561_v28 = vld [vmem:[%s905_s0 - $0x6d] ss:$72 sm:%s422_s27]   ;;  %s626_s14 = smov 28   ;;  %s461_s17 = smov 3  ;;  %v563_v31 = vld [vmem:[%s905_s0 + $0x2] ss:$72 sm:%s440_s7]   ;;  %v411_v35 = vsel %vm32_vm0, %v559_v29, %v558_v25 }
  0x2c   :  { %314 = vrot.lane.b32.xlu0 %v313_v10, %s622_s8  ;;  %s443_s8 = smov 12  ;;  %s464_s18 = smov 12  ;;  %v425_v33 = vsel %vm32_vm0, %v561_v28, %v560_v27  ;;  %v562_v34 = vld [vmem:[%s905_s0 - $0xdd] ss:$72 sm:%s427_s13]  }
  0x2d   :  { %328 = vrot.lane.b32.xlu1 %v327_v13, %s623_s15  ;;  %v564_v32 = vld [vmem:[%s905_s0 - $0x6e] ss:$72 sm:%s443_s8]   ;;  %s627_s24 = smov 24   ;;  %s469_s2 = smov 48  ;;  %v430_v40 = vsel %vm429_vm4, %v562_v34, %v425_v33 }
  0x2e   :  { %v566_v36 = vld [vmem:[%s905_s0 + $0x1] ss:$72 sm:%s461_s17]   ;;  %s628_s3 = smov 20   ;;  %v446_v38 = vsel %vm32_vm0, %v564_v32, %v563_v31  ;;  %s629_s6 = smov 16  }
  0x2f   :  { %v567_v37 = vld [vmem:[%s905_s0 - $0x6f] ss:$72 sm:%s464_s18]   ;;  %s631_s9 = smov 8   ;;  %s632_s10 = smov 4  }
  0x30   :  { %342 = vrot.lane.b32.xlu0 %v341_v16, %s624_s23  ;;  %s448_s23 = smov 48  ;;  %v467_v41 = vsel %vm32_vm0, %v567_v37, %v566_v36  ;;  %v568_v42 = vld [vmem:[%s905_s0 - $0xdf] ss:$72 sm:%s469_s2]   ;;  %vm190_vm0 = vcmask 687744  }
  0x31   :  { %356 = vrot.lane.b32.xlu1 %v355_v19, %s625_s4  ;;  %v565_v39 = vld [vmem:[%s905_s0 - $0xde] ss:$72 sm:%s448_s23]   ;;  %s630_s0 = smov 12   ;;  %v472_v44 = vsel %vm429_vm4, %v568_v42, %v467_v41 }
  0x32   :  { %v451_v43 = vsel %vm429_vm4, %v565_v39, %v446_v38  ;;  %vm246_vm4 = vcmask 556544  }
  0x34   :  { %370 = vrot.lane.b32.xlu0 %v369_v22, %s626_s14 }
  0x35   :  { %384 = vrot.lane.b32.xlu1 %v383_v26, %s627_s24 }
  0x38   :  { %398 = vrot.lane.b32.xlu0 %v397_v30, %s628_s3 }
  0x39   :  { %412 = vrot.lane.b32.xlu1 %v411_v35, %s629_s6 }
  0x3c   :  { %431 = vrot.lane.b32.xlu0 %v430_v40, %s630_s0 }
  0x3d   :  { %452 = vrot.lane.b32.xlu1 %v451_v43, %s631_s9 }
  0x40   :  { %473 = vrot.lane.b32.xlu0 %v472_v44, %s632_s10 }
  0x76   :  { %v35_v45 = vpop.permute.xlu0 %34  }
  0x77   :  { %37 = vst.msk [vmem:[#allocation0] sm:$0x3] %vm36_vm5, %v35_v45   ;;  %39 = vst.msk [vmem:[#allocation0 + $0x6] sm:$0xc] %vm36_vm5, %v35_v45   ;;  %v63_v46 = vpop.permute.xlu1 %62   ;;  %vm260_vm5 = vcmask 523744  }
  0x7a   :  { %v49_v47 = vpop.permute.xlu0 %48  }
  0x7b   :  { %51 = vst.msk [vmem:[#allocation0] sm:$0x3] %vm50_vm6, %v49_v47   ;;  %53 = vst.msk [vmem:[#allocation0 + $0x6] sm:$0xc] %vm50_vm6, %v49_v47   ;;  %v77_v48 = vpop.permute.xlu1 %76   ;;  %vm274_vm6 = vcmask 490944  }
  0x7c   :  { %65 = vst.msk [vmem:[#allocation0] sm:$0x3] %vm64_vm7, %v63_v46   ;;  %67 = vst.msk [vmem:[#allocation0 + $0x6] sm:$0xc] %vm64_vm7, %v63_v46   ;;  %vm288_vm7 = vcmask 458144  }
  0x7d   :  { %79 = vst.msk [vmem:[#allocation0] sm:$0x3] %vm78_vm8, %v77_v48   ;;  %81 = vst.msk [vmem:[#allocation0 + $0x6] sm:$0xc] %vm78_vm8, %v77_v48   ;;  %vm302_vm8 = vcmask 425344  }
  0x7e   :  { %v91_v49 = vpop.permute.xlu0 %90  }
  0x7f   :  { %93 = vst.msk [vmem:[#allocation0] sm:$0x3] %vm92_vm9, %v91_v49   ;;  %95 = vst.msk [vmem:[#allocation0 + $0x6] sm:$0xc] %vm92_vm9, %v91_v49   ;;  %v105_v50 = vpop.permute.xlu1 %104   ;;  %vm316_vm9 = vcmask 392544  }
  0x80   :  { %107 = vst.msk [vmem:[#allocation0] sm:$0x3] %vm106_vm10, %v105_v50   ;;  %109 = vst.msk [vmem:[#allocation0 + $0x6] sm:$0xc] %vm106_vm10, %v105_v50   ;;  %vm330_vm10 = vcmask 359744  }
  0x82   :  { %v119_v51 = vpop.permute.xlu0 %118  }
  0x83   :  { %121 = vst.msk [vmem:[#allocation0] sm:$0x3] %vm120_vm11, %v119_v51   ;;  %123 = vst.msk [vmem:[#allocation0 + $0x6] sm:$0xc] %vm120_vm11, %v119_v51   ;;  %v133_v52 = vpop.permute.xlu1 %132   ;;  %vm344_vm11 = vcmask 326944  }
  0x84   :  { %135 = vst.msk [vmem:[#allocation0] sm:$0x3] %vm134_vm12, %v133_v52   ;;  %137 = vst.msk [vmem:[#allocation0 + $0x6] sm:$0xc] %vm134_vm12, %v133_v52   ;;  %vm358_vm12 = vcmask 294144  }
  0x86   :  { %v147_v53 = vpop.permute.xlu0 %146  }
  0x87   :  { %149 = vst.msk [vmem:[#allocation0] sm:$0x3] %vm148_vm13, %v147_v53   ;;  %151 = vst.msk [vmem:[#allocation0 + $0x6] sm:$0xc] %vm148_vm13, %v147_v53   ;;  %v161_v54 = vpop.permute.xlu1 %160   ;;  %vm372_vm13 = vcmask 261344  }
  0x88   :  { %163 = vst.msk [vmem:[#allocation0] sm:$0x3] %vm162_vm14, %v161_v54   ;;  %165 = vst.msk [vmem:[#allocation0 + $0x6] sm:$0xc] %vm162_vm14, %v161_v54   ;;  %vm386_vm14 = vcmask 228544  }
  0x8a   :  { %v175_v55 = vpop.permute.xlu0 %174  }
  0x8b   :  { %177 = vst.msk [vmem:[#allocation0] sm:$0x3] %vm176_vm15, %v175_v55   ;;  %179 = vst.msk [vmem:[#allocation0 + $0x6] sm:$0xc] %vm176_vm15, %v175_v55   ;;  %v189_v56 = vpop.permute.xlu1 %188   ;;  %vm400_vm15 = vcmask 195744  }
  0x8c   :  { %191 = vst.msk [vmem:[#allocation0] sm:$0x3] %vm190_vm0, %v189_v56   ;;  %193 = vst.msk [vmem:[#allocation0 + $0x6] sm:$0xc] %vm190_vm0, %v189_v56   ;;  %vm414_vm0 = vcmask 162944  }
  0x8e   :  { %v203_v57 = vpop.permute.xlu0 %202  }
  0x8f   :  { %205 = vst.msk [vmem:[#allocation0] sm:$0x3] %vm204_vm1, %v203_v57   ;;  %207 = vst.msk [vmem:[#allocation0 + $0x6] sm:$0xc] %vm204_vm1, %v203_v57   ;;  %v217_v58 = vpop.permute.xlu1 %216   ;;  %vm433_vm1 = vcmask 130144  }
  0x90   :  { %219 = vst.msk [vmem:[#allocation0] sm:$0x3] %vm218_vm2, %v217_v58   ;;  %221 = vst.msk [vmem:[#allocation0 + $0x6] sm:$0xc] %vm218_vm2, %v217_v58   ;;  %vm454_vm2 = vcmask 97344  }
  0x92   :  { %v231_v59 = vpop.permute.xlu0 %230  }
  0x93   :  { %233 = vst.msk [vmem:[#allocation0] sm:$0x3] %vm232_vm3, %v231_v59   ;;  %235 = vst.msk [vmem:[#allocation0 + $0x6] sm:$0xc] %vm232_vm3, %v231_v59   ;;  %v245_v60 = vpop.permute.xlu1 %244   ;;  %vm475_vm3 = vcmask 64544  }
  0x94   :  { %247 = vst.msk [vmem:[#allocation0] sm:$0x3] %vm246_vm4, %v245_v60   ;;  %249 = vst.msk [vmem:[#allocation0 + $0x6] sm:$0xc] %vm246_vm4, %v245_v60  }
  0x96   :  { %v259_v61 = vpop.permute.xlu0 %258  }
  0x97   :  { %261 = vst.msk [vmem:[#allocation0] sm:$0x3] %vm260_vm5, %v259_v61   ;;  %263 = vst.msk [vmem:[#allocation0 + $0x6] sm:$0xc] %vm260_vm5, %v259_v61   ;;  %v273_v62 = vpop.permute.xlu1 %272  }
  0x98   :  { %275 = vst.msk [vmem:[#allocation0] sm:$0x3] %vm274_vm6, %v273_v62   ;;  %277 = vst.msk [vmem:[#allocation0 + $0x6] sm:$0xc] %vm274_vm6, %v273_v62  }
  0x9a   :  { %v287_v63 = vpop.permute.xlu0 %286  }
  0x9b   :  { %289 = vst.msk [vmem:[#allocation0] sm:$0x3] %vm288_vm7, %v287_v63   ;;  %291 = vst.msk [vmem:[#allocation0 + $0x6] sm:$0xc] %vm288_vm7, %v287_v63   ;;  %v301_v0 = vpop.permute.xlu1 %300  }
  0x9c   :  { %303 = vst.msk [vmem:[#allocation0] sm:$0x3] %vm302_vm8, %v301_v0   ;;  %305 = vst.msk [vmem:[#allocation0 + $0x6] sm:$0xc] %vm302_vm8, %v301_v0  }
  0x9e   :  { %v315_v1 = vpop.permute.xlu0 %314  }
  0x9f   :  { %317 = vst.msk [vmem:[#allocation0] sm:$0x3] %vm316_vm9, %v315_v1   ;;  %319 = vst.msk [vmem:[#allocation0 + $0x6] sm:$0xc] %vm316_vm9, %v315_v1   ;;  %v329_v2 = vpop.permute.xlu1 %328  }
  0xa0   :  { %331 = vst.msk [vmem:[#allocation0] sm:$0x3] %vm330_vm10, %v329_v2   ;;  %333 = vst.msk [vmem:[#allocation0 + $0x6] sm:$0xc] %vm330_vm10, %v329_v2  }
  0xa2   :  { %v343_v3 = vpop.permute.xlu0 %342  }
  0xa3   :  { %345 = vst.msk [vmem:[#allocation0] sm:$0x3] %vm344_vm11, %v343_v3   ;;  %347 = vst.msk [vmem:[#allocation0 + $0x6] sm:$0xc] %vm344_vm11, %v343_v3   ;;  %v357_v4 = vpop.permute.xlu1 %356  }
  0xa4   :  { %359 = vst.msk [vmem:[#allocation0] sm:$0x3] %vm358_vm12, %v357_v4   ;;  %361 = vst.msk [vmem:[#allocation0 + $0x6] sm:$0xc] %vm358_vm12, %v357_v4  }
  0xa6   :  { %v371_v5 = vpop.permute.xlu0 %370  }
  0xa7   :  { %373 = vst.msk [vmem:[#allocation0] sm:$0x3] %vm372_vm13, %v371_v5   ;;  %375 = vst.msk [vmem:[#allocation0 + $0x6] sm:$0xc] %vm372_vm13, %v371_v5   ;;  %v385_v6 = vpop.permute.xlu1 %384  }
  0xa8   :  { %387 = vst.msk [vmem:[#allocation0] sm:$0x3] %vm386_vm14, %v385_v6   ;;  %389 = vst.msk [vmem:[#allocation0 + $0x6] sm:$0xc] %vm386_vm14, %v385_v6  }
  0xaa   :  { %v399_v7 = vpop.permute.xlu0 %398  }
  0xab   :  { %401 = vst.msk [vmem:[#allocation0] sm:$0x3] %vm400_vm15, %v399_v7   ;;  %403 = vst.msk [vmem:[#allocation0 + $0x6] sm:$0xc] %vm400_vm15, %v399_v7   ;;  %v413_v8 = vpop.permute.xlu1 %412  }
  0xac   :  { %415 = vst.msk [vmem:[#allocation0] sm:$0x3] %vm414_vm0, %v413_v8   ;;  %417 = vst.msk [vmem:[#allocation0 + $0x6] sm:$0xc] %vm414_vm0, %v413_v8  }
  0xae   :  { %v432_v9 = vpop.permute.xlu0 %431  }
  0xaf   :  { %434 = vst.msk [vmem:[#allocation0] sm:$0x3] %vm433_vm1, %v432_v9   ;;  %436 = vst.msk [vmem:[#allocation0 + $0x6] sm:$0xc] %vm433_vm1, %v432_v9   ;;  %v453_v10 = vpop.permute.xlu1 %452  }
  0xb0   :  { %438 = vst.msk [vmem:[#allocation0 + $0xc] sm:$0x30] %vm433_vm1, %v432_v9  }
  0xb1   :  { %455 = vst.msk [vmem:[#allocation0] sm:$0x3] %vm454_vm2, %v453_v10   ;;  %457 = vst.msk [vmem:[#allocation0 + $0x6] sm:$0xc] %vm454_vm2, %v453_v10  }
  0xb2   :  { %459 = vst.msk [vmem:[#allocation0 + $0xc] sm:$0x30] %vm454_vm2, %v453_v10   ;;  %v474_v11 = vpop.permute.xlu0 %473  }
  0xb3   :  { %476 = vst.msk [vmem:[#allocation0] sm:$0x3] %vm475_vm3, %v474_v11   ;;  %478 = vst.msk [vmem:[#allocation0 + $0x6] sm:$0xc] %vm475_vm3, %v474_v11  }
  0xb4   :  { %480 = vst.msk [vmem:[#allocation0 + $0xc] sm:$0x30] %vm475_vm3, %v474_v11  }
  0xba   :  { %v484_v12 = vld [vmem:[#allocation0] sm:$0x3]  ;;  %v488_v13 = vld [vmem:[#allocation0 + $0x8] sm:$0x3] }
  0xbb   :  { %v493_v14 = vld [vmem:[#allocation0 + $0x10] sm:$0x3]  ;;  %486 = vst [vmem:[%s906_s1] sm:$0x3] %v484_v12  ;;  %569 = vst [vmem:[%s906_s1 + $0x2] sm:$0x3] %v488_v13 }
  0xbc   :  { %570 = vst [vmem:[%s906_s1 + $0x4] sm:$0x3] %v493_v14 }

// kernel: demucs_forward.26
= control target key start
LH: loop header
LB: loop body
LE: loop exit
PB: predicated region body
PF: predicated region fallthrough
CT: control target
= control target key end

     0   :  { %s496_s15 = smov 0   ;;  %s528_s0 = inlined_call_operand.vmem [shape: bf16[32,16], index: 0, kind: input, shape index: {}]   ;;  %s529_s1 = inlined_call_operand.vmem [shape: bf16[16,32], index: 1, kind: input, shape index: {}]   ;;  %s530_s2 = inlined_call_operand.vmem [shape: f32[1,32], index: 2, kind: input, shape index: {}]   ;;  %s531_s3 = inlined_call_operand.vmem [shape: bf16[16,64], index: 3, kind: input, shape index: {}]   ;;  %s532_s4 = inlined_call_operand.vmem [shape: f32[32,64], index: 4, kind: output, shape index: {}]  }
   0x1 LB: > { %s403_s16 = sadd.s32 4294967295, %s466_s15   ;;  %p407_p0 = scmp.ge.s32.totalorder %s466_s15, 1  ;;  %s466_s15 = sphi %s496_s15, %s14_s15  }
   0x2   : > { %p163_p1 = scmp.lt.s32.totalorder %s466_s15, 3 }
   0x4   : > { %p164_p2 = pnand %p407_p0, %p163_p1 }
   0x5   : > { %v449_v0 = vld [vmem:[%s529_s1] sm:$0xff] (!%p164_p2)   ;;  %v468_v1 = vmov (!%p164_p2), 0.0   ;;  %s408_s19 = sshll.u32 (!%p164_p2), %s403_s16, 1  ;;  %vm469_vm0 = vmmov (!%p164_p2), 0   ;;  %vm224_vm1 = vcmask (!%p164_p2), 130048   ;;  %s470_s28 = smov (!%p164_p2), 112  }
   0x6   : > { %167 = sbr.rel (%p164_p2) target bundleno = 595 (0x253), region = 36  ;;  %426 = vmatprep.subr.bf16.mxu0 (!%p164_p2), %v468_v1  ;;  %432 = vmatprep.subr.bf16.mxu1 (!%p164_p2), %v468_v1  ;;  %p190_p3 = scmp.lt.s32.totalorder (!%p164_p2), %s408_s19, 3  ;;  %v412_v3 = vld [vmem:[%s530_s2] ss:$0 sm:$0xff] (!%p164_p2)  ;;  %vm344_vm2 = vcmask (!%p164_p2), 523264  }
   0x7   : > { %427 = vmatpush3.bf16.msra.mxu0 (!%p164_p2), %v449_v0  ;;  %428 = vmatprep.mubr.msk.bf16.mxu0 (!%p164_p2), %vm469_vm0, %v468_v1  ;;  %v451_v16 = vld [vmem:[%s531_s3] sm:$0xff] (!%p164_p2)  }
   0x8   : > { %434 = vmatprep.mubr.msk.bf16.mxu1 (!%p164_p2), %vm469_vm0, %v468_v1  ;;  %433 = vmatpush3.bf16.msra.mxu1 (!%p164_p2), %v451_v16 }
   0xd   : > { %s534_s19 = smov (!%p190_p3, %s408_s19), 3 }
   0xe   : > { %s409_s20 = sshll.u32 %s534_s19, 2  ;;  %s411_s29 = sshll.u32 %s534_s19, 3 }
   0xf   : > { %s193_s23 = scalar_lea.vmem %s528_s0, %s409_s20  ;;  %s199_s6 = scalar_lea.vmem %s532_s4, %s411_s29 }
  0x10   : > { %v450_v2 = vld [vmem:[%s193_s23] sm:$0xff]  }
  0x11   : > { %429 = vmatmul.mubr.msk.bf16.vlgmr.msra.gmra.mrb[0].mxu0 %vm224_vm1, %v450_v2 }
  0xe4   : > { %v262_v4 = vpop.f32.mrb[0].mxu0 }
  0xe5   : > { %v263_v5 = vadd.f32 %v412_v3, %v262_v4  ;;  %v430_v6 = vpop.f32.mrb[1].mxu0 }
  0xe6   : > { %v265_v7 = vpop.f32.mrb[2].mxu0 }
  0xe7   : > { %v416_v8 = vmul.f32 -1.442695, %v263_v5  ;;  %v266_v9 = vadd.f32 %v412_v3, %v265_v7  ;;  %v431_v10 = vpop.f32.mrb[3].mxu0 }
  0xe9   : > { %452 = vpow2.f32 %v416_v8  ;;  %v417_v11 = vmul.f32 -1.442695, %v266_v9 }
  0xeb   : > { %454 = vpow2.f32 %v417_v11 }
  0xf3   : > { %v453_v12 = vpop.eup %452 }
  0xf4   : > { %v275_v13 = vadd.f32 1.0, %v453_v12 }
  0xf5   : > { %v455_v14 = vpop.eup %454 }
  0xf6   : > { %456 = vrcp.f32 %v275_v13  ;;  %v276_v15 = vadd.f32 1.0, %v455_v14 }
  0xf8   : > { %458 = vrcp.f32 %v276_v15 }
 0x100   : > { %v457_v17 = vpop.eup %456 }
 0x101   : > { %283 = vrot.lane.b32.xlu0 %v457_v17, %s470_s28 }
 0x102   : > { %v459_v18 = vpop.eup %458 }
 0x105   : > { %285 = vrot.lane.b32.xlu0 %v459_v18, %s470_s28 }
 0x173   : > { %v284_v19 = vpop.permute.xlu0 %283 }
 0x174   : > { %v289_v21 = vmul.f32 %v284_v19, %v263_v5 }
 0x177   : > { %v286_v20 = vpop.permute.xlu0 %285 }
 0x178   : > { %v290_v22 = vmul.f32 %v286_v20, %v266_v9 }
 0x17a   : > { %v291_v23 = vpack.c.bf16 %v290_v22, %v289_v21 }
 0x17c   : > { %435 = vmatmul.mubr.msk.bf16.vlgmr.msra.gmra.mrb[0].mxu1 %vm224_vm1, %v291_v23 }
 0x24f   : > { %v337_v24 = vpop.f32.mrb[0].mxu1 }
 0x250   : > { %345 = vst.msk [vmem:[%s199_s6] sm:$0xff] %vm344_vm2, %v337_v24  ;;  %v436_v25 = vpop.f32.mrb[1].mxu1 }
 0x251   : > { %v340_v26 = vpop.f32.mrb[2].mxu1 }
 0x252   : > { %346 = vst.msk [vmem:[%s199_s6 + $0x8] sm:$0xff] %vm344_vm2, %v340_v26  ;;  %v437_v27 = vpop.f32.mrb[3].mxu1 }
 0x253 PF: > { %s14_s15 = sadd.s32 1, %s466_s15  }
 0x254   : > { %p11_p4 = scmp.ge.s32.totalorder %s14_s15, 4  }
 0x256   :  { %13 = sbr.rel (!%p11_p4) target bundleno = 1 (0x1), region = 66 }

// kernel: demucs_forward.27
= control target key start
LH: loop header
LB: loop body
LE: loop exit
PB: predicated region body
PF: predicated region fallthrough
CT: control target
= control target key end

     0   :  { %s1158_s15 = smov 0   ;;  %s1160_s16 = smov 0   ;;  %s1370_s0 = inlined_call_operand.vmem [shape: bf16[136,8], index: 0, kind: input, shape index: {}]   ;;  %s1371_s1 = inlined_call_operand.vmem [shape: bf16[8,16], index: 1, kind: input, shape index: {}]   ;;  %s1372_s2 = inlined_call_operand.vmem [shape: f32[1,16], index: 2, kind: input, shape index: {}]   ;;  %s1373_s3 = inlined_call_operand.vmem [shape: bf16[8,8], index: 3, kind: input, shape index: {}]   ;;  %s1374_s4 = inlined_call_operand.vmem [shape: f32[136,8], index: 4, kind: output, shape index: {}]  }
   0x1   :  { %s1162_s17 = smov 0  }
   0x2 LB: > { %s1171_s18 = sadd.s32 4294967295, %s1096_s17   ;;  %s1173_s19 = sadd.s32 1, %s1096_s17   ;;  %s1096_s17 = sphi %s1162_s17, %s1381_s17   ;;  %s1092_s16 = sphi %s1160_s16, %s1380_s16   ;;  %s1088_s15 = sphi %s1158_s15, %s1379_s15  }
   0x3   : > { %s107_s20 = ssub.s32 %s1096_s17, %s1173_s19  ;;  %s110_s21 = sadd.s32 1, %s1092_s16 }
   0x4   : > { %p108_p0 = scmp.eq.s32.totalorder %s107_s20, 0  ;;  %p120_p1 = scmp.ne.s32.totalorder %s1092_s16, %s1088_s15 }
   0x5   : > { %p121_p2 = scmp.eq.s32.totalorder %s1171_s18, 1  ;;  %p808_p3 = scmp.ge.s32.totalorder %s1096_s17, 1 }
   0x6   : > { %s1181_s22 = scalar_select %p108_p0, %s1092_s16, %s110_s21  }
   0x7   : > { %p1183_p4 = por %p121_p2, %p120_p1  ;;  %p171_p5 = scmp.lt.s32.totalorder %s1096_s17, 3 }
   0x9   : > { %p172_p6 = pnand %p808_p3, %p171_p5 }
   0xa   : > { %v229_v0 = vld [vmem:[%s1371_s1] sm:$0xf] (!%p172_p6)  ;;  %vm276_vm0 = vcmask (!%p172_p6), 1043456   ;;  %s1191_s26 = smul.u32 (!%p172_p6), 9, %s1171_s18  ;;  %v1130_v1 = vmov (!%p172_p6), 0.0   ;;  %vm1131_vm1 = vmmov (!%p172_p6), 0  }
   0xb   : > { %175 = sbr.rel (%p172_p6) target bundleno = 694 (0x2b6), region = 36  ;;  %860 = vmatprep.subr.bf16.mxu0 (!%p172_p6), %v1130_v1  ;;  %v278_v2 = vsel (!%p172_p6), %vm276_vm0, %v229_v0, 0  ;;  %862 = vmatprep.mubr.msk.bf16.mxu0 (!%p172_p6), %vm1131_vm1, %v1130_v1  ;;  %vm260_vm2 = vcmask (!%p172_p6), 64512   ;;  %v1221_v8 = vld [vmem:[%s1372_s2] ss:$0 sm:$0xff] (!%p172_p6)  ;;  %s1132_s10 = smov (!%p172_p6), 120  }
   0xc   : > { %861 = vmatpush3.bf16.msra.mxu0 (!%p172_p6), %v278_v2  ;;  %p205_p7 = scmp.lt.s32.totalorder (!%p172_p6), %s1191_s26, 16  ;;  %882 = vmatprep.subr.bf16.mxu1 (!%p172_p6), %v1130_v1  ;;  %v456_v36 = vld [vmem:[%s1373_s3] sm:$0xf] (!%p172_p6)  ;;  %s197_s11 = sand.u32 (!%p172_p6), 1, %s1088_s15  }
   0xd   : > { %884 = vmatprep.mubr.msk.bf16.mxu1 (!%p172_p6), %vm1131_vm1, %v1130_v1  ;;  %v473_v37 = vsel (!%p172_p6), %vm276_vm0, %v456_v36, 0  ;;  %s904_s12 = smul.u32 (!%p172_p6), 72, %s197_s11 }
   0xe   : > { %883 = vmatpush3.bf16.msra.mxu1 (!%p172_p6), %v473_v37 }
   0xf   : > { %s1291_s13 = scalar_lea.vmem (!%p172_p6), [#allocation2], %s904_s12  }
  0x12   : > { %s206_s27 = scalar_select %p205_p7, %s1191_s26, 16 }
  0x13   : > { %s564_s14 = ssub.s32 (%p1183_p4), 17, %s1191_s26  ;;  %s847_s15 = smul.u32 (%p1183_p4), 72, %s1171_s18 }
  0x14   : > { %s809_s28 = sshll.u32 %s206_s27, 2  ;;  %p565_p8 = scmp.lt.s32.totalorder (%p1183_p4), %s564_s14, 9 }
  0x15   : > { %s208_s5 = scalar_lea.vmem %s1370_s0, %s809_s28  ;;  %s1318_s21 = scalar_lea.vmem (%p1183_p4), %s1374_s4, %s847_s15  }
  0x16   : > { %v997_v3 = vld [vmem:[%s208_s5] sm:$0xff]   ;;  %v998_v4 = vld [vmem:[%s208_s5 + $0x8] sm:$0xff]   ;;  %v999_v5 = vld [vmem:[%s208_s5 + $0x10] sm:$0xff]  }
  0x17   : > { %863 = vmatmul.mubr.msk.bf16.vlgmr.msra.gmra.mrb[0].mxu0 %vm260_vm2, %v997_v3  ;;  %v1000_v6 = vld [vmem:[%s208_s5 + $0x18] sm:$0xff]   ;;  %v1001_v7 = vld [vmem:[%s208_s5 + $0x20] ss:$0 sps:$4 sm:$0xff]  }
  0x18   : > { %866 = vmatprep.mubr.msk.bf16.mxu0 %vm1131_vm1, %v1130_v1 }
  0x1f   : > { %867 = vmatmul.mubr.msk.bf16.gmra.mrb[4].mxu0 %vm260_vm2, %v998_v4 }
  0x20   : > { %870 = vmatprep.mubr.msk.bf16.mxu0 %vm1131_vm1, %v1130_v1 }
  0x27   : > { %871 = vmatmul.mubr.msk.bf16.gmra.mrb[8].mxu0 %vm260_vm2, %v999_v5 }
  0x28   : > { %874 = vmatprep.mubr.msk.bf16.mxu0 %vm1131_vm1, %v1130_v1 }
  0x2f   : > { %875 = vmatmul.mubr.msk.bf16.gmra.mrb[12].mxu0 %vm260_vm2, %v1000_v6 }
  0x30   : > { %878 = vmatprep.mubr.msk.bf16.mxu0 %vm1131_vm1, %v1130_v1 }
  0x37   : > { %879 = vmatmul.mubr.msk.bf16.gmra.mrb[16].mxu0 %vm260_vm2, %v1001_v7 }
  0xea   : > { %v314_v9 = vpop.f32.mrb[0].mxu0 }
  0xeb   : > { %v1224_v10 = vadd.f32 %v1221_v8, %v314_v9  ;;  %v864_v11 = vpop.f32.mrb[1].mxu0 }
  0xec   : > { %v317_v12 = vpop.f32.mrb[2].mxu0 }
  0xed   : > { %v821_v13 = vmul.f32 -1.442695, %v1224_v10  ;;  %v1228_v14 = vadd.f32 %v1221_v8, %v317_v12  ;;  %v865_v15 = vpop.f32.mrb[3].mxu0 }
  0xef   : > { %1002 = vpow2.f32 %v821_v13  ;;  %v822_v16 = vmul.f32 -1.442695, %v1228_v14 }
  0xf1   : > { %1004 = vpow2.f32 %v822_v16 }
  0xf2   : > { %v322_v17 = vpop.f32.mrb[4].mxu0 }
  0xf3   : > { %v1232_v18 = vadd.f32 %v1221_v8, %v322_v17  ;;  %v868_v19 = vpop.f32.mrb[5].mxu0 }
  0xf4   : > { %v325_v20 = vpop.f32.mrb[6].mxu0 }
  0xf5   : > { %v823_v21 = vmul.f32 -1.442695, %v1232_v18  ;;  %v1236_v22 = vadd.f32 %v1221_v8, %v325_v20  ;;  %v869_v23 = vpop.f32.mrb[7].mxu0 }
  0xf7   : > { %1006 = vpow2.f32 %v823_v21  ;;  %v824_v24 = vmul.f32 -1.442695, %v1236_v22 }
  0xf9   : > { %v1003_v25 = vpop.eup %1002  ;;  %1008 = vpow2.f32 %v824_v24 }
  0xfa   : > { %v379_v26 = vadd.f32 1.0, %v1003_v25  ;;  %v330_v27 = vpop.f32.mrb[8].mxu0 }
  0xfb   : > { %v1005_v28 = vpop.eup %1004  ;;  %v1240_v29 = vadd.f32 %v1221_v8, %v330_v27  ;;  %v872_v30 = vpop.f32.mrb[9].mxu0 }
  0xfc   : > { %1010 = vrcp.f32 %v379_v26  ;;  %v380_v31 = vadd.f32 1.0, %v1005_v28  ;;  %v333_v32 = vpop.f32.mrb[10].mxu0 }
  0xfd   : > { %v825_v33 = vmul.f32 -1.442695, %v1240_v29  ;;  %v1244_v34 = vadd.f32 %v1221_v8, %v333_v32  ;;  %v873_v35 = vpop.f32.mrb[11].mxu0 }
  0xff   : > { %1012 = vpow2.f32 %v825_v33  ;;  %v826_v38 = vmul.f32 -1.442695, %v1244_v34 }
 0x100   : > { %1014 = vrcp.f32 %v380_v31 }
 0x101   : > { %v1007_v39 = vpop.eup %1006  ;;  %1016 = vpow2.f32 %v826_v38 }
 0x102   : > { %v381_v40 = vadd.f32 1.0, %v1007_v39  ;;  %v338_v41 = vpop.f32.mrb[12].mxu0 }
 0x103   : > { %v1009_v42 = vpop.eup %1008  ;;  %v1252_v43 = vadd.f32 %v1221_v8, %v338_v41  ;;  %v876_v44 = vpop.f32.mrb[13].mxu0 }
 0x104   : > { %1018 = vrcp.f32 %v381_v40  ;;  %v382_v45 = vadd.f32 1.0, %v1009_v42  ;;  %v341_v46 = vpop.f32.mrb[14].mxu0 }
 0x105   : > { %v827_v47 = vmul.f32 -1.442695, %v1252_v43  ;;  %v1256_v48 = vadd.f32 %v1221_v8, %v341_v46  ;;  %v877_v49 = vpop.f32.mrb[15].mxu0 }
 0x106   : > { %v1011_v50 = vpop.eup %1010 }
 0x107   : > { %1020 = vpow2.f32 %v827_v47  ;;  %v828_v51 = vmul.f32 -1.442695, %v1256_v48  ;;  %415 = vrot.lane.b32.xlu0 %v1011_v50, %s1132_s10 }
 0x108   : > { %1022 = vrcp.f32 %v382_v45 }
 0x109   : > { %v1013_v52 = vpop.eup %1012  ;;  %1024 = vpow2.f32 %v828_v51 }
 0x10a   : > { %v1015_v53 = vpop.eup %1014  ;;  %v383_v54 = vadd.f32 1.0, %v1013_v52  ;;  %v346_v55 = vpop.f32.mrb[16].mxu0 }
 0x10b   : > { %v1017_v56 = vpop.eup %1016  ;;  %v347_v57 = vadd.f32 %v1221_v8, %v346_v55  ;;  %417 = vrot.lane.b32.xlu0 %v1015_v53, %s1132_s10  ;;  %v880_v58 = vpop.f32.mrb[17].mxu0 }
 0x10c   : > { %1026 = vrcp.f32 %v383_v54  ;;  %v384_v59 = vadd.f32 1.0, %v1017_v56  ;;  %v349_v60 = vpop.f32.mrb[18].mxu0 }
 0x10d   : > { %v829_v61 = vmul.f32 -1.442695, %v347_v57  ;;  %v881_v62 = vpop.f32.mrb[19].mxu0 }
 0x10e   : > { %v1019_v63 = vpop.eup %1018  ;;  %1028 = vrcp.f32 %v384_v59 }
 0x10f   : > { %1030 = vpow2.f32 %v829_v61  ;;  %419 = vrot.lane.b32.xlu1 %v1019_v63, %s1132_s10 }
 0x111   : > { %v1021_v0 = vpop.eup %1020 }
 0x112   : > { %v1023_v2 = vpop.eup %1022  ;;  %v385_v3 = vadd.f32 1.0, %v1021_v0 }
 0x113   : > { %v1025_v4 = vpop.eup %1024  ;;  %421 = vrot.lane.b32.xlu1 %v1023_v2, %s1132_s10 }
 0x114   : > { %1032 = vrcp.f32 %v385_v3  ;;  %v386_v5 = vadd.f32 1.0, %v1025_v4 }
 0x116   : > { %v1027_v6 = vpop.eup %1026  ;;  %1034 = vrcp.f32 %v386_v5 }
 0x117   : > { %423 = vrot.lane.b32.xlu0 %v1027_v6, %s1132_s10 }
 0x118   : > { %v1029_v7 = vpop.eup %1028 }
 0x119   : > { %v1031_v8 = vpop.eup %1030  ;;  %425 = vrot.lane.b32.xlu1 %v1029_v7, %s1132_s10 }
 0x11a   : > { %v387_v9 = vadd.f32 1.0, %v1031_v8 }
 0x11c   : > { %1036 = vrcp.f32 %v387_v9 }
 0x11e   : > { %v1033_v11 = vpop.eup %1032 }
 0x11f   : > { %427 = vrot.lane.b32.xlu0 %v1033_v11, %s1132_s10 }
 0x120   : > { %v1035_v12 = vpop.eup %1034 }
 0x121   : > { %429 = vrot.lane.b32.xlu1 %v1035_v12, %s1132_s10 }
 0x126   : > { %v1037_v13 = vpop.eup %1036 }
 0x127   : > { %431 = vrot.lane.b32.xlu0 %v1037_v13, %s1132_s10 }
 0x179   : > { %v416_v15 = vpop.permute.xlu0 %415 }
 0x17a   : > { %v442_v17 = vmul.f32 %v416_v15, %v1224_v10 }
 0x17d   : > { %v418_v16 = vpop.permute.xlu0 %417 }
 0x17e   : > { %v443_v19 = vmul.f32 %v418_v16, %v1228_v14 }
 0x180   : > { %v451_v20 = vpack.c.bf16 %v443_v19, %v442_v17 }
 0x181   : > { %v420_v21 = vpop.permute.xlu1 %419 }
 0x182   : > { %885 = vmatmul.mubr.msk.bf16.vlgmr.msra.gmra.mrb[0].mxu1 %vm260_vm2, %v451_v20  ;;  %v444_v24 = vmul.f32 %v420_v21, %v1232_v18 }
 0x183   : > { %888 = vmatprep.mubr.msk.bf16.mxu1 %vm1131_vm1, %v1130_v1 }
 0x185   : > { %v422_v23 = vpop.permute.xlu1 %421 }
 0x186   : > { %v445_v25 = vmul.f32 %v422_v23, %v1236_v22 }
 0x188   : > { %v452_v26 = vpack.c.bf16 %v445_v25, %v444_v24 }
 0x189   : > { %v424_v27 = vpop.permute.xlu0 %423 }
 0x18a   : > { %889 = vmatmul.mubr.msk.bf16.gmra.mrb[4].mxu1 %vm260_vm2, %v452_v26  ;;  %v446_v14 = vmul.f32 %v424_v27, %v1240_v29 }
 0x18b   : > { %v426_v28 = vpop.permute.xlu1 %425  ;;  %892 = vmatprep.mubr.msk.bf16.mxu1 %vm1131_vm1, %v1130_v1 }
 0x18c   : > { %v447_v10 = vmul.f32 %v426_v28, %v1244_v34 }
 0x18e   : > { %v453_v30 = vpack.c.bf16 %v447_v10, %v446_v14 }
 0x191   : > { %v428_v31 = vpop.permute.xlu0 %427 }
 0x192   : > { %893 = vmatmul.mubr.msk.bf16.gmra.mrb[8].mxu1 %vm260_vm2, %v453_v30  ;;  %v448_v32 = vmul.f32 %v428_v31, %v1252_v43 }
 0x193   : > { %v430_v18 = vpop.permute.xlu1 %429  ;;  %896 = vmatprep.mubr.msk.bf16.mxu1 %vm1131_vm1, %v1130_v1 }
 0x194   : > { %v449_v22 = vmul.f32 %v430_v18, %v1256_v48 }
 0x196   : > { %v454_v33 = vpack.c.bf16 %v449_v22, %v448_v32 }
 0x199   : > { %v432_v35 = vpop.permute.xlu0 %431 }
 0x19a   : > { %897 = vmatmul.mubr.msk.bf16.gmra.mrb[12].mxu1 %vm260_vm2, %v454_v33  ;;  %v450_v29 = vmul.f32 %v432_v35, %v347_v57 }
 0x19b   : > { %900 = vmatprep.mubr.msk.bf16.mxu1 %vm1131_vm1, %v1130_v1 }
 0x19c   : > { %v455_v34 = vpack.c.bf16 %v450_v29, %v450_v29 }
 0x1a2   : > { %901 = vmatmul.mubr.msk.bf16.gmra.mrb[16].mxu1 %vm260_vm2, %v455_v34 }
 0x255   : > { %v509_v36 = vpop.f32.mrb[0].mxu1 }
 0x256   : > { %547 = vst.msk [vmem:[%s1291_s13] sm:$0xff] %vm260_vm2, %v509_v36  ;;  %v886_v37 = vpop.f32.mrb[1].mxu1 }
 0x257   : > { %v512_v38 = vpop.f32.mrb[2].mxu1 }
 0x258   : > { %548 = vst.msk [vmem:[%s1291_s13 + $0x8] sm:$0xff] %vm260_vm2, %v512_v38  ;;  %v887_v1 = vpop.f32.mrb[3].mxu1 }
 0x25d   : > { %v517_v39 = vpop.f32.mrb[4].mxu1 }
 0x25e   : > { %549 = vst.msk [vmem:[%s1291_s13 + $0x10] sm:$0xff] %vm260_vm2, %v517_v39  ;;  %v890_v40 = vpop.f32.mrb[5].mxu1 }
 0x25f   : > { %v520_v41 = vpop.f32.mrb[6].mxu1 }
 0x260   : > { %550 = vst.msk [vmem:[%s1291_s13 + $0x18] sm:$0xff] %vm260_vm2, %v520_v41  ;;  %v891_v42 = vpop.f32.mrb[7].mxu1 }
 0x265   : > { %v525_v43 = vpop.f32.mrb[8].mxu1 }
 0x266   : > { %551 = vst.msk [vmem:[%s1291_s13 + $0x20] sm:$0xff] %vm260_vm2, %v525_v43  ;;  %v894_v44 = vpop.f32.mrb[9].mxu1 }
 0x267   : > { %v528_v45 = vpop.f32.mrb[10].mxu1 }
 0x268   : > { %552 = vst.msk [vmem:[%s1291_s13 + $0x28] sm:$0xff] %vm260_vm2, %v528_v45  ;;  %v895_v46 = vpop.f32.mrb[11].mxu1 }
 0x26d   : > { %v533_v47 = vpop.f32.mrb[12].mxu1 }
 0x26e   : > { %553 = vst.msk [vmem:[%s1291_s13 + $0x30] sm:$0xff] %vm260_vm2, %v533_v47  ;;  %v898_v48 = vpop.f32.mrb[13].mxu1 }
 0x26f   : > { %v536_v49 = vpop.f32.mrb[14].mxu1 }
 0x270   : > { %554 = vst.msk [vmem:[%s1291_s13 + $0x38] sm:$0xff] %vm260_vm2, %v536_v49  ;;  %v899_v50 = vpop.f32.mrb[15].mxu1 }
 0x272   : > { %562 = sbr.rel (!%p1183_p4) target bundleno = 694 (0x2b6), region = 40 }
 0x275   : > { %v541_v51 = vpop.f32.mrb[16].mxu1 }
 0x276   : > { %555 = vst.msk [vmem:[%s1291_s13 + $0x40] sm:$0xff] %vm260_vm2, %v541_v51  ;;  %v902_v52 = vpop.f32.mrb[17].mxu1 }
 0x277   : > { %v544_v53 = vpop.f32.mrb[18].mxu1 }
 0x278   : > { %v903_v54 = vpop.f32.mrb[19].mxu1 }
 0x279   : > { %s1383_s14 = smov (!%p565_p8, %s564_s14), 9 }
 0x27a   : > { %s835_s24 = sshll.u32 %s1383_s14, 7 }
 0x27b   : > { %p838_p9 = scmp.eq.s32.totalorder %s835_s24, 0 }
 0x27c   : > { %1038 = sdivrem.u32 (!%p838_p9), %s1383_s14, 9 }
 0x27d   : > { %573 = sbr.rel (%p838_p9) target bundleno = 694 (0x2b6), region = 44 }
 0x285   : > { %s1324_s23 = spop.drf %1038 }
 0x286   : > { %p839_p10 = scmp.le.s32.totalorder %s1324_s23, 0 }
 0x287   : > { %s1376_s18 = smov (!%p839_p10), %s1318_s21  ;;  %s1377_s25 = smov (!%p839_p10), %s1291_s13 }
 0x288   : > { %761 = sbr.rel (%p839_p10) target bundleno = 665 (0x299), region = 120  ;;  %s1333_s26 = smov (!%p839_p10), 0  }
 0x289   : > { %s1335_s27 = smov (!%p839_p10), 0  }
 0x28f LB: >> { %v653_v55 = vld [vmem:[%s1104_s25] sm:$0xff]  ;;  %v655_v56 = vld [vmem:[%s1104_s25 + $0x8] sm:$0xff]  ;;  %v657_v57 = vld [vmem:[%s1104_s25 + $0x10] sm:$0xff]  ;;  %s671_s28 = sadd.s32 1, %s1108_s26  ;;  %s647_s27 = sadd.s32 1, %s1112_s27   ;;  %s1112_s27 = sphi %s1335_s27, %s647_s27   ;;  %s1108_s26 = sphi %s1333_s26, %s1378_s26   ;;  %s1104_s25 = sphi %s1377_s25, %s676_s25   ;;  %s1100_s18 = sphi %s1376_s18, %s677_s18  }
 0x290   : >> { %654 = vst [vmem:[%s1100_s18] sm:$0xff] %v653_v55  ;;  %656 = vst [vmem:[%s1100_s18 + $0x8] sm:$0xff] %v655_v56  ;;  %v659_v58 = vld [vmem:[%s1104_s25 + $0x18] sm:$0xff]  ;;  %v661_v59 = vld [vmem:[%s1104_s25 + $0x20] sm:$0xff]  ;;  %p672_p11 = scmp.ge.s32.totalorder %s671_s28, %s1324_s23  ;;  %p646_p12 = scmp.ge.s32.totalorder %s647_s27, %s1324_s23 }
 0x291   : >> { %658 = vst [vmem:[%s1100_s18 + $0x10] sm:$0xff] %v657_v57  ;;  %v663_v60 = vld [vmem:[%s1104_s25 + $0x28] sm:$0xff]  ;;  %660 = vst [vmem:[%s1100_s18 + $0x18] sm:$0xff] %v659_v58  ;;  %v665_v61 = vld [vmem:[%s1104_s25 + $0x30] sm:$0xff] }
 0x292   : >> { %662 = vst [vmem:[%s1100_s18 + $0x20] sm:$0xff] %v661_v59  ;;  %664 = vst [vmem:[%s1100_s18 + $0x28] sm:$0xff] %v663_v60  ;;  %v667_v62 = vld [vmem:[%s1104_s25 + $0x38] sm:$0xff]  ;;  %v669_v63 = vld [vmem:[%s1104_s25 + $0x40] sm:$0xff]  ;;  %s1385_s28 = smov (%p672_p11, %s671_s28), 0  ;;  %649 = sbr.rel (!%p646_p12) target bundleno = 655 (0x28f), region = 126 }
 0x293   : >> { %666 = vst [vmem:[%s1100_s18 + $0x30] sm:$0xff] %v665_v61  ;;  %668 = vst [vmem:[%s1100_s18 + $0x38] sm:$0xff] %v667_v62  ;;  %s674_s29 = smul.u32 72, %s1385_s28  ;;  %s1378_s26 = smov %s1385_s28 }
 0x294   : >> { %670 = vst [vmem:[%s1100_s18 + $0x40] sm:$0xff] %v669_v63 }
 0x295   : >> { %s676_s25 = scalar_lea.vmem %s1291_s13, %s674_s29 [#allocation2]   ;;  %s677_s18 = scalar_lea.vmem %s1318_s21, %s674_s29  }
 0x299 PF: > { %1040 = sdivrem.u32 %s1383_s14, 9 }
 0x29a   : > { %s840_s30 = smul.u32 72, %s1324_s23 }
 0x29c   : > { %s682_s5 = scalar_lea.vmem %s1291_s13, %s840_s30 [#allocation2]   ;;  %s684_s6 = scalar_lea.vmem %s1318_s21, %s840_s30  }
 0x2a2   : > { %s1041_s7 = spop.drf %1040 }
 0x2a3   : > { %p842_p13 = scmp.le.s32.totalorder %s1041_s7, 0 }
 0x2a4   : > { %s1114_s8 = smov (!%p842_p13), %s684_s6   ;;  %s1118_s9 = smov (!%p842_p13), %s682_s5  }
 0x2a5   : > { %775 = sbr.rel (%p842_p13) target bundleno = 694 (0x2b6), region = 131  ;;  %s1122_s10 = smov (!%p842_p13), 0  }
 0x2a6   : > { %s1126_s11 = smov (!%p842_p13), 0  }
 0x2ac LB: >> { %v694_v0 = vld [vmem:[%s1120_s9] sm:$0xff]  ;;  %s696_s12 = sadd.s32 1, %s1124_s10  ;;  %s688_s11 = sadd.s32 1, %s1128_s11   ;;  %s1128_s11 = sphi %s1126_s11, %s688_s11   ;;  %s1124_s10 = sphi %s1122_s10, %s1123_s10   ;;  %s1120_s9 = sphi %s1118_s9, %s701_s9   ;;  %s1116_s8 = sphi %s1114_s8, %s702_s8  }
 0x2ad   : >> { %695 = vst [vmem:[%s1116_s8] sm:$0xff] %v694_v0  ;;  %p697_p0 = scmp.ge.s32.totalorder %s696_s12, %s1041_s7  ;;  %p687_p1 = scmp.ge.s32.totalorder %s688_s11, %s1041_s7 }
 0x2af   : >> { %s1387_s12 = smov (%p697_p0, %s696_s12), 0  ;;  %690 = sbr.rel (!%p687_p1) target bundleno = 684 (0x2ac), region = 137 }
 0x2b0   : >> { %s843_s13 = sshll.u32 %s1387_s12, 3  ;;  %s1123_s10 = smov %s1387_s12  }
 0x2b1   : >> { %s701_s9 = scalar_lea.vmem %s682_s5, %s843_s13 [#allocation2]   ;;  %s702_s8 = scalar_lea.vmem %s684_s6, %s843_s13  }
 0x2b6 PF: > { %p11_p2 = scmp.ge.s32.totalorder %s1173_s19, 4   ;;  %s1379_s15 = smov %s1092_s16 }
 0x2b7   : > { %s1380_s16 = smov %s1181_s22  ;;  %s1381_s17 = smov %s1173_s19 }
 0x2b8   :  { %13 = sbr.rel (!%p11_p2) target bundleno = 2 (0x2), region = 148 }

</bundles_post_ra>
